<compile_context>
chip_gen: v7x
topology: tpu7x:2x2x1
jax: 0.10.0
libtpu: 0.0.40
codegen_flags: <defaults>
</compile_context>

<pallas_src>
import functools

import jax
import jax.numpy as jnp
from jax import lax
from jax.experimental import pallas as pl
from jax.experimental.pallas import tpu as pltpu

# ---- module hyper-parameters (defaults of AnimationIDAttention) ----
D = 320                    # query_dim / out_dim
HEADS = 5
DH = 64                    # dim_head
INNER = HEADS * DH         # 320 (hidden_size)
DC = 1024                  # cross_attention_dim
NUM_IP_TOKENS = 4
SCALE = DH ** -0.5         # F.scaled_dot_product_attention default: 1/sqrt(head_dim)


# ----------------------------- kernel 1: K/V proj ----------------------------
def kv_proj_kernel(e_ref, wk_ref, wv_ref, kh_ref, vh_ref):
    # e_ref : (1, Lf, DC) f32   full encoder states (text + IP tokens)
    # wk/wv : (DC, INNER) bf16
    # kh/vh : (1, HEADS, Lf, DH) bf16 — head-major K / V (relayout happens ONCE here)
    e16 = e_ref[0].astype(jnp.bfloat16)                                   # (Lf, DC)
    k = jnp.dot(e16, wk_ref[...], preferred_element_type=jnp.float32)     # (Lf, INNER)
    v = jnp.dot(e16, wv_ref[...], preferred_element_type=jnp.float32)
    lf = k.shape[0]
    # bf16 BEFORE the lane-splitting head relayout (halves bytes moved)
    kh_ref[0] = jnp.transpose(k.astype(jnp.bfloat16).reshape(lf, HEADS, DH), (1, 0, 2))
    vh_ref[0] = jnp.transpose(v.astype(jnp.bfloat16).reshape(lf, HEADS, DH), (1, 0, 2))


# ---------------------------- kernel 2: attention ----------------------------
def attention_kernel(x_ref, kh_ref, vh_ref, wq_ref, ctx_ref, *, end_pos):
    # x_ref  : (1, TS, D) f32        query rows of this sequence tile
    # kh/vh  : (1, HEADS, Lf, DH) bf16  head-major keys / values (full encoder)
    # wq_ref : (D, INNER) bf16       softmax scale pre-folded into the weights
    # ctx_ref: (1, TS, INNER) bf16   attention output, heads concatenated lane-dense
    x16 = x_ref[0].astype(jnp.bfloat16)                                   # (TS, D)
    q = jnp.dot(x16, wq_ref[...], preferred_element_type=jnp.float32)     # (TS, INNER), scaled
    ts = q.shape[0]

    # bf16 before the head split/relayout; K/V arrive head-major already.
    qh = jnp.transpose(q.astype(jnp.bfloat16).reshape(ts, HEADS, DH), (1, 0, 2))  # (H,TS,DH)
    kh = kh_ref[0]                                                        # (H, Lf, DH) bf16
    vh = vh_ref[0]

    s = jnp.einsum('hsd,htd->hst', qh, kh,
                   preferred_element_type=jnp.float32)                    # (H, TS, Lf)
    # Mask the trailing NUM_IP_TOKENS key columns (attention is over text tokens only);
    # end_pos is static, so this is a constant select pattern.
    col = lax.broadcasted_iota(jnp.int32, s.shape, 2)
    s = jnp.where(col < end_pos, s, -1e30)

    m = jnp.max(s, axis=-1, keepdims=True)                                # f32 softmax
    ex = jnp.exp(s - m)
    denom = jnp.sum(ex, axis=-1, keepdims=True)
    p = (ex * pl.reciprocal(denom, approx=False)).astype(jnp.bfloat16)    # exact recip

    ctx = jnp.einsum('hst,htd->hsd', p, vh,
                     preferred_element_type=jnp.float32)                  # (H, TS, DH)
    # Merge heads back to (TS, INNER) in bf16 so the out-projection downstream is a
    # single 320-deep lane-dense matmul (no (H,S,D) f32 intermediate, no head-sum).
    ctx_ref[0] = jnp.transpose(ctx.astype(jnp.bfloat16), (1, 0, 2)).reshape(ts, INNER)


# ----------------------- kernel 3: renorm-merge + out-proj --------------------
def merge_proj_kernel(ab_ref, ctx_ref, wo_ref, bo_ref, o_ref):
    # ab_ref : (B, 2) f32 in SMEM — per-batch scalars: merged = a*ctx + b
    # ctx_ref: (1, TS, INNER) bf16
    # wo_ref : (INNER, D) bf16 ; bo_ref: (1, D) f32
    b = pl.program_id(0)
    a = ab_ref[b, 0]
    c = ab_ref[b, 1]
    merged = ctx_ref[0].astype(jnp.float32) * a + c                       # 2 VPU ops
    out = jnp.dot(merged.astype(jnp.bfloat16), wo_ref[...],
                  preferred_element_type=jnp.float32) + bo_ref[...]       # (TS, D)
    o_ref[0] = out.astype(o_ref.dtype)


# --------------------------------- wrapper -----------------------------------
def _seq_tile(s):
    # Prefer >=256-row tiles (MXU row utilization); fall back to the full sequence.
    for ts in (512, 256, 128, 64, 32, 16, 8):
        if s % ts == 0:
            return ts
    return s


def animation_id_attention(hidden_states, encoder_hidden_states, params,
                           out_dtype=jnp.float32):
    # out_dtype=jnp.bfloat16 halves the writeback if downstream accepts it (v5e win).
    B, S, _ = hidden_states.shape
    Lf = encoder_hidden_states.shape[1]
    end_pos = Lf - NUM_IP_TOKENS
    TS = _seq_tile(S)
    n_s = S // TS

    # bf16 weights (MXU operands), SCALE folded into Wq (removes per-score multiply).
    wq = (params["wq"] * SCALE).astype(jnp.bfloat16)                      # (D, INNER)
    wk = params["wk"].astype(jnp.bfloat16)                                # (DC, INNER)
    wv = params["wv"].astype(jnp.bfloat16)                                # (DC, INNER)
    wo = params["wo"].astype(jnp.bfloat16)                                # (INNER, D)
    bo = params["bo"]                                                     # (1, D) f32

    # TODO(synk): id_to_k / id_to_v are initialized by the reference module but unused
    # in the non-xformers forward path (the second SDPA reuses key/value), so they are
    # not passed to the kernels; the xformers branch is not reproduced.

    # ---- 1) K/V projection + head split (full encoder, no wrapper slice) ----
    kh, vh = pl.pallas_call(
        kv_proj_kernel,
        out_shape=(jax.ShapeDtypeStruct((B, HEADS, Lf, DH), jnp.bfloat16),
                   jax.ShapeDtypeStruct((B, HEADS, Lf, DH), jnp.bfloat16)),
        grid=(B,),
        in_specs=[
            pl.BlockSpec((1, Lf, DC), lambda b: (b, 0, 0)),
            pl.BlockSpec((DC, INNER), lambda b: (0, 0)),
            pl.BlockSpec((DC, INNER), lambda b: (0, 0)),
        ],
        out_specs=(
            pl.BlockSpec((1, HEADS, Lf, DH), lambda b: (b, 0, 0, 0)),
            pl.BlockSpec((1, HEADS, Lf, DH), lambda b: (b, 0, 0, 0)),
        ),
        compiler_params=pltpu.CompilerParams(dimension_semantics=("parallel",)),
    )(encoder_hidden_states, wk, wv)

    # ---- 2) attention, tiled over S and parallel over (batch, S-tiles) ------
    ctx = pl.pallas_call(
        functools.partial(attention_kernel, end_pos=end_pos),
        out_shape=jax.ShapeDtypeStruct((B, S, INNER), jnp.bfloat16),
        grid=(B, n_s),
        in_specs=[
            pl.BlockSpec((1, TS, D), lambda b, s: (b, s, 0)),
            pl.BlockSpec((1, HEADS, Lf, DH), lambda b, s: (b, 0, 0, 0)),
            pl.BlockSpec((1, HEADS, Lf, DH), lambda b, s: (b, 0, 0, 0)),
            pl.BlockSpec((D, INNER), lambda b, s: (0, 0)),
        ],
        out_specs=pl.BlockSpec((1, TS, INNER), lambda b, s: (b, s, 0)),
        compiler_params=pltpu.CompilerParams(
            dimension_semantics=("parallel", "parallel"),
            # sized from the actual per-tile working set (~7 MiB at TS=512, L~80);
            # comfortably inside v7x's 64 MiB physical VMEM.
            vmem_limit_bytes=24 * 1024 * 1024),
    )(hidden_states, kh, vh, wq)

    # ---- 3) global IP-renorm stats: stable two-pass, unbiased (torch.std) ---
    # Reference path: ip_hidden_states == hidden_states, so r = std/(std+1e-5) and
    # merged = ctx*(1+r) + mean*(1-r).  Tiny reduction, done in plain jnp.
    ctx32 = ctx.astype(jnp.float32)
    mean = jnp.mean(ctx32, axis=(1, 2))
    std = jnp.std(ctx32, axis=(1, 2), ddof=1)
    r = std / (std + 1e-5)
    ab = jnp.stack([1.0 + r, (1.0 - r) * mean], axis=-1).astype(jnp.float32)   # (B, 2)

    # ---- 4) renorm-merge + single 320-deep out-projection, S-tiled ----------
    out = pl.pallas_call(
        merge_proj_kernel,
        out_shape=jax.ShapeDtypeStruct((B, S, D), out_dtype),
        grid=(B, n_s),
        in_specs=[
            pl.BlockSpec(memory_space=pltpu.MemorySpace.SMEM),   # per-batch (a, b) scalars
            pl.BlockSpec((1, TS, INNER), lambda b, s: (b, s, 0)),
            pl.BlockSpec((INNER, D), lambda b, s: (0, 0)),
            pl.BlockSpec((1, D), lambda b, s: (0, 0)),
        ],
        out_specs=pl.BlockSpec((1, TS, D), lambda b, s: (b, s, 0)),
        compiler_params=pltpu.CompilerParams(
            dimension_semantics=("parallel", "parallel")),
    )(ab, ctx, wo, bo)

    return out


# --------------------------- deterministic params ----------------------------
def init_params(key):
    ks = jax.random.split(key, 8)

    def w(k, shape, scale=0.02):
        return (scale * jax.random.normal(k, shape)).astype(jnp.float32)

    return {
        "wq": w(ks[0], (D, INNER)),        # to_q (bias=False)
        "wk": w(ks[1], (DC, INNER)),       # to_k (bias=False)
        "wv": w(ks[2], (DC, INNER)),       # to_v (bias=False)
        "wo": w(ks[3], (INNER, D)),        # to_out[0] weight (stored in,out)
        "bo": w(ks[4], (1, D), 0.1),       # to_out[0] bias
        # present in the module, dead in the non-xformers forward path:
        "wk_id": w(ks[5], (DC, INNER)),    # id_to_k
        "wv_id": w(ks[6], (DC, INNER)),    # id_to_v
    }


if __name__ == "__main__":
    key = jax.random.PRNGKey(0)
    kx, kenc, kp = jax.random.split(key, 3)

    B, S, L_ENC = 2, 8, 12                 # encoder: 8 text tokens + 4 "IP" tokens
    hidden_states = jax.random.normal(kx, (B, S, D), dtype=jnp.float32)
    encoder_hidden_states = jax.random.normal(kenc, (B, L_ENC, DC), dtype=jnp.float32)
    params = init_params(kp)

    out = jax.jit(animation_id_attention)(hidden_states, encoder_hidden_states, params)
    out = jax.block_until_ready(out)
    assert out.shape == (B, S, D) and out.dtype == jnp.float32
    assert bool(jnp.all(jnp.isfinite(out)))
    print("KERNEL_OK")
</pallas_src>

<mosaic_0001>
module attributes {stable_mosaic.version = 11 : i64} {
  func.func @kv_proj_kernel(%arg0: i32, %arg1: memref<1x12x1024xf32, #tpu.memory_space<vmem>>, %arg2: memref<1024x320xbf16, #tpu.memory_space<vmem>>, %arg3: memref<1024x320xbf16, #tpu.memory_space<vmem>>, %arg4: memref<1x5x12x64xbf16, #tpu.memory_space<vmem>>, %arg5: memref<1x5x12x64xbf16, #tpu.memory_space<vmem>>) attributes {dimension_semantics = [#tpu.dimension_semantics<parallel>], iteration_bounds = array<i64: 2>, scalar_prefetch = 0 : i64, scratch_operands = 0 : i64, tpu.core_type = #tpu.core_type<tc>, window_params = [{transform_indices = @transform_0, window_bounds = array<i64: 1, 12, 1024>}, {pipeline_mode = #tpu.pipeline_mode<synchronous>, transform_indices = @transform_1, window_bounds = array<i64: 1024, 320>}, {pipeline_mode = #tpu.pipeline_mode<synchronous>, transform_indices = @transform_2, window_bounds = array<i64: 1024, 320>}, {transform_indices = @transform_3, window_bounds = array<i64: 1, 5, 12, 64>}, {transform_indices = @transform_4, window_bounds = array<i64: 1, 5, 12, 64>}]} {
    %c0 = arith.constant 0 : index
    %c0_0 = arith.constant 0 : index
    %c0_1 = arith.constant 0 : index
    %0 = vector.load %arg1[%c0, %c0_0, %c0_1] : memref<1x12x1024xf32, #tpu.memory_space<vmem>>, vector<1x12x1024xf32>
    %1 = vector.shape_cast %0 : vector<1x12x1024xf32> to vector<12x1024xf32>
    %2 = arith.truncf %1 : vector<12x1024xf32> to vector<12x1024xbf16>
    %c0_2 = arith.constant 0 : index
    %c0_3 = arith.constant 0 : index
    %3 = vector.load %arg2[%c0_2, %c0_3] : memref<1024x320xbf16, #tpu.memory_space<vmem>>, vector<1024x320xbf16>
    %cst = arith.constant dense<0.000000e+00> : vector<12x320xf32>
    %4 = tpu.matmul %2, %3, %cst {dimension_numbers = #tpu.dot_dimension_numbers<[1], [0], [0], [1], [0, 0, 1, 1], [], []>} : vector<12x1024xbf16>, vector<1024x320xbf16>, vector<12x320xf32> -> vector<12x320xf32>
    %c0_4 = arith.constant 0 : index
    %c0_5 = arith.constant 0 : index
    %5 = vector.load %arg3[%c0_4, %c0_5] : memref<1024x320xbf16, #tpu.memory_space<vmem>>, vector<1024x320xbf16>
    %cst_6 = arith.constant dense<0.000000e+00> : vector<12x320xf32>
    %6 = tpu.matmul %2, %5, %cst_6 {dimension_numbers = #tpu.dot_dimension_numbers<[1], [0], [0], [1], [0, 0, 1, 1], [], []>} : vector<12x1024xbf16>, vector<1024x320xbf16>, vector<12x320xf32> -> vector<12x320xf32>
    %7 = arith.truncf %4 : vector<12x320xf32> to vector<12x320xbf16>
    %8 = vector.shape_cast %7 : vector<12x320xbf16> to vector<12x5x64xbf16>
    %9 = tpu.transpose %8, [1, 0, 2] : vector<12x5x64xbf16> -> vector<5x12x64xbf16>
    %c0_7 = arith.constant 0 : index
    %c0_8 = arith.constant 0 : index
    %c0_9 = arith.constant 0 : index
    %c0_10 = arith.constant 0 : index
    %10 = vector.load %arg4[%c0_7, %c0_8, %c0_9, %c0_10] : memref<1x5x12x64xbf16, #tpu.memory_space<vmem>>, vector<1x5x12x64xbf16>
    %11 = vector.shape_cast %10 : vector<1x5x12x64xbf16> to vector<5x12x64xbf16>
    %12 = vector.shape_cast %9 : vector<5x12x64xbf16> to vector<1x5x12x64xbf16>
    tpu.vector_store %arg4[%c0_7, %c0_8, %c0_9, %c0_10], %12 {strides = array<i32>} : memref<1x5x12x64xbf16, #tpu.memory_space<vmem>>, vector<1x5x12x64xbf16>,
    %13 = arith.truncf %6 : vector<12x320xf32> to vector<12x320xbf16>
    %14 = vector.shape_cast %13 : vector<12x320xbf16> to vector<12x5x64xbf16>
    %15 = tpu.transpose %14, [1, 0, 2] : vector<12x5x64xbf16> -> vector<5x12x64xbf16>
    %c0_11 = arith.constant 0 : index
    %c0_12 = arith.constant 0 : index
    %c0_13 = arith.constant 0 : index
    %c0_14 = arith.constant 0 : index
    %16 = vector.load %arg5[%c0_11, %c0_12, %c0_13, %c0_14] : memref<1x5x12x64xbf16, #tpu.memory_space<vmem>>, vector<1x5x12x64xbf16>
    %17 = vector.shape_cast %16 : vector<1x5x12x64xbf16> to vector<5x12x64xbf16>
    %18 = vector.shape_cast %15 : vector<5x12x64xbf16> to vector<1x5x12x64xbf16>
    tpu.vector_store %arg5[%c0_11, %c0_12, %c0_13, %c0_14], %18 {strides = array<i32>} : memref<1x5x12x64xbf16, #tpu.memory_space<vmem>>, vector<1x5x12x64xbf16>,
    return
  }
  func.func @transform_0(%arg0: i32) -> (i32, i32, i32) {
    %c0_i32 = arith.constant 0 : i32
    %c0_i32_0 = arith.constant 0 : i32
    %c0_i32_1 = arith.constant 0 : i32
    return %arg0, %c0_i32, %c0_i32_0 : i32, i32, i32
  }
  func.func @transform_1(%arg0: i32) -> (i32, i32) {
    %c0_i32 = arith.constant 0 : i32
    %c0_i32_0 = arith.constant 0 : i32
    %c0_i32_1 = arith.constant 0 : i32
    return %c0_i32, %c0_i32_0 : i32, i32
  }
  func.func @transform_2(%arg0: i32) -> (i32, i32) {
    %c0_i32 = arith.constant 0 : i32
    %c0_i32_0 = arith.constant 0 : i32
    %c0_i32_1 = arith.constant 0 : i32
    return %c0_i32, %c0_i32_0 : i32, i32
  }
  func.func @transform_3(%arg0: i32) -> (i32, i32, i32, i32) {
    %c0_i32 = arith.constant 0 : i32
    %c0_i32_0 = arith.constant 0 : i32
    %c0_i32_1 = arith.constant 0 : i32
    %c0_i32_2 = arith.constant 0 : i32
    return %arg0, %c0_i32, %c0_i32_0, %c0_i32_1 : i32, i32, i32, i32
  }
  func.func @transform_4(%arg0: i32) -> (i32, i32, i32, i32) {
    %c0_i32 = arith.constant 0 : i32
    %c0_i32_0 = arith.constant 0 : i32
    %c0_i32_1 = arith.constant 0 : i32
    %c0_i32_2 = arith.constant 0 : i32
    return %arg0, %c0_i32, %c0_i32_0, %c0_i32_1 : i32, i32, i32, i32
  }
}

module attributes {stable_mosaic.version = 11 : i64} {
  func.func @attention_kernel(%arg0: i32, %arg1: i32, %arg2: memref<1x8x320xf32, #tpu.memory_space<vmem>>, %arg3: memref<1x5x12x64xbf16, #tpu.memory_space<vmem>>, %arg4: memref<1x5x12x64xbf16, #tpu.memory_space<vmem>>, %arg5: memref<320x320xbf16, #tpu.memory_space<vmem>>, %arg6: memref<1x8x320xbf16, #tpu.memory_space<vmem>>) attributes {dimension_semantics = [#tpu.dimension_semantics<parallel>, #tpu.dimension_semantics<parallel>], iteration_bounds = array<i64: 2, 1>, scalar_prefetch = 0 : i64, scratch_operands = 0 : i64, tpu.core_type = #tpu.core_type<tc>, window_params = [{transform_indices = @transform_0, window_bounds = array<i64: 1, 8, 320>}, {transform_indices = @transform_1, window_bounds = array<i64: 1, 5, 12, 64>}, {transform_indices = @transform_2, window_bounds = array<i64: 1, 5, 12, 64>}, {pipeline_mode = #tpu.pipeline_mode<synchronous>, transform_indices = @transform_3, window_bounds = array<i64: 320, 320>}, {transform_indices = @transform_4, window_bounds = array<i64: 1, 8, 320>}]} {
    %c0 = arith.constant 0 : index
    %c0_0 = arith.constant 0 : index
    %c0_1 = arith.constant 0 : index
    %0 = vector.load %arg2[%c0, %c0_0, %c0_1] : memref<1x8x320xf32, #tpu.memory_space<vmem>>, vector<1x8x320xf32>
    %1 = vector.shape_cast %0 : vector<1x8x320xf32> to vector<8x320xf32>
    %2 = arith.truncf %1 : vector<8x320xf32> to vector<8x320xbf16>
    %c0_2 = arith.constant 0 : index
    %c0_3 = arith.constant 0 : index
    %3 = vector.load %arg5[%c0_2, %c0_3] : memref<320x320xbf16, #tpu.memory_space<vmem>>, vector<320x320xbf16>
    %cst = arith.constant dense<0.000000e+00> : vector<8x320xf32>
    %4 = tpu.matmul %2, %3, %cst {dimension_numbers = #tpu.dot_dimension_numbers<[1], [0], [0], [1], [0, 0, 1, 1], [], []>} : vector<8x320xbf16>, vector<320x320xbf16>, vector<8x320xf32> -> vector<8x320xf32>
    %5 = arith.truncf %4 : vector<8x320xf32> to vector<8x320xbf16>
    %6 = vector.shape_cast %5 : vector<8x320xbf16> to vector<8x5x64xbf16>
    %7 = tpu.transpose %6, [1, 0, 2] : vector<8x5x64xbf16> -> vector<5x8x64xbf16>
    %c0_4 = arith.constant 0 : index
    %c0_5 = arith.constant 0 : index
    %c0_6 = arith.constant 0 : index
    %c0_7 = arith.constant 0 : index
    %8 = vector.load %arg3[%c0_4, %c0_5, %c0_6, %c0_7] : memref<1x5x12x64xbf16, #tpu.memory_space<vmem>>, vector<1x5x12x64xbf16>
    %9 = vector.shape_cast %8 : vector<1x5x12x64xbf16> to vector<5x12x64xbf16>
    %c0_8 = arith.constant 0 : index
    %c0_9 = arith.constant 0 : index
    %c0_10 = arith.constant 0 : index
    %c0_11 = arith.constant 0 : index
    %10 = vector.load %arg4[%c0_8, %c0_9, %c0_10, %c0_11] : memref<1x5x12x64xbf16, #tpu.memory_space<vmem>>, vector<1x5x12x64xbf16>
    %11 = vector.shape_cast %10 : vector<1x5x12x64xbf16> to vector<5x12x64xbf16>
    "tpu.trace_start"() <{level = 10 : i32, message = "hsd,htd->hst"}> : () -> ()
    %cst_12 = arith.constant dense<0.000000e+00> : vector<5x8x12xf32>
    %12 = tpu.matmul %7, %9, %cst_12 {dimension_numbers = #tpu.dot_dimension_numbers<[2], [2], [1], [1], [0, 0, 0, 1, 1, 1], [0], [0]>} : vector<5x8x64xbf16>, vector<5x12x64xbf16>, vector<5x8x12xf32> -> vector<5x8x12xf32>
    "tpu.trace_stop"() : () -> ()
    %13 = tpu.iota {dimensions = array<i32: 2>} : vector<5x8x12xi32>
    %c8_i32 = arith.constant 8 : i32
    %14 = vector.broadcast %c8_i32 : i32 to vector<5x8x12xi32>
    %15 = arith.cmpi slt, %13, %14 : vector<5x8x12xi32>
    %cst_13 = arith.constant -1.000000e+30 : f32
    %16 = vector.broadcast %cst_13 : f32 to vector<5x8x12xf32>
    %17 = arith.select %15, %12, %16 : vector<5x8x12xi1>, vector<5x8x12xf32>
    %cst_14 = arith.constant dense<0xFF800000> : vector<5x8xf32>
    %18 = vector.multi_reduction <maximumf>, %17, %cst_14 [2] : vector<5x8x12xf32> to vector<5x8xf32>
    %19 = vector.shape_cast %18 : vector<5x8xf32> to vector<5x8x1xf32>
    %20 = vector.broadcast %19 : vector<5x8x1xf32> to vector<5x8x12xf32>
    %21 = arith.subf %17, %20 : vector<5x8x12xf32>
    %22 = math.exp %21 : vector<5x8x12xf32>
    %cst_15 = arith.constant dense<0.000000e+00> : vector<5x8xf32>
    %23 = vector.multi_reduction <add>, %22, %cst_15 [2] : vector<5x8x12xf32> to vector<5x8xf32>
    %24 = vector.shape_cast %23 : vector<5x8xf32> to vector<5x8x1xf32>
    %25 = tpu.reciprocal %24 : vector<5x8x1xf32> -> vector<5x8x1xf32>
    %26 = vector.broadcast %25 : vector<5x8x1xf32> to vector<5x8x12xf32>
    %27 = arith.mulf %22, %26 : vector<5x8x12xf32>
    %28 = arith.truncf %27 : vector<5x8x12xf32> to vector<5x8x12xbf16>
    "tpu.trace_start"() <{level = 10 : i32, message = "hst,htd->hsd"}> : () -> ()
    %cst_16 = arith.constant dense<0.000000e+00> : vector<5x8x64xf32>
    %29 = tpu.matmul %28, %11, %cst_16 {dimension_numbers = #tpu.dot_dimension_numbers<[2], [1], [1], [2], [0, 0, 0, 1, 1, 2], [0], [0]>} : vector<5x8x12xbf16>, vector<5x12x64xbf16>, vector<5x8x64xf32> -> vector<5x8x64xf32>
    "tpu.trace_stop"() : () -> ()
    %30 = arith.truncf %29 : vector<5x8x64xf32> to vector<5x8x64xbf16>
    %31 = tpu.transpose %30, [1, 0, 2] : vector<5x8x64xbf16> -> vector<8x5x64xbf16>
    %32 = vector.shape_cast %31 : vector<8x5x64xbf16> to vector<8x320xbf16>
    %c0_17 = arith.constant 0 : index
    %c0_18 = arith.constant 0 : index
    %c0_19 = arith.constant 0 : index
    %33 = vector.load %arg6[%c0_17, %c0_18, %c0_19] : memref<1x8x320xbf16, #tpu.memory_space<vmem>>, vector<1x8x320xbf16>
    %34 = vector.shape_cast %33 : vector<1x8x320xbf16> to vector<8x320xbf16>
    %35 = vector.shape_cast %32 : vector<8x320xbf16> to vector<1x8x320xbf16>
    tpu.vector_store %arg6[%c0_17, %c0_18, %c0_19], %35 {strides = array<i32>} : memref<1x8x320xbf16, #tpu.memory_space<vmem>>, vector<1x8x320xbf16>,
    return
  }
  func.func @transform_0(%arg0: i32, %arg1: i32) -> (i32, i32, i32) {
    %c0_i32 = arith.constant 0 : i32
    %c0_i32_0 = arith.constant 0 : i32
    return %arg0, %arg1, %c0_i32 : i32, i32, i32
  }
  func.func @transform_1(%arg0: i32, %arg1: i32) -> (i32, i32, i32, i32) {
    %c0_i32 = arith.constant 0 : i32
    %c0_i32_0 = arith.constant 0 : i32
    %c0_i32_1 = arith.constant 0 : i32
    %c0_i32_2 = arith.constant 0 : i32
    return %arg0, %c0_i32, %c0_i32_0, %c0_i32_1 : i32, i32, i32, i32
  }
  func.func @transform_2(%arg0: i32, %arg1: i32) -> (i32, i32, i32, i32) {
    %c0_i32 = arith.constant 0 : i32
    %c0_i32_0 = arith.constant 0 : i32
    %c0_i32_1 = arith.constant 0 : i32
    %c0_i32_2 = arith.constant 0 : i32
    return %arg0, %c0_i32, %c0_i32_0, %c0_i32_1 : i32, i32, i32, i32
  }
  func.func @transform_3(%arg0: i32, %arg1: i32) -> (i32, i32) {
    %c0_i32 = arith.constant 0 : i32
    %c0_i32_0 = arith.constant 0 : i32
    %c0_i32_1 = arith.constant 0 : i32
    return %c0_i32, %c0_i32_0 : i32, i32
  }
  func.func @transform_4(%arg0: i32, %arg1: i32) -> (i32, i32, i32) {
    %c0_i32 = arith.constant 0 : i32
    %c0_i32_0 = arith.constant 0 : i32
    return %arg0, %arg1, %c0_i32 : i32, i32, i32
  }
}

module attributes {stable_mosaic.version = 11 : i64} {
  func.func @merge_proj_kernel(%arg0: i32, %arg1: i32, %arg2: memref<2x2xf32, #tpu.memory_space<smem>>, %arg3: memref<1x8x320xbf16, #tpu.memory_space<vmem>>, %arg4: memref<320x320xbf16, #tpu.memory_space<vmem>>, %arg5: memref<1x320xf32, #tpu.memory_space<vmem>>, %arg6: memref<1x8x320xf32, #tpu.memory_space<vmem>>) attributes {dimension_semantics = [#tpu.dimension_semantics<parallel>, #tpu.dimension_semantics<parallel>], iteration_bounds = array<i64: 2, 1>, scalar_prefetch = 0 : i64, scratch_operands = 0 : i64, tpu.core_type = #tpu.core_type<tc>, window_params = [{transform_indices = @transform_0, window_bounds = array<i64: 2, 2>}, {transform_indices = @transform_1, window_bounds = array<i64: 1, 8, 320>}, {pipeline_mode = #tpu.pipeline_mode<synchronous>, transform_indices = @transform_2, window_bounds = array<i64: 320, 320>}, {pipeline_mode = #tpu.pipeline_mode<synchronous>, transform_indices = @transform_3, window_bounds = array<i64: 1, 320>}, {transform_indices = @transform_4, window_bounds = array<i64: 1, 8, 320>}]} {
    %0 = arith.index_cast %arg0 : i32 to index
    %c0 = arith.constant 0 : index
    %1 = memref.load %arg2[%0, %c0] : memref<2x2xf32, #tpu.memory_space<smem>>
    %2 = arith.index_cast %arg0 : i32 to index
    %c1 = arith.constant 1 : index
    %3 = memref.load %arg2[%2, %c1] : memref<2x2xf32, #tpu.memory_space<smem>>
    %c0_0 = arith.constant 0 : index
    %c0_1 = arith.constant 0 : index
    %c0_2 = arith.constant 0 : index
    %4 = vector.load %arg3[%c0_0, %c0_1, %c0_2] : memref<1x8x320xbf16, #tpu.memory_space<vmem>>, vector<1x8x320xbf16>
    %5 = vector.shape_cast %4 : vector<1x8x320xbf16> to vector<8x320xbf16>
    %6 = arith.extf %5 : vector<8x320xbf16> to vector<8x320xf32>
    %7 = vector.broadcast %1 : f32 to vector<8x320xf32>
    %8 = arith.mulf %6, %7 : vector<8x320xf32>
    %9 = vector.broadcast %3 : f32 to vector<8x320xf32>
    %10 = arith.addf %8, %9 : vector<8x320xf32>
    %11 = arith.truncf %10 : vector<8x320xf32> to vector<8x320xbf16>
    %c0_3 = arith.constant 0 : index
    %c0_4 = arith.constant 0 : index
    %12 = vector.load %arg4[%c0_3, %c0_4] : memref<320x320xbf16, #tpu.memory_space<vmem>>, vector<320x320xbf16>
    %cst = arith.constant dense<0.000000e+00> : vector<8x320xf32>
    %13 = tpu.matmul %11, %12, %cst {dimension_numbers = #tpu.dot_dimension_numbers<[1], [0], [0], [1], [0, 0, 1, 1], [], []>} : vector<8x320xbf16>, vector<320x320xbf16>, vector<8x320xf32> -> vector<8x320xf32>
    %c0_5 = arith.constant 0 : index
    %c0_6 = arith.constant 0 : index
    %14 = vector.load %arg5[%c0_5, %c0_6] : memref<1x320xf32, #tpu.memory_space<vmem>>, vector<1x320xf32>
    %15 = vector.broadcast %14 : vector<1x320xf32> to vector<8x320xf32>
    %16 = arith.addf %13, %15 : vector<8x320xf32>
    %c0_7 = arith.constant 0 : index
    %c0_8 = arith.constant 0 : index
    %c0_9 = arith.constant 0 : index
    %17 = vector.load %arg6[%c0_7, %c0_8, %c0_9] : memref<1x8x320xf32, #tpu.memory_space<vmem>>, vector<1x8x320xf32>
    %18 = vector.shape_cast %17 : vector<1x8x320xf32> to vector<8x320xf32>
    %19 = vector.shape_cast %16 : vector<8x320xf32> to vector<1x8x320xf32>
    tpu.vector_store %arg6[%c0_7, %c0_8, %c0_9], %19 {strides = array<i32>} : memref<1x8x320xf32, #tpu.memory_space<vmem>>, vector<1x8x320xf32>,
    return
  }
  func.func @transform_0(%arg0: i32, %arg1: i32) -> (i32, i32) {
    %c0_i32 = arith.constant 0 : i32
    %c0_i32_0 = arith.constant 0 : i32
    %c0_i32_1 = arith.constant 0 : i32
    return %c0_i32, %c0_i32_0 : i32, i32
  }
  func.func @transform_1(%arg0: i32, %arg1: i32) -> (i32, i32, i32) {
    %c0_i32 = arith.constant 0 : i32
    %c0_i32_0 = arith.constant 0 : i32
    return %arg0, %arg1, %c0_i32 : i32, i32, i32
  }
  func.func @transform_2(%arg0: i32, %arg1: i32) -> (i32, i32) {
    %c0_i32 = arith.constant 0 : i32
    %c0_i32_0 = arith.constant 0 : i32
    %c0_i32_1 = arith.constant 0 : i32
    return %c0_i32, %c0_i32_0 : i32, i32
  }
  func.func @transform_3(%arg0: i32, %arg1: i32) -> (i32, i32) {
    %c0_i32 = arith.constant 0 : i32
    %c0_i32_0 = arith.constant 0 : i32
    %c0_i32_1 = arith.constant 0 : i32
    return %c0_i32, %c0_i32_0 : i32, i32
  }
  func.func @transform_4(%arg0: i32, %arg1: i32) -> (i32, i32, i32) {
    %c0_i32 = arith.constant 0 : i32
    %c0_i32_0 = arith.constant 0 : i32
    return %arg0, %arg1, %c0_i32 : i32, i32, i32
  }
}

</mosaic_0001>

<bundles_post_ra>
// kernel: animation_id_attention.4
= control target key start
LH: loop header
LB: loop body
LE: loop exit
PB: predicated region body
PF: predicated region fallthrough
CT: control target
= control target key end

     0   :  { %s2375_s15 = smov 0   ;;  %s2377_s16 = smov 0   ;;  %s2752_s0 = inlined_call_operand.vmem [shape: f32[2,8,320], index: 0, kind: input, shape index: {}]   ;;  %s2753_s1 = inlined_call_operand.vmem [shape: bf16[2,5,12,64], index: 1, kind: input, shape index: {}]   ;;  %s2754_s2 = inlined_call_operand.vmem [shape: bf16[2,5,12,64], index: 2, kind: input, shape index: {}]   ;;  %s2755_s3 = inlined_call_operand.vmem [shape: bf16[320,320], index: 3, kind: input, shape index: {}]   ;;  %s2756_s4 = inlined_call_operand.vmem [shape: bf16[2,8,320], index: 4, kind: output, shape index: {}]  }
   0x1   :  { %s2379_s17 = smov 0  }
   0x2 LB: > { %s26_s18 = sadd.s32 1, %s2338_s16  ;;  %p1961_p0 = scmp.ge.s32.totalorder %s2342_s17, 1  ;;  %s2342_s17 = sphi %s2379_s17, %s14_s17   ;;  %s2338_s16 = sphi %s2377_s16, %s2758_s16   ;;  %s2334_s15 = sphi %s2375_s15, %s2757_s15  }
   0x3   : > { %p28_p1 = scmp.ge.s32.totalorder %s26_s18, 2  ;;  %p202_p2 = scmp.lt.s32.totalorder %s2342_s17, 3 }
   0x5   : > { %s2760_s18 = smov (%p28_p1, %s26_s18), 0  ;;  %p203_p3 = pnand %p1961_p0, %p202_p2 }
   0x6   : > { %v2210_v0 = vld [vmem:[%s2755_s3 + $0x4] ss:$12 sps:$4 sm:$0xff] (!%p203_p3)   ;;  %v2212_v1 = vld [vmem:[%s2755_s3] ss:$12 sps:$4 sm:$0xff] (!%p203_p3)   ;;  %v2213_v2 = vld [vmem:[%s2755_s3 + $0x1c] ss:$12 sps:$4 sm:$0xff] (!%p203_p3)  }
   0x7   : > { %206 = sbr.rel (%p203_p3) target bundleno = 1360 (0x550), region = 36  ;;  %685 = vmatprep.subr.bf16.mxu0 (!%p203_p3), %v2210_v0  ;;  %v2215_v3 = vld [vmem:[%s2755_s3 + $0x18] ss:$12 sps:$4 sm:$0xff] (!%p203_p3)   ;;  %v2216_v4 = vld [vmem:[%s2755_s3 + $0x34] ss:$12 sps:$4 sm:$0xff] (!%p203_p3)   ;;  %p246_p4 = scmp.lt.s32.totalorder (!%p203_p3), %s2334_s15, 1 }
   0x8   : > { %686 = vmatpush1.bf16.msra.mxu0 (!%p203_p3), %v2212_v1  ;;  %v2218_v5 = vld [vmem:[%s2755_s3 + $0x30] ss:$12 sps:$4 sm:$0xff] (!%p203_p3)   ;;  %v2219_v6 = vld [vmem:[%s2755_s3 + $0x4c] ss:$12 sps:$4 sm:$0xff] (!%p203_p3)   ;;  %v2221_v7 = vld [vmem:[%s2755_s3 + $0x48] ss:$12 sps:$4 sm:$0xff] (!%p203_p3)  }
   0x9   : > { %687 = vmatprep.subr.bf16.mxu0 (!%p203_p3), %v2213_v2  ;;  %v2222_v8 = vld [vmem:[%s2755_s3 + $0x64] ss:$12 sps:$4 sm:$0xff] (!%p203_p3)   ;;  %v2234_v9 = vld [vmem:[%s2755_s3 + $0xc8] ss:$12 sps:$4 sm:$0xff] (!%p203_p3)   ;;  %v2224_v11 = vld [vmem:[%s2755_s3 + $0x60] ss:$12 sps:$4 sm:$0xff] (!%p203_p3)  }
   0xa   : > { %v2235_v10 = vld [vmem:[%s2755_s3 + $0x8] ss:$12 sps:$4 sm:$0xff] (!%p203_p3)   ;;  %2054 = vmatprep.subr.bf16.mxu1 (!%p203_p3), %v2234_v9  ;;  %v2239_v12 = vld [vmem:[%s2755_s3 + $0xe0] ss:$12 sps:$4 sm:$0xff] (!%p203_p3)   ;;  %v2227_v15 = vld [vmem:[%s2755_s3 + $0x78] ss:$12 sps:$4 sm:$0xff] (!%p203_p3)  }
   0xb   : > { %2055 = vmatpush3.bf16.msra.mxu1 (!%p203_p3), %v2235_v10  ;;  %v2240_v13 = vld [vmem:[%s2755_s3 + $0x20] ss:$12 sps:$4 sm:$0xff] (!%p203_p3)   ;;  %v2225_v14 = vld [vmem:[%s2755_s3 + $0x7c] ss:$12 sps:$4 sm:$0xff] (!%p203_p3)   ;;  %v2244_v16 = vld [vmem:[%s2755_s3 + $0xf8] ss:$12 sps:$4 sm:$0xff] (!%p203_p3)  }
   0xc   : > { %688 = vmatpush1.bf16.msra.mxu0 (!%p203_p3), %v2215_v3  ;;  %2056 = vmatprep.subr.bf16.mxu1 (!%p203_p3), %v2239_v12  ;;  %v2245_v17 = vld [vmem:[%s2755_s3 + $0x38] ss:$12 sps:$4 sm:$0xff] (!%p203_p3)   ;;  %v2228_v18 = vld [vmem:[%s2755_s3 + $0x94] ss:$12 sps:$4 sm:$0xff] (!%p203_p3)   ;;  %v2249_v19 = vld [vmem:[%s2755_s3 + $0x110] ss:$12 sps:$4 sm:$0xff] (!%p203_p3)  }
   0xd   : > { %689 = vmatprep.subr.bf16.mxu0 (!%p203_p3), %v2216_v4  ;;  %v2250_v20 = vld [vmem:[%s2755_s3 + $0x50] ss:$12 sps:$4 sm:$0xff] (!%p203_p3)   ;;  %v2231_v22 = vld [vmem:[%s2755_s3 + $0xac] ss:$12 sps:$4 sm:$0xff] (!%p203_p3)   ;;  %v2254_v23 = vld [vmem:[%s2755_s3 + $0x128] ss:$12 sps:$4 sm:$0xff] (!%p203_p3)  }
   0xe   : > { %v2230_v21 = vld [vmem:[%s2755_s3 + $0x90] ss:$12 sps:$4 sm:$0xff]   ;;  %s2762_s15 = smov (!%p246_p4, %s2334_s15), 1  ;;  %v2233_v24 = vld [vmem:[%s2755_s3 + $0xa8] ss:$12 sps:$4 sm:$0xff]   ;;  %v2344_v45 = vmov 0.0  }
   0xf   : > { %2057 = vmatpush3.bf16.msra.mxu1 %v2240_v13  ;;  %v2255_v25 = vld [vmem:[%s2755_s3 + $0x68] ss:$12 sps:$4 sm:$0xff]   ;;  %v2236_v26 = vld [vmem:[%s2755_s3 + $0xc4] ss:$12 sps:$4 sm:$0xff]   ;;  %v2259_v27 = vld [vmem:[%s2755_s3 + $0x140] ss:$12 sps:$4 sm:$0xff]  }
  0x10   : > { %690 = vmatpush1.bf16.msra.mxu0 %v2218_v5  ;;  %2058 = vmatprep.subr.bf16.mxu1 %v2244_v16  ;;  %s2177_s5 = smul.u32 24, %s2762_s15  ;;  %v2238_v28 = vld [vmem:[%s2755_s3 + $0xc0] ss:$12 sps:$4 sm:$0xff]   ;;  %v2264_v30 = vld [vmem:[%s2755_s3 + $0x158] ss:$12 sps:$4 sm:$0xff]   ;;  %vm2345_vm0 = vmmov 0   ;;  %v860_v16 = vlaneseq }
  0x11   : > { %691 = vmatprep.subr.bf16.mxu0 %v2219_v6  ;;  %v2260_v29 = vld [vmem:[%s2755_s3 + $0x80] ss:$12 sps:$4 sm:$0xff]   ;;  %v2241_v31 = vld [vmem:[%s2755_s3 + $0xdc] ss:$12 sps:$4 sm:$0xff]   ;;  %v2243_v32 = vld [vmem:[%s2755_s3 + $0xd8] ss:$12 sps:$4 sm:$0xff]  }
  0x12   : > { %v2265_v33 = vld [vmem:[%s2755_s3 + $0x98] ss:$12 sps:$4 sm:$0xff]   ;;  %s2505_s24 = scalar_lea.vmem %s2752_s0, %s2177_s5  ;;  %v2269_v34 = vld [vmem:[%s2755_s3 + $0x170] ss:$12 sps:$4 sm:$0xff]   ;;  %v2246_v35 = vld [vmem:[%s2755_s3 + $0xf4] ss:$12 sps:$4 sm:$0xff]  }
  0x13   : > { %2059 = vmatpush3.bf16.msra.mxu1 %v2245_v17  ;;  %v2270_v36 = vld [vmem:[%s2755_s3 + $0xb0] ss:$12 sps:$4 sm:$0xff]   ;;  %v276_v37 = vld [vmem:[%s2505_s24 + $0x8] sm:$0xff]  ;;  %v275_v39 = vld [vmem:[%s2505_s24] sm:$0xff]  ;;  %s2178_s9 = smul.u32 40, %s2762_s15  ;;  %vm681_vm1 = vcmask 523264  }
  0x14   : > { %692 = vmatpush1.bf16.msra.mxu0 %v2221_v7  ;;  %2060 = vmatprep.subr.bf16.mxu1 %v2249_v19  ;;  %v279_v38 = vpack.c.bf16 %v276_v37, %v276_v37  ;;  %v2248_v40 = vld [vmem:[%s2755_s3 + $0xf0] ss:$12 sps:$4 sm:$0xff]   ;;  %v2251_v41 = vld [vmem:[%s2755_s3 + $0x10c] ss:$12 sps:$4 sm:$0xff]   ;;  %v278_v42 = vpack.c.bf16 %v275_v39, %v275_v39  ;;  %v2274_v43 = vld [vmem:[%s2755_s3 + $0x188] ss:$12 sps:$4 sm:$0xff]  }
  0x15   : > { %693 = vmatprep.subr.bf16.mxu0 %v2222_v8  ;;  %v2253_v44 = vld [vmem:[%s2755_s3 + $0x108] ss:$12 sps:$4 sm:$0xff]   ;;  %v2256_v46 = vld [vmem:[%s2755_s3 + $0x124] ss:$12 sps:$4 sm:$0xff]   ;;  %s2538_s22 = scalar_lea.vmem %s2753_s1, %s2178_s9  ;;  %v2278_v47 = vld [vmem:[%s2755_s3 + $0x1a0] ss:$12 sps:$4 sm:$0xff]   ;;  %s2564_s13 = scalar_lea.vmem %s2754_s2, %s2178_s9 }
  0x16   : > { %799 = vmatprep.mubr.bf16.mxu1 %v279_v38  ;;  %717 = vmatprep.mubr.bf16.mxu0 %v279_v38  ;;  %v2258_v48 = vld [vmem:[%s2755_s3 + $0x120] ss:$12 sps:$4 sm:$0xff]   ;;  %v2261_v49 = vld [vmem:[%s2755_s3 + $0x13c] ss:$12 sps:$4 sm:$0xff]   ;;  %v2282_v50 = vld [vmem:[%s2755_s3 + $0x1b8] ss:$12 sps:$4 sm:$0xff]  }
  0x17   : > { %2061 = vmatpush3.bf16.msra.mxu1 %v2250_v20  ;;  %v2263_v51 = vld [vmem:[%s2755_s3 + $0x138] ss:$12 sps:$4 sm:$0xff]   ;;  %v2266_v52 = vld [vmem:[%s2755_s3 + $0x154] ss:$12 sps:$4 sm:$0xff]   ;;  %v2286_v54 = vld [vmem:[%s2755_s3 + $0x1d0] ss:$12 sps:$4 sm:$0xff]  }
  0x18   : > { %694 = vmatpush1.bf16.msra.mxu0 %v2224_v11  ;;  %2062 = vmatprep.subr.bf16.mxu1 %v2254_v23  ;;  %v277_v53 = vld [vmem:[%s2505_s24 + $0x10] sm:$0xff]  ;;  %v2271_v56 = vld [vmem:[%s2755_s3 + $0x16c] ss:$12 sps:$4 sm:$0xff]   ;;  %v2281_v61 = vld [vmem:[%s2755_s3 + $0x19c] ss:$12 sps:$4 sm:$0xff]   ;;  %v2346_v63 = vmov 0  }
  0x19   : > { %695 = vmatprep.subr.bf16.mxu0 %v2225_v14  ;;  %v2268_v55 = vld [vmem:[%s2755_s3 + $0x150] ss:$12 sps:$4 sm:$0xff]   ;;  %v280_v57 = vpack.c.bf16 %v277_v53, %v277_v53  ;;  %v2273_v58 = vld [vmem:[%s2755_s3 + $0x168] ss:$12 sps:$4 sm:$0xff]   ;;  %v2275_v60 = vld [vmem:[%s2755_s3 + $0x180] ss:$12 sps:$4 sm:$0xff]  }
  0x1a   : > { %v2277_v59 = vld [vmem:[%s2755_s3 + $0x184] ss:$12 sps:$4 sm:$0xff]   ;;  %v2285_v0 = vld [vmem:[%s2755_s3 + $0x1b4] ss:$12 sps:$4 sm:$0xff]   ;;  %v2289_v2 = vld [vmem:[%s2755_s3 + $0x1cc] ss:$12 sps:$4 sm:$0xff]  }
  0x1b   : > { %2063 = vmatpush3.bf16.msra.mxu1 %v2255_v25  ;;  %v2279_v62 = vld [vmem:[%s2755_s3 + $0x198] ss:$12 sps:$4 sm:$0xff]   ;;  %v2283_v1 = vld [vmem:[%s2755_s3 + $0x1b0] ss:$12 sps:$4 sm:$0xff]   ;;  %v2287_v3 = vld [vmem:[%s2755_s3 + $0x1c8] ss:$12 sps:$4 sm:$0xff]  }
  0x1c   : > { %696 = vmatpush1.bf16.msra.mxu0 %v2227_v15  ;;  %2064 = vmatprep.subr.bf16.mxu1 %v2259_v27  ;;  %v2347_v14 = vmov 1983009808   ;;  %s2348_s9 = smov 64   ;;  %vm1319_vm3 = vcmask 97280   ;;  %vm1388_vm4 = vcmask 1045504   ;;  %vm1839_vm5 = vcmask 519168  }
  0x1d   : > { %697 = vmatprep.subr.bf16.mxu0 %v2228_v18  ;;  %v858_v15 = vunpack.c.l.s4 %v2347_v14  ;;  %v861_v18 = vshrl.u32 %v860_v16, 7 }
  0x1f   : > { %2065 = vmatpush3.bf16.msra.mxu1 %v2260_v29  ;;  %v859_v17 = vunpack.c.0.s8 %v858_v15 }
  0x20   : > { %698 = vmatpush1.bf16.msra.mxu0 %v2230_v21  ;;  %2066 = vmatprep.subr.bf16.mxu1 %v2264_v30 }
  0x21   : > { %699 = vmatprep.subr.bf16.mxu0 %v2231_v22  ;;  %v2615_v19 = vsub.s32 %v859_v17, %v861_v18 }
  0x23   : > { %2067 = vmatpush3.bf16.msra.mxu1 %v2265_v33 }
  0x24   : > { %700 = vmatpush1.bf16.msra.mxu0 %v2233_v24  ;;  %2068 = vmatprep.subr.bf16.mxu1 %v2269_v34 }
  0x25   : > { %701 = vmatprep.subr.bf16.mxu0 %v2236_v26 }
  0x27   : > { %2069 = vmatpush3.bf16.msra.mxu1 %v2270_v36 }
  0x28   : > { %702 = vmatpush1.bf16.msra.mxu0 %v2238_v28  ;;  %2101 = vmatprep.subr.bf16.mxu1 %v2344_v45 }
  0x29   : > { %703 = vmatprep.subr.bf16.mxu0 %v2241_v31  ;;  %v2290_v31 = vld [vmem:[%s2538_s22] sm:$0x3f]  }
  0x2a   : > { %800 = vmatmul.mubr.bf16.vlgmr.msra.gmra.mrb[0].mxu1 %v278_v42  ;;  %v1065_v33 = vsel %vm681_vm1, %v2290_v31, 0 }
  0x2b   : > { %2102 = vmatpush3.bf16.msra.mxu1 %v2274_v43  ;;  %2109 = vmatprep.mubr.msk.bf16.mxu1 %vm2345_vm0, %v2344_v45 }
  0x2c   : > { %704 = vmatpush1.bf16.msra.mxu0 %v2243_v32  ;;  %2103 = vmatprep.subr.bf16.mxu1 %v2344_v45  ;;  %v2291_v32 = vld [vmem:[%s2538_s22 + $0x20] sm:$0x3f]  }
  0x2d   : > { %705 = vmatprep.subr.bf16.mxu0 %v2246_v35  ;;  %v1269_v34 = vsel %vm681_vm1, %v2291_v32, 0  ;;  %v2349_v35 = vmov 1934713408  }
  0x2e   : > { %v874_v36 = vunpack.c.l.s4 %v2349_v35 }
  0x2f   : > { %2104 = vmatpush3.bf16.msra.mxu1 %v2278_v47 }
  0x30   : > { %706 = vmatpush1.bf16.msra.mxu0 %v2248_v40  ;;  %2105 = vmatprep.subr.bf16.mxu1 %v2344_v45  ;;  %v875_v37 = vunpack.c.0.s8 %v874_v36 }
  0x31   : > { %707 = vmatprep.subr.bf16.mxu0 %v2251_v41 }
  0x32   : > { %v2627_v38 = vsub.s32 %v875_v37, %v861_v18  ;;  %v2293_v37 = vld [vmem:[%s2538_s22 + $0x10] sm:$0x3f]  }
  0x33   : > { %2106 = vmatpush3.bf16.msra.mxu1 %v2282_v50 }
  0x34   : > { %708 = vmatpush1.bf16.msra.mxu0 %v2253_v44  ;;  %2107 = vmatprep.subr.bf16.mxu1 %v2344_v45 }
  0x35   : > { %709 = vmatprep.subr.bf16.mxu0 %v2256_v46 }
  0x37   : > { %2108 = vmatpush3.bf16.msra.mxu1 %v2286_v54 }
  0x38   : > { %710 = vmatpush1.bf16.msra.mxu0 %v2258_v48  ;;  %2113 = vmatprep.subr.bf16.mxu1 %v2344_v45 }
  0x39   : > { %711 = vmatprep.subr.bf16.mxu0 %v2261_v49 }
  0x3a   : > { %2110 = vmatmul.mubr.msk.bf16.vlgmr.msra.gmra.mrb[4].mxu1 %vm681_vm1, %v280_v57 }
  0x3b   : > { %2115 = vmatprep.mubr.msk.bf16.mxu1 %vm2345_vm0, %v2344_v45 }
  0x3c   : > { %712 = vmatpush1.bf16.msra.mxu0 %v2263_v51 }
  0x3d   : > { %713 = vmatprep.subr.bf16.mxu0 %v2266_v52 }
  0x40   : > { %714 = vmatpush1.bf16.msra.mxu0 %v2268_v55  ;;  %2114 = vmatpush3.bf16.xpose.msra.mxu1 %v1065_v33 }
  0x41   : > { %715 = vmatprep.subr.bf16.mxu0 %v2271_v56  ;;  %2119 = vmatprep.subr.bf16.mxu1 %v2344_v45 }
  0x44   : > { %716 = vmatpush1.bf16.msra.mxu0 %v2273_v58 }
  0x45   : > { %726 = vmatprep.subr.bf16.mxu0 %v2277_v59 }
  0x47   : > { %718 = vmatmul.mubr.bf16.vlgmr.msra.gmra.mrb[0].mxu0 %v278_v42 }
  0x48   : > { %727 = vmatpush1.bf16.msra.mxu0 %v2275_v60  ;;  %758 = vmatprep.mubr.bf16.mxu0 %v2346_v63 }
  0x49   : > { %728 = vmatprep.subr.bf16.mxu0 %v2281_v61 }
  0x4c   : > { %729 = vmatpush1.bf16.msra.mxu0 %v2279_v62 }
  0x4d   : > { %730 = vmatprep.subr.bf16.mxu0 %v2285_v0 }
  0x50   : > { %731 = vmatpush1.bf16.msra.mxu0 %v2283_v1 }
  0x51   : > { %732 = vmatprep.subr.bf16.mxu0 %v2289_v2 }
  0x54   : > { %733 = vmatpush1.bf16.msra.mxu0 %v2287_v3 }
  0x55   : > { %2137 = vmatprep.subr.bf16.mxu0 %v2344_v45 }
  0x57   : > { %2026 = vmatmul.mubr.msk.bf16.vlgmr.msra.gmra.mrb[0].mxu0 %vm681_vm1, %v280_v57 }
  0x58   : > { %2139 = vmatprep.mubr.msk.bf16.mxu0 %vm2345_vm0, %v2344_v45 }
  0x5d   : > { %2138 = vmatpush3.bf16.xpose.msra.mxu0 %v1269_v34 }
  0x5e   : > { %2149 = vmatprep.subr.bf16.mxu0 %v2344_v45 }
  0xfd   : > { %v2070_v4 = vpop.f32.mrb[0].mxu1 }
  0xfe   : > { %v2071_v5 = vpop.f32.mrb[1].mxu1 }
  0xff   : > { %v2072_v6 = vadd.f32 %v2071_v5, %v2070_v4  ;;  %v2073_v7 = vpop.f32.mrb[2].mxu1 }
 0x100   : > { %v2074_v8 = vpop.f32.mrb[3].mxu1 }
 0x10d   : > { %v841_v9 = vpop.f32.mrb[4].mxu1 }
 0x10e   : > { %v842_v10 = vadd.f32 %v2072_v6, %v841_v9  ;;  %v2111_v11 = vpop.f32.mrb[5].mxu1 }
 0x10f   : > { %v844_v12 = vpop.f32.mrb[6].mxu1 }
 0x110   : > { %v2112_v13 = vpop.f32.mrb[7].mxu1 }
 0x12a   : > { %v760_v20 = vpop.f32.mrb[0].mxu0 }
 0x12b   : > { %v2028_v21 = vpack.c.bf16 %v842_v10, %v760_v20  ;;  %v762_v22 = vpop.f32.mrb[1].mxu0  ;;  %v847_v23 = vpack.c.bf16 %v760_v20, %v760_v20  ;;  %v2292_v20 = vld [vmem:[%s2538_s22 + $0x8] sm:$0x3f]  }
 0x12c   : > { %v848_v24 = vpack.c.bf16 %v762_v22, %v762_v22  ;;  %v764_v25 = vpop.f32.mrb[2].mxu0 }
 0x12d   : > { %v863_v26 = vrot.slane %v2028_v21, %v2615_v19  ;;  %851 = vrot.lane.b32.xlu0 %v847_v23, %s2348_s9  ;;  %v765_v27 = vpop.f32.mrb[3].mxu0 }
 0x12e   : > { %v870_v28 = vrot.slane %v848_v24, %v2615_v19  ;;  %v1116_v27 = vsel %vm681_vm1, %v2292_v20, 0 }
 0x130   : > { %v871_v29 = vcombine.low %v863_v26, %v870_v28  ;;  %v872_v30 = vcombine.high %v863_v26, %v870_v28 }
 0x131   : > { %854 = vrot.lane.b32.xlu0 %v848_v24, %s2348_s9 }
 0x132   : > { %v879_v40 = vrot.slane %v871_v29, %v2627_v38  ;;  %v886_v44 = vrot.slane %v872_v30, %v2627_v38 }
 0x134   : > { %v887_v48 = vcombine.high %v879_v40, %v2346_v63  ;;  %v888_v51 = vcombine.high %v886_v44, %v2346_v63  ;;  %v927_v52 = vshrl.u32 %v879_v40, 16  ;;  %v943_v58 = vshrl.u32 %v886_v44, 16 }
 0x136   : > { %v935_v57 = vshrl.u32 %v887_v48, 16  ;;  %v951_v2 = vshrl.u32 %v888_v51, 16 }
 0x19f   : > { %v852_v39 = vpop.permute.xlu0 %851 }
 0x1a0   : > { %v896_v42 = vrot.slane %v852_v39, %v2615_v19 }
 0x1a3   : > { %v855_v41 = vpop.permute.xlu0 %854 }
 0x1a4   : > { %v904_v43 = vrot.slane %v855_v41, %v2615_v19  ;;  %v2294_v41 = vld [vmem:[%s2538_s22 + $0x18] sm:$0x3f]   ;;  %s2179_s22 = smul.u32 12, %s2762_s15 }
 0x1a6   : > { %v905_v46 = vcombine.low %v896_v42, %v904_v43  ;;  %v906_v47 = vcombine.high %v896_v42, %v904_v43  ;;  %v1218_v42 = vsel %vm681_vm1, %v2294_v41, 0  ;;  %v1312_v43 = vand.u32 127, %v860_v16  ;;  %v2296_v41 = vld [vmem:[%s2564_s13 + $0x8] sm:$0x3f]   ;;  %s273_s24 = scalar_lea.vmem %s2756_s4, %s2179_s22 }
 0x1a8   : > { %v913_v49 = vrot.slane %v905_v46, %v2627_v38  ;;  %v920_v50 = vrot.slane %v906_v47, %v2627_v38  ;;  %vm1313_vm2 = vcmp.lt.s32.totalorder %v1312_v43, 8 }
 0x1aa   : > { %v921_v53 = vcombine.high %v913_v49, %v2346_v63  ;;  %v922_v54 = vcombine.high %v920_v50, %v2346_v63  ;;  %v925_v55 = vpack.i.b16 %v913_v49, %v879_v40  ;;  %v928_v56 = vshrl.u32 %v913_v49, 16 }
 0x1ab   : > { %v941_v59 = vpack.i.b16 %v920_v50, %v886_v44  ;;  %v944_v60 = vshrl.u32 %v920_v50, 16  ;;  %v1167_v40 = vsel %vm681_vm1, %v2293_v37, 0 }
 0x1ac   : > { %v929_v61 = vpack.i.b16 %v928_v56, %v927_v52  ;;  %v933_v62 = vpack.i.b16 %v921_v53, %v887_v48  ;;  %v936_v0 = vshrl.u32 %v921_v53, 16  ;;  %v949_v1 = vpack.i.b16 %v922_v54, %v888_v51 }
 0x1ad   : > { %v945_v3 = vpack.i.b16 %v944_v60, %v943_v58  ;;  %v952_v4 = vshrl.u32 %v922_v54, 16  ;;  %v955_v5 = vcombine.low %v925_v55, %v941_v59 }
 0x1ae   : > { %v937_v6 = vpack.i.b16 %v936_v0, %v935_v57  ;;  %v963_v7 = vcombine.low %v933_v62, %v949_v1 }
 0x1af   : > { %v953_v8 = vpack.i.b16 %v952_v4, %v951_v2  ;;  %v988_v9 = vcombine.low %v929_v61, %v945_v3  ;;  %v962_v10 = vrot.slane %v955_v5, %v2615_v19 }
 0x1b0   : > { %v970_v11 = vrot.slane %v963_v7, %v2615_v19 }
 0x1b1   : > { %v996_v12 = vcombine.low %v937_v6, %v953_v8  ;;  %v995_v15 = vrot.slane %v988_v9, %v2615_v19 }
 0x1b2   : > { %v971_v13 = vcombine.low %v962_v10, %v970_v11  ;;  %v972_v14 = vcombine.high %v962_v10, %v970_v11 }
 0x1b3   : > { %v1003_v17 = vrot.slane %v996_v12, %v2615_v19 }
 0x1b4   : > { %v979_v18 = vrot.slane %v971_v13, %v2627_v38  ;;  %v987_v24 = vrot.slane %v972_v14, %v2627_v38 }
 0x1b5   : > { %v1004_v21 = vcombine.low %v995_v15, %v1003_v17  ;;  %v1005_v22 = vcombine.high %v995_v15, %v1003_v17 }
 0x1b6   : > { %v980_v26 = vcombine.high %v979_v18, %v2346_v63  ;;  %v1024_v28 = vshrl.u32 %v979_v18, 16 }
 0x1b7   : > { %v1012_v23 = vrot.slane %v1004_v21, %v2627_v38  ;;  %v1020_v25 = vrot.slane %v1005_v22, %v2627_v38 }
 0x1b8   : > { %v1030_v35 = vshrl.u32 %v980_v26, 16 }
 0x1b9   : > { %v1023_v29 = vpack.i.b16 %v1012_v23, %v979_v18  ;;  %v1035_v30 = vpack.i.b16 %v1020_v25, %v987_v24  ;;  %v1025_v31 = vshrl.u32 %v1012_v23, 16  ;;  %v1013_v32 = vcombine.high %v1012_v23, %v2346_v63 }
 0x1bb   : > { %2116 = vmatmul.mubr.msk.bf16.vlgmr.msra.gmra.mrb[8].mxu1 %vm681_vm1, %v1023_v29  ;;  %2140 = vmatmul.mubr.msk.bf16.vlgmr.msra.gmra.mrb[4].mxu0 %vm681_vm1, %v1035_v30  ;;  %v1026_v33 = vpack.i.b16 %v1025_v31, %v1024_v28  ;;  %v1029_v34 = vpack.i.b16 %v1013_v32, %v980_v26  ;;  %v1031_v36 = vshrl.u32 %v1013_v32, 16 }
 0x1bc   : > { %2120 = vmatpush3.bf16.xpose.msra.mxu1 %v1116_v27  ;;  %2121 = vmatprep.mubr.msk.bf16.mxu1 %vm2345_vm0, %v2344_v45 }
 0x1bd   : > { %2125 = vmatprep.subr.bf16.mxu1 %v2344_v45  ;;  %v1032_v39 = vpack.i.b16 %v1031_v36, %v1030_v35  ;;  %2151 = vmatprep.mubr.msk.bf16.mxu0 %vm2345_vm0, %v2344_v45  ;;  %v2295_v36 = vld [vmem:[%s2564_s13] sm:$0x3f]  }
 0x1be   : > { %v1390_v37 = vsel %vm1388_vm4, %v2295_v36, 0 }
 0x1c3   : > { %2122 = vmatmul.mubr.msk.bf16.vlgmr.msra.gmra.mrb[12].mxu1 %vm681_vm1, %v1026_v33 }
 0x1c4   : > { %2126 = vmatpush3.bf16.xpose.msra.mxu1 %v1167_v40  ;;  %2127 = vmatprep.mubr.msk.bf16.mxu1 %vm2345_vm0, %v2344_v45 }
 0x1c5   : > { %2131 = vmatprep.subr.bf16.mxu1 %v2344_v45 }
 0x1cb   : > { %2128 = vmatmul.mubr.msk.bf16.vlgmr.msra.gmra.mrb[16].mxu1 %vm681_vm1, %v1029_v34 }
 0x1cc   : > { %2132 = vmatpush3.bf16.xpose.msra.mxu1 %v1218_v42  ;;  %2133 = vmatprep.mubr.msk.bf16.mxu1 %vm2345_vm0, %v2344_v45  ;;  %v1441_v42 = vsel %vm1388_vm4, %v2296_v41, 0 }
 0x1cd   : > { %2143 = vmatprep.subr.bf16.mxu1 %v2344_v45  ;;  %2150 = vmatpush3.bf16.msra.mxu0 %v1441_v42 }
 0x1ce   : > { %2161 = vmatprep.subr.bf16.mxu0 %v2344_v45 }
 0x1d3   : > { %2134 = vmatmul.mubr.msk.bf16.vlgmr.msra.gmra.mrb[20].mxu1 %vm681_vm1, %v1032_v39 }
 0x1d4   : > { %2145 = vmatprep.mubr.msk.bf16.mxu1 %vm2345_vm0, %v2344_v45  ;;  %2144 = vmatpush3.bf16.msra.mxu1 %v1390_v37 }
 0x1d5   : > { %2155 = vmatprep.subr.bf16.mxu1 %v2344_v45 }
 0x28e   : > { %v1101_v44 = vpop.f32.mrb[8].mxu1  ;;  %v1305_v46 = vpop.f32.mrb[4].mxu0 }
 0x28f   : > { %v1314_v47 = vsel %vm1313_vm2, %v1101_v44, -1e+30  ;;  %v2117_v48 = vpop.f32.mrb[9].mxu1  ;;  %v2141_v49 = vpop.f32.mrb[5].mxu0  ;;  %v1318_v8 = vsel %vm1313_vm2, %v1305_v46, -1e+30 }
 0x290   : > { %v1104_v50 = vpop.f32.mrb[10].mxu1  ;;  %v1308_v51 = vpop.f32.mrb[6].mxu0  ;;  %v1320_v52 = vsel %vm1319_vm3, %v1314_v47, -inf  ;;  %v1332_v10 = vsel %vm1319_vm3, %v1318_v8, -inf  ;;  %v2297_v46 = vld [vmem:[%s2564_s13 + $0x10] sm:$0x3f]  }
 0x291   : > { %1321 = vmax.xlane.f32.xlu1 %v1320_v52  ;;  %v2118_v53 = vpop.f32.mrb[11].mxu1  ;;  %v2142_v54 = vpop.f32.mrb[7].mxu0  ;;  %v1492_v50 = vsel %vm1388_vm4, %v2297_v46, 0  ;;  %v2298_v52 = vld [vmem:[%s2564_s13 + $0x18] sm:$0x3f]  }
 0x296   : > { %v1152_v55 = vpop.f32.mrb[12].mxu1 }
 0x297   : > { %v1315_v56 = vsel %vm1313_vm2, %v1152_v55, -1e+30  ;;  %v2123_v57 = vpop.f32.mrb[13].mxu1 }
 0x298   : > { %v1155_v16 = vpop.f32.mrb[14].mxu1  ;;  %v1323_v58 = vsel %vm1319_vm3, %v1315_v56, -inf }
 0x299   : > { %1324 = vmax.xlane.f32.xlu1 %v1323_v58  ;;  %v2124_v59 = vpop.f32.mrb[15].mxu1  ;;  %v2299_v16 = vld [vmem:[%s2564_s13 + $0x20] sm:$0x3f]  }
 0x29e   : > { %v1203_v60 = vpop.f32.mrb[16].mxu1 }
 0x29f   : > { %v1316_v61 = vsel %vm1313_vm2, %v1203_v60, -1e+30  ;;  %v2129_v62 = vpop.f32.mrb[17].mxu1 }
 0x2a0   : > { %v1206_v0 = vpop.f32.mrb[18].mxu1  ;;  %v1326_v1 = vsel %vm1319_vm3, %v1316_v61, -inf  ;;  %v1594_v62 = vsel %vm1388_vm4, %v2299_v16, 0 }
 0x2a1   : > { %1327 = vmax.xlane.f32.xlu0 %v1326_v1  ;;  %v2130_v2 = vpop.f32.mrb[19].mxu1 }
 0x2a6   : > { %v1254_v3 = vpop.f32.mrb[20].mxu1 }
 0x2a7   : > { %v1317_v4 = vsel %vm1313_vm2, %v1254_v3, -1e+30  ;;  %v2135_v5 = vpop.f32.mrb[21].mxu1 }
 0x2a8   : > { %v1257_v6 = vpop.f32.mrb[22].mxu1  ;;  %v1329_v7 = vsel %vm1319_vm3, %v1317_v4, -inf }
 0x2a9   : > { %1330 = vmax.xlane.f32.xlu1 %v1329_v7  ;;  %v2136_v9 = vpop.f32.mrb[23].mxu1 }
 0x2ad   : > { %1333 = vmax.xlane.f32.xlu1 %v1332_v10 }
 0x31e   : > { %v1322_v11 = vpop.xlane.xlu1 %1321 }
 0x31f   : > { %v1335_v12 = vsub.f32 %v1314_v47, %v1322_v11 }
 0x321   : > { %v1340_v13 = vmul.f32 1.442695, %v1335_v12 }
 0x323   : > { %2300 = vpow2.f32 %v1340_v13 }
 0x326   : > { %v1325_v14 = vpop.xlane.xlu1 %1324 }
 0x327   : > { %v1336_v15 = vsub.f32 %v1315_v56, %v1325_v14  ;;  %v1543_v56 = vsel %vm1388_vm4, %v2298_v52, 0 }
 0x329   : > { %v1342_v17 = vmul.f32 1.442695, %v1336_v15 }
 0x32b   : > { %2302 = vpow2.f32 %v1342_v17 }
 0x32d   : > { %v2301_v18 = vpop.eup %2300 }
 0x32e   : > { %v1328_v20 = vpop.xlane.xlu0 %1327  ;;  %v1350_v21 = vsel %vm1319_vm3, %v2301_v18, 0.0 }
 0x32f   : > { %v1337_v22 = vsub.f32 %v1316_v61, %v1328_v20  ;;  %1351 = vadd.xlane.f32.xlu1 %v1350_v21 }
 0x331   : > { %v1344_v23 = vmul.f32 1.442695, %v1337_v22 }
 0x333   : > { %2304 = vpow2.f32 %v1344_v23 }
 0x335   : > { %v2303_v24 = vpop.eup %2302 }
 0x336   : > { %v1331_v25 = vpop.xlane.xlu1 %1330  ;;  %v1353_v26 = vsel %vm1319_vm3, %v2303_v24, 0.0 }
 0x337   : > { %v1338_v27 = vsub.f32 %v1317_v4, %v1331_v25  ;;  %1354 = vadd.xlane.f32.xlu1 %v1353_v26 }
 0x339   : > { %v1346_v28 = vmul.f32 1.442695, %v1338_v27 }
 0x33a   : > { %v1334_v29 = vpop.xlane.xlu1 %1333 }
 0x33b   : > { %2306 = vpow2.f32 %v1346_v28  ;;  %v1339_v30 = vsub.f32 %v1318_v8, %v1334_v29 }
 0x33d   : > { %v2305_v31 = vpop.eup %2304  ;;  %v1348_v32 = vmul.f32 1.442695, %v1339_v30 }
 0x33e   : > { %v1356_v33 = vsel %vm1319_vm3, %v2305_v31, 0.0 }
 0x33f   : > { %2308 = vpow2.f32 %v1348_v32  ;;  %1357 = vadd.xlane.f32.xlu1 %v1356_v33 }
 0x345   : > { %v2307_v34 = vpop.eup %2306 }
 0x346   : > { %v1359_v35 = vsel %vm1319_vm3, %v2307_v34, 0.0 }
 0x347   : > { %1360 = vadd.xlane.f32.xlu1 %v1359_v35 }
 0x349   : > { %v2309_v39 = vpop.eup %2308 }
 0x34a   : > { %v1362_v40 = vsel %vm1319_vm3, %v2309_v39, 0.0 }
 0x34b   : > { %1363 = vadd.xlane.f32.xlu1 %v1362_v40 }
 0x3bc   : > { %v1352_v43 = vpop.xlane.xlu1 %1351 }
 0x3bd   : > { %2310 = vrcp.f32 %v1352_v43 }
 0x3c4   : > { %v1355_v44 = vpop.xlane.xlu1 %1354 }
 0x3c5   : > { %2312 = vrcp.f32 %v1355_v44 }
 0x3c7   : > { %v2311_v47 = vpop.eup %2310 }
 0x3c8   : > { %v1370_v48 = vmul.f32 %v2311_v47, %v2301_v18 }
 0x3ca   : > { %v1375_v49 = vpack.c.bf16 %v1370_v48, %v1370_v48 }
 0x3cc   : > { %2146 = vmatmul.mubr.msk.bf16.vlgmr.msra.gmra.mrb[24].mxu1 %vm1319_vm3, %v1375_v49  ;;  %v1358_v51 = vpop.xlane.xlu1 %1357 }
 0x3cd   : > { %2314 = vrcp.f32 %v1358_v51  ;;  %2156 = vmatpush3.bf16.msra.mxu1 %v1492_v50  ;;  %2157 = vmatprep.mubr.msk.bf16.mxu1 %vm2345_vm0, %v2344_v45 }
 0x3ce   : > { %2167 = vmatprep.subr.bf16.mxu1 %v2344_v45 }
 0x3cf   : > { %v2313_v53 = vpop.eup %2312 }
 0x3d0   : > { %v1371_v54 = vmul.f32 %v2313_v53, %v2303_v24 }
 0x3d2   : > { %v1376_v55 = vpack.c.bf16 %v1371_v54, %v1371_v54 }
 0x3d4   : > { %2152 = vmatmul.mubr.msk.bf16.vlgmr.msra.gmra.mrb[8].mxu0 %vm1319_vm3, %v1376_v55  ;;  %v1361_v57 = vpop.xlane.xlu1 %1360 }
 0x3d5   : > { %2316 = vrcp.f32 %v1361_v57  ;;  %2162 = vmatpush3.bf16.msra.mxu0 %v1543_v56  ;;  %2163 = vmatprep.mubr.msk.bf16.mxu0 %vm2345_vm0, %v2344_v45 }
 0x3d7   : > { %v2315_v58 = vpop.eup %2314 }
 0x3d8   : > { %v1372_v59 = vmul.f32 %v2315_v58, %v2305_v31  ;;  %v1364_v60 = vpop.xlane.xlu1 %1363 }
 0x3d9   : > { %2318 = vrcp.f32 %v1364_v60 }
 0x3da   : > { %v1377_v61 = vpack.c.bf16 %v1372_v59, %v1372_v59 }
 0x3dc   : > { %2158 = vmatmul.mubr.msk.bf16.vlgmr.msra.gmra.mrb[28].mxu1 %vm1319_vm3, %v1377_v61 }
 0x3dd   : > { %2168 = vmatpush3.bf16.msra.mxu1 %v1594_v62  ;;  %2169 = vmatprep.mubr.msk.bf16.mxu1 %vm2345_vm0, %v2344_v45 }
 0x3df   : > { %v2317_v0 = vpop.eup %2316 }
 0x3e0   : > { %v1373_v1 = vmul.f32 %v2317_v0, %v2307_v34 }
 0x3e2   : > { %v1378_v2 = vpack.c.bf16 %v1373_v1, %v1373_v1 }
 0x3e3   : > { %v2319_v3 = vpop.eup %2318 }
 0x3e4   : > { %v1374_v4 = vmul.f32 %v2319_v3, %v2309_v39  ;;  %2164 = vmatmul.mubr.msk.bf16.vlgmr.msra.gmra.mrb[12].mxu0 %vm1319_vm3, %v1378_v2 }
 0x3e6   : > { %v1379_v5 = vpack.c.bf16 %v1374_v4, %v1374_v4 }
 0x3e8   : > { %2170 = vmatmul.mubr.msk.bf16.vlgmr.msra.gmra.mrb[32].mxu1 %vm1319_vm3, %v1379_v5 }
 0x49f   : > { %v1426_v6 = vpop.f32.mrb[24].mxu1 }
 0x4a0   : > { %v2147_v7 = vpop.f32.mrb[25].mxu1 }
 0x4a1   : > { %v1429_v8 = vpop.f32.mrb[26].mxu1 }
 0x4a2   : > { %v2148_v9 = vpop.f32.mrb[27].mxu1 }
 0x4a7   : > { %v1477_v10 = vpop.f32.mrb[8].mxu0 }
 0x4a8   : > { %v2153_v11 = vpop.f32.mrb[9].mxu0  ;;  %v1672_v18 = vpack.c.bf16 %v1477_v10, %v1477_v10 }
 0x4a9   : > { %v1480_v12 = vpop.f32.mrb[10].mxu0 }
 0x4aa   : > { %v2154_v13 = vpop.f32.mrb[11].mxu0  ;;  %v1679_v24 = vrot.slane %v1672_v18, %v2615_v19 }
 0x4af   : > { %v1528_v14 = vpop.f32.mrb[28].mxu1 }
 0x4b0   : > { %v2159_v45 = vpop.f32.mrb[29].mxu1  ;;  %v1646_v27 = vpack.c.bf16 %v1528_v14, %v1528_v14 }
 0x4b1   : > { %v1531_v15 = vpop.f32.mrb[30].mxu1 }
 0x4b2   : > { %v2160_v17 = vpop.f32.mrb[31].mxu1  ;;  %v1653_v37 = vrot.slane %v1646_v27, %v2615_v19 }
 0x4b7   : > { %v1579_v20 = vpop.f32.mrb[12].mxu0 }
 0x4b8   : > { %v1680_v21 = vpack.c.bf16 %v1579_v20, %v1579_v20  ;;  %v2165_v22 = vpop.f32.mrb[13].mxu0 }
 0x4b9   : > { %v1582_v23 = vpop.f32.mrb[14].mxu0 }
 0x4ba   : > { %v1687_v25 = vrot.slane %v1680_v21, %v2615_v19  ;;  %v2166_v26 = vpop.f32.mrb[15].mxu0 }
 0x4bb   : > { %v1630_v28 = vpop.f32.mrb[32].mxu1 }
 0x4bc   : > { %v1688_v29 = vcombine.low %v1679_v24, %v1687_v25  ;;  %v1689_v30 = vcombine.high %v1679_v24, %v1687_v25  ;;  %v2049_v31 = vpack.c.bf16 %v1630_v28, %v1426_v6  ;;  %v2171_v32 = vpop.f32.mrb[33].mxu1 }
 0x4bd   : > { %v1633_v33 = vpop.f32.mrb[34].mxu1 }
 0x4be   : > { %v1696_v34 = vrot.slane %v1688_v29, %v2627_v38  ;;  %v1645_v35 = vrot.slane %v2049_v31, %v2615_v19  ;;  %v2172_v36 = vpop.f32.mrb[35].mxu1  ;;  %v1703_v39 = vrot.slane %v1689_v30, %v2627_v38 }
 0x4c0   : > { %v1654_v40 = vcombine.low %v1645_v35, %v1653_v37  ;;  %v1655_v41 = vcombine.high %v1645_v35, %v1653_v37  ;;  %v1704_v42 = vcombine.high %v1696_v34, %v2346_v63  ;;  %v1705_v46 = vcombine.high %v1703_v39, %v2346_v63 }
 0x4c1   : > { %v1711_v47 = vshrl.u32 %v1696_v34, 16  ;;  %v1727_v53 = vshrl.u32 %v1703_v39, 16 }
 0x4c2   : > { %v1662_v43 = vrot.slane %v1654_v40, %v2627_v38  ;;  %v1669_v44 = vrot.slane %v1655_v41, %v2627_v38  ;;  %v1719_v52 = vshrl.u32 %v1704_v42, 16  ;;  %v1735_v59 = vshrl.u32 %v1705_v46, 16 }
 0x4c4   : > { %v1670_v48 = vcombine.high %v1662_v43, %v2346_v63  ;;  %v1671_v49 = vcombine.high %v1669_v44, %v2346_v63  ;;  %v1708_v50 = vpack.i.b16 %v1696_v34, %v1662_v43  ;;  %v1710_v51 = vshrl.u32 %v1662_v43, 16 }
 0x4c5   : > { %v1724_v54 = vpack.i.b16 %v1703_v39, %v1669_v44  ;;  %v1726_v55 = vshrl.u32 %v1669_v44, 16 }
 0x4c6   : > { %v1712_v56 = vpack.i.b16 %v1711_v47, %v1710_v51  ;;  %v1716_v57 = vpack.i.b16 %v1704_v42, %v1670_v48  ;;  %v1718_v16 = vshrl.u32 %v1670_v48, 16  ;;  %v1732_v58 = vpack.i.b16 %v1705_v46, %v1671_v49 }
 0x4c7   : > { %v1728_v60 = vpack.i.b16 %v1727_v53, %v1726_v55  ;;  %v1734_v61 = vshrl.u32 %v1671_v49, 16  ;;  %v1738_v62 = vcombine.low %v1708_v50, %v1724_v54 }
 0x4c8   : > { %v1720_v0 = vpack.i.b16 %v1719_v52, %v1718_v16  ;;  %v1746_v1 = vcombine.low %v1716_v57, %v1732_v58 }
 0x4c9   : > { %v1736_v2 = vpack.i.b16 %v1735_v59, %v1734_v61  ;;  %v1771_v3 = vcombine.low %v1712_v56, %v1728_v60  ;;  %v1745_v4 = vrot.slane %v1738_v62, %v2615_v19 }
 0x4ca   : > { %v1753_v5 = vrot.slane %v1746_v1, %v2615_v19 }
 0x4cb   : > { %v1779_v6 = vcombine.low %v1720_v0, %v1736_v2  ;;  %v1778_v9 = vrot.slane %v1771_v3, %v2615_v19 }
 0x4cc   : > { %v1754_v7 = vcombine.low %v1745_v4, %v1753_v5  ;;  %v1755_v8 = vcombine.high %v1745_v4, %v1753_v5 }
 0x4cd   : > { %v1786_v10 = vrot.slane %v1779_v6, %v2615_v19 }
 0x4ce   : > { %v1762_v11 = vrot.slane %v1754_v7, %v2627_v38  ;;  %v1770_v15 = vrot.slane %v1755_v8, %v2627_v38 }
 0x4cf   : > { %v1787_v12 = vcombine.low %v1778_v9, %v1786_v10  ;;  %v1788_v13 = vcombine.high %v1778_v9, %v1786_v10 }
 0x4d0   : > { %v1763_v14 = vcombine.high %v1762_v11, %v2346_v63  ;;  %v1807_v18 = vshrl.u32 %v1762_v11, 16 }
 0x4d1   : > { %v1795_v45 = vrot.slane %v1787_v12, %v2627_v38  ;;  %v1803_v17 = vrot.slane %v1788_v13, %v2627_v38 }
 0x4d2   : > { %v1813_v19 = vshrl.u32 %v1763_v14, 16 }
 0x4d3   : > { %v1808_v20 = vshrl.u32 %v1795_v45, 16  ;;  %v1796_v21 = vcombine.high %v1795_v45, %v2346_v63  ;;  %v1806_v22 = vpack.i.b16 %v1795_v45, %v1762_v11  ;;  %v1818_v23 = vpack.i.b16 %v1803_v17, %v1770_v15 }
 0x4d5   : > { %v1809_v24 = vpack.i.b16 %v1808_v20, %v1807_v18  ;;  %v1814_v25 = vshrl.u32 %v1796_v21, 16  ;;  %v2051_v26 = vcombine.low %v1818_v23, %v1818_v23  ;;  %v1812_v27 = vpack.i.b16 %v1796_v21, %v1763_v14 }
 0x4d7   : > { %1819 = vrot.lane.b32.xlu1 %v1809_v24, %s2348_s9  ;;  %v1815_v28 = vpack.i.b16 %v1814_v25, %v1813_v19  ;;  %1840 = vst.msk [vmem:[%s273_s24 + $0x8] sm:$0xf] %vm1839_vm5, %v2051_v26 }
 0x4d9   : > { %1821 = vrot.lane.b32.xlu0 %v1815_v28, %s2348_s9 }
 0x549   : > { %v1820_v38 = vpop.permute.xlu1 %1819 }
 0x54a   : > { %v1825_v29 = vsel %vm681_vm1, %v1806_v22, %v1820_v38 }
 0x54b   : > { %v1822_v63 = vpop.permute.xlu0 %1821 }
 0x54c   : > { %v1828_v30 = vsel %vm681_vm1, %v1812_v27, %v1822_v63 }
 0x54d   : > { %v2050_v31 = vcombine.low %v1825_v29, %v1828_v30 }
 0x54f   : > { %1838 = vst [vmem:[%s273_s24] sm:$0xff] %v2050_v31 }
 0x550 PF: > { %s14_s17 = sadd.s32 1, %s2342_s17   ;;  %s2757_s15 = smov %s2338_s16 }
 0x551   : > { %p11_p5 = scmp.ge.s32.totalorder %s14_s17, 4   ;;  %s2758_s16 = smov %s2760_s18 }
 0x553   :  { %13 = sbr.rel (!%p11_p5) target bundleno = 2 (0x2), region = 72 }

// kernel: animation_id_attention.5
= control target key start
LH: loop header
LB: loop body
LE: loop exit
PB: predicated region body
PF: predicated region fallthrough
CT: control target
= control target key end

     0   :  { %9 = vsyncpa [#allocation4], 0  ;;  %s1693_s0 = inlined_call_operand.vmem [shape: f32[2,2], index: 0, kind: input, shape index: {}]   ;;  %s1694_s1 = inlined_call_operand.vmem [shape: bf16[2,8,320], index: 1, kind: input, shape index: {}]   ;;  %s1695_s2 = inlined_call_operand.vmem [shape: bf16[320,320], index: 2, kind: input, shape index: {}]   ;;  %s1696_s3 = inlined_call_operand.vmem [shape: f32[1,320], index: 3, kind: input, shape index: {}]   ;;  %s1697_s4 = inlined_call_operand.hbm [shape: f32[2,8,320], index: 4, kind: output, shape index: {}]  }
   0x1   :  { %10 = vsyncpa [#allocation3], 0 }
   0x2   :  { %12 = vsyncpa [#allocation3 + $0x1], 0  ;;  %s1351_s15 = smov 0   ;;  %s1353_s16 = smov 0  }
   0x3   :  { %s1355_s17 = smov 0   ;;  %s1357_s18 = smov 0  }
   0x4   :  { %s1359_s19 = smov 0   ;;  %s1361_s20 = smov 0  }
   0x5 LB: > { %s953_s21 = sadd.s32 4294967295, %s1319_s20   ;;  %s954_s22 = sadd.s32 4294967294, %s1319_s20   ;;  %s1319_s20 = sphi %s1361_s20, %s18_s20   ;;  %s1315_s19 = sphi %s1359_s19, %s1706_s19   ;;  %s1311_s18 = sphi %s1357_s18, %s1705_s18   ;;  %s1307_s17 = sphi %s1355_s17, %s1704_s17   ;;  %s1303_s16 = sphi %s1353_s16, %s1703_s16   ;;  %s1299_s15 = sphi %s1351_s15, %s1702_s15  }
   0x6   : > { %s30_s23 = sadd.s32 1, %s1315_s19  ;;  %s130_s24 = sadd.s32 1, %s1307_s17 }
   0x7   : > { %p32_p0 = scmp.ge.s32.totalorder %s30_s23, 2  ;;  %p140_p1 = scmp.ne.s32.totalorder %s1307_s17, %s1303_s16 }
   0x8   : > { %p141_p2 = scmp.eq.s32.totalorder %s953_s21, 1  ;;  %p146_p3 = scmp.ne.s32.totalorder %s1303_s16, %s1299_s15 }
   0x9   : > { %s1708_s23 = smov (%p32_p0, %s30_s23), 0  ;;  %p147_p5 = scmp.eq.s32.totalorder %s954_s22, 1 }
   0xa   : > { %p1391_p4 = por %p141_p2, %p140_p1  ;;  %s125_s26 = ssub.s32 %s1315_s19, %s1708_s23 }
   0xb   : > { %p955_p6 = scmp.ge.s32.totalorder %s1319_s20, 1  ;;  %p128_p7 = scmp.eq.s32.totalorder %s125_s26, 0 }
   0xc   : > { %p1398_p8 = por %p147_p5, %p146_p3  ;;  %p154_p9 = scmp.lt.s32.totalorder %s1319_s20, 3 }
   0xd   : > { %s1404_s28 = scalar_select %p128_p7, %s1307_s17, %s130_s24  }
   0xe   : > { %p1406_p10 = pnand %p955_p6, %p154_p9  ;;  %p1410_p11 = scmp.eq.s32.totalorder %s953_s21, 0 }
   0xf   : > { %s167_s7 = sshll.u32 %s1693_s0, 4  ;;  %s168_s7 = int_to_ptr.vmem [resolvable:$true] %s167_s7 }
  0x10   : > { %p1079_p12 = pneg %p1406_p10  ;;  %s1222_s8 = scalar_lea.vmem %s168_s7, 32 }
  0x11   : > { %p1223_p0 = scmp.ne.s32.totalorder %s168_s7, %s1222_s8  ;;  %p1230_p5 = scmp.lt.s32.totalorder %s168_s7, %s168_s7 }
  0x12   : > { %p1080_p13 = pnand %p1410_p11, %p1079_p12  ;;  %p1231_p6 = scmp.lt.s32.totalorder %s1222_s8, %s1222_s8 }
  0x14   : > { %p1224_p1 = pneg %p1080_p13  ;;  %p1232_p7 = por %p1231_p6, %p1230_p5 }
  0x16   : > { %p1225_p2 = pnand %p1224_p1, %p1223_p0 }
  0x18   : > { %p1226_p3 = pneg %p1225_p2 }
  0x1a   : > { %p1233_p9 = pnand %p1232_p7, %p1226_p3 }
  0x1c   : > { %1236 = shalt.err (!%p1233_p9)
}
  0x1d   : > { %s1321_s9 = smov [#allocation2]   ;;  %198 = sbr.rel (%p1406_p10) target bundleno = 335 (0x14f), region = 36 }
  0x1e   : > { %1082 = dma.vmem_to_smem (!%p1080_p13), %s168_s7, 32, %s1321_s9, [#allocation4]  }
  0x24   : > { %1290 = dma.done.wait (%p1410_p11), [#allocation4], 32  }
  0x25   : > { %1292 = vsyncadd (%p1410_p11), [#allocation4], 4294967264 }
  0x26   : > { %204 = sfence }
  0x27   : > { %v1142_v0 = vld [vmem:[%s1695_s2 + $0x4] ss:$12 sps:$4 sm:$0xff]   ;;  %p229_p12 = scmp.lt.s32.totalorder %s1311_s18, 1  ;;  %v1322_v2 = vmov 0   ;;  %s961_s14 = sshll.u32 %s1311_s18, 7  ;;  %vm676_vm0 = vcmask 523264  }
  0x28   : > { %v1144_v1 = vld [vmem:[%s1695_s2 + $0x184] ss:$12 sps:$4 sm:$0xff]   ;;  %753 = vmatprep.mubr.bf16.mxu1 %v1322_v2  ;;  %680 = vmatprep.subr.bf16.mxu0 %v1142_v0  ;;  %v1146_v3 = vld [vmem:[%s1695_s2] ss:$12 sps:$4 sm:$0xff]   ;;  %v1148_v5 = vld [vmem:[%s1695_s2 + $0x1c] ss:$12 sps:$4 sm:$0xff]  }
  0x29   : > { %v1147_v4 = vld [vmem:[%s1695_s2 + $0x180] ss:$12 sps:$4 sm:$0xff]   ;;  %s230_s29 = scalar_select %p229_p12, %s1311_s18, 1  ;;  %721 = vmatprep.subr.bf16.mxu1 %v1144_v1  ;;  %681 = vmatpush1.bf16.msra.mxu0 %v1146_v3  ;;  %v1150_v6 = vld [vmem:[%s1695_s2 + $0x19c] ss:$12 sps:$4 sm:$0xff]   ;;  %vm1324_vm1 = vmmov 0  }
  0x2a   : > { %s241_s6 = sadd.s32 1, %s961_s14  ;;  %722 = vmatpush1.bf16.msra.mxu1 %v1147_v4  ;;  %v1152_v7 = vld [vmem:[%s1695_s2 + $0x18] ss:$12 sps:$4 sm:$0xff]   ;;  %682 = vmatprep.subr.bf16.mxu0 %v1148_v5  ;;  %s240_s13 = sld [smem:[#allocation2 + %s961_s14]]  ;;  %v1154_v9 = vld [vmem:[%s1695_s2 + $0x34] ss:$12 sps:$4 sm:$0xff]  }
  0x2b   : > { %v1153_v8 = vld [vmem:[%s1695_s2 + $0x198] ss:$12 sps:$4 sm:$0xff]   ;;  %723 = vmatprep.subr.bf16.mxu1 %v1150_v6  ;;  %s1071_s24 = smul.u32 12, %s230_s29  ;;  %s242_s26 = sld [smem:[#allocation2 + %s241_s6]]  ;;  %v1156_v10 = vld [vmem:[%s1695_s2 + $0x1b4] ss:$12 sps:$4 sm:$0xff]  }
  0x2c   : > { %v1158_v11 = vld [vmem:[%s1695_s2 + $0x30] ss:$12 sps:$4 sm:$0xff]   ;;  %v1160_v13 = vld [vmem:[%s1695_s2 + $0x4c] ss:$12 sps:$4 sm:$0xff]   ;;  %v1164_v15 = vld [vmem:[%s1695_s2 + $0x48] ss:$12 sps:$4 sm:$0xff]  }
  0x2d   : > { %v1159_v12 = vld [vmem:[%s1695_s2 + $0x1b0] ss:$12 sps:$4 sm:$0xff]   ;;  %683 = vmatpush1.bf16.msra.mxu0 %v1152_v7  ;;  %v1162_v14 = vld [vmem:[%s1695_s2 + $0x1cc] ss:$12 sps:$4 sm:$0xff]   ;;  %s1478_s5 = scalar_lea.vmem %s1694_s1, %s1071_s24  ;;  %v1165_v16 = vld [vmem:[%s1695_s2 + $0x1c8] ss:$12 sps:$4 sm:$0xff]  }
  0x2e   : > { %724 = vmatpush1.bf16.msra.mxu1 %v1153_v8  ;;  %684 = vmatprep.subr.bf16.mxu0 %v1154_v9  ;;  %v1166_v17 = vld [vmem:[%s1695_s2 + $0x64] ss:$12 sps:$4 sm:$0xff]   ;;  %v1168_v18 = vld [vmem:[%s1695_s2 + $0xc8] ss:$12 sps:$4 sm:$0xff]   ;;  %v1169_v23 = vld [vmem:[%s1695_s2 + $0x60] ss:$12 sps:$4 sm:$0xff]  }
  0x2f   : > { %725 = vmatprep.subr.bf16.mxu1 %v1156_v10  ;;  %v244_v19 = vld [vmem:[%s1478_s5 + $0x8] sm:$0xf]  ;;  %v1173_v28 = vld [vmem:[%s1695_s2 + $0xe0] ss:$12 sps:$4 sm:$0xff]   ;;  %v1174_v30 = vld [vmem:[%s1695_s2 + $0x78] ss:$12 sps:$4 sm:$0xff]  }
  0x30   : > { %v1490_v20 = vstv %s240_s13  ;;  %v247_v21 = vunpack.c.l.bf16 %v244_v19  ;;  %v1171_v25 = vld [vmem:[%s1695_s2 + $0x7c] ss:$12 sps:$4 sm:$0xff]   ;;  %v1176_v31 = vld [vmem:[%s1695_s2 + $0x94] ss:$12 sps:$4 sm:$0xff]   ;;  %v1178_v33 = vld [vmem:[%s1695_s2 + $0xf8] ss:$12 sps:$4 sm:$0xff]  }
  0x31   : > { %685 = vmatpush1.bf16.msra.mxu0 %v1158_v11  ;;  %v1492_v22 = vstv %s242_s26  ;;  %v1170_v27 = vld [vmem:[%s1695_s2 + $0x8] ss:$12 sps:$4 sm:$0xff]   ;;  %v1175_v32 = vld [vmem:[%s1695_s2 + $0x20] ss:$12 sps:$4 sm:$0xff]   ;;  %v1179_v34 = vld [vmem:[%s1695_s2 + $0x90] ss:$12 sps:$4 sm:$0xff]  }
  0x32   : > { %726 = vmatpush1.bf16.msra.mxu1 %v1159_v12  ;;  %686 = vmatprep.subr.bf16.mxu0 %v1160_v13  ;;  %v251_v24 = vmul.f32 %v1490_v20, %v247_v21  ;;  %v1181_v35 = vld [vmem:[%s1695_s2 + $0xac] ss:$12 sps:$4 sm:$0xff]   ;;  %v1183_v37 = vld [vmem:[%s1695_s2 + $0x110] ss:$12 sps:$4 sm:$0xff]   ;;  %v1184_v38 = vld [vmem:[%s1695_s2 + $0xa8] ss:$12 sps:$4 sm:$0xff]  }
  0x33   : > { %727 = vmatprep.subr.bf16.mxu1 %v1162_v14  ;;  %v1180_v36 = vld [vmem:[%s1695_s2 + $0x38] ss:$12 sps:$4 sm:$0xff]   ;;  %v1185_v40 = vld [vmem:[%s1695_s2 + $0x50] ss:$12 sps:$4 sm:$0xff]   ;;  %v1188_v41 = vld [vmem:[%s1695_s2 + $0x128] ss:$12 sps:$4 sm:$0xff]  }
  0x34   : > { %v255_v26 = vadd.f32 %v1492_v22, %v251_v24  ;;  %v1186_v39 = vld [vmem:[%s1695_s2 + $0xc4] ss:$12 sps:$4 sm:$0xff]   ;;  %v1189_v42 = vld [vmem:[%s1695_s2 + $0xc0] ss:$12 sps:$4 sm:$0xff]   ;;  %v1191_v43 = vld [vmem:[%s1695_s2 + $0xdc] ss:$12 sps:$4 sm:$0xff]  }
  0x35   : > { %687 = vmatpush1.bf16.msra.mxu0 %v1164_v15  ;;  %v1190_v44 = vld [vmem:[%s1695_s2 + $0x68] ss:$12 sps:$4 sm:$0xff]   ;;  %v1193_v45 = vld [vmem:[%s1695_s2 + $0x140] ss:$12 sps:$4 sm:$0xff]   ;;  %v1194_v46 = vld [vmem:[%s1695_s2 + $0xd8] ss:$12 sps:$4 sm:$0xff]  }
  0x36   : > { %728 = vmatpush1.bf16.msra.mxu1 %v1165_v16  ;;  %688 = vmatprep.subr.bf16.mxu0 %v1166_v17  ;;  %v1508_v29 = vpack.c.bf16 %v255_v26, %v255_v26  ;;  %v1196_v47 = vld [vmem:[%s1695_s2 + $0xf4] ss:$12 sps:$4 sm:$0xff]   ;;  %v1198_v50 = vld [vmem:[%s1695_s2 + $0x158] ss:$12 sps:$4 sm:$0xff]   ;;  %v1199_v53 = vld [vmem:[%s1695_s2 + $0xf0] ss:$12 sps:$4 sm:$0xff]  }
  0x37   : > { %1027 = vmatprep.subr.bf16.mxu1 %v1168_v18  ;;  %v1195_v48 = vld [vmem:[%s1695_s2 + $0x80] ss:$12 sps:$4 sm:$0xff]   ;;  %v1200_v57 = vld [vmem:[%s1695_s2 + $0x98] ss:$12 sps:$4 sm:$0xff]   ;;  %v1203_v58 = vld [vmem:[%s1695_s2 + $0x170] ss:$12 sps:$4 sm:$0xff]   ;;  %v341_v18 = vlaneseq }
  0x38   : > { %v243_v49 = vld [vmem:[%s1478_s5] sm:$0xff]  ;;  %v1201_v54 = vld [vmem:[%s1695_s2 + $0x10c] ss:$12 sps:$4 sm:$0xff]   ;;  %v1204_v60 = vld [vmem:[%s1695_s2 + $0x108] ss:$12 sps:$4 sm:$0xff]   ;;  %v1323_v5 = vmov 0.0  }
  0x39   : > { %689 = vmatpush1.bf16.msra.mxu0 %v1169_v23  ;;  %1022 = vmatmul.mubr.msk.bf16.vlgmr.msra.gmra.mrb[0].mxu1 %vm676_vm0, %v1508_v29  ;;  %v245_v51 = vunpack.c.l.bf16 %v243_v49  ;;  %v246_v52 = vunpack.c.h.bf16 %v243_v49  ;;  %v1206_v61 = vld [vmem:[%s1695_s2 + $0x124] ss:$12 sps:$4 sm:$0xff]   ;;  %v1208_v1 = vld [vmem:[%s1695_s2 + $0x120] ss:$12 sps:$4 sm:$0xff]   ;;  %v1210_v2 = vld [vmem:[%s1695_s2 + $0x13c] ss:$12 sps:$4 sm:$0xff]  }
  0x3a   : > { %690 = vmatprep.subr.bf16.mxu0 %v1171_v25  ;;  %1028 = vmatpush3.bf16.msra.mxu1 %v1170_v27  ;;  %v1205_v0 = vld [vmem:[%s1695_s2 + $0xb0] ss:$12 sps:$4 sm:$0xff]   ;;  %v1209_v4 = vld [vmem:[%s1695_s2 + $0x188] ss:$12 sps:$4 sm:$0xff]   ;;  %v1212_v6 = vld [vmem:[%s1695_s2 + $0x138] ss:$12 sps:$4 sm:$0xff]  }
  0x3b   : > { %1029 = vmatprep.subr.bf16.mxu1 %v1173_v28  ;;  %v250_v55 = vmul.f32 %v1490_v20, %v246_v52  ;;  %v249_v56 = vmul.f32 %v1490_v20, %v245_v51  ;;  %v1214_v7 = vld [vmem:[%s1695_s2 + $0x154] ss:$12 sps:$4 sm:$0xff]   ;;  %v1216_v9 = vld [vmem:[%s1695_s2 + $0x150] ss:$12 sps:$4 sm:$0xff]   ;;  %v1218_v10 = vld [vmem:[%s1695_s2 + $0x16c] ss:$12 sps:$4 sm:$0xff]  }
  0x3c   : > { %v1213_v8 = vld [vmem:[%s1695_s2 + $0x1a0] ss:$12 sps:$4 sm:$0xff]   ;;  %v1217_v11 = vld [vmem:[%s1695_s2 + $0x1b8] ss:$12 sps:$4 sm:$0xff]   ;;  %v1220_v12 = vld [vmem:[%s1695_s2 + $0x168] ss:$12 sps:$4 sm:$0xff]  }
  0x3d   : > { %691 = vmatpush1.bf16.msra.mxu0 %v1174_v30  ;;  %v254_v59 = vadd.f32 %v1492_v22, %v250_v55  ;;  %v253_v63 = vadd.f32 %v1492_v22, %v249_v56  ;;  %v1221_v13 = vld [vmem:[%s1695_s2 + $0x1d0] ss:$12 sps:$4 sm:$0xff]   ;;  %v342_v24 = vshrl.u32 %v341_v18, 7  ;;  %s226_s5 = sand.u32 1, %s1303_s16   ;;  %v339_v28 = vld [vmem:[%s1696_s3] sm:$0x7] }
  0x3e   : > { %692 = vmatprep.subr.bf16.mxu0 %v1176_v31  ;;  %1030 = vmatpush3.bf16.msra.mxu1 %v1175_v32  ;;  %s1070_s7 = smul.u32 24, %s226_s5  ;;  %s1325_s6 = smov [#allocation5]  }
  0x3f   : > { %1031 = vmatprep.subr.bf16.mxu1 %v1178_v33  ;;  %v257_v62 = vpack.c.bf16 %v254_v59, %v254_v59  ;;  %v256_v3 = vpack.c.bf16 %v253_v63, %v253_v63  ;;  %v343_v25 = vsub.s32 0, %v342_v24  ;;  %v351_v26 = vsub.s32 2, %v342_v24  ;;  %s1072_s8 = smul.u32 384, %s1311_s18  ;;  %s846_s18 = scalar_lea.sflag [#allocation3], %s226_s5 }
  0x40   : > { %v347_v27 = vsub.s32 1, %v342_v24  ;;  %s228_s9 = scalar_lea.vmem [#allocation5], %s1070_s7  ;;  %s1241_s12 = sshll.u32 %s1325_s6, 4  ;;  %s1242_s12 = int_to_ptr.vmem [resolvable:$false] %s1241_s12 }
  0x41   : > { %693 = vmatpush1.bf16.msra.mxu0 %v1179_v34  ;;  %794 = vmatprep.mubr.bf16.mxu1 %v257_v62  ;;  %v352_v30 = vrot.slane %v339_v28, %v351_v26  ;;  %s862_s10 = sshll.u32 %s228_s9, 4  ;;  %s1643_s24 = scalar_lea.hbm %s1697_s4, %s1072_s8  ;;  %s1645_s10 = int_to_ptr.vmem [resolvable:$true] %s862_s10 }
  0x42   : > { %694 = vmatprep.subr.bf16.mxu0 %v1181_v35  ;;  %1032 = vmatpush3.bf16.msra.mxu1 %v1180_v36  ;;  %v348_v31 = vrot.slane %v339_v28, %v347_v27  ;;  %s1237_s29 = scalar_lea.vmem %s1645_s10, 384  ;;  %s1243_s13 = scalar_lea.vmem %s1242_s12, 768 }
  0x43   : > { %1033 = vmatprep.subr.bf16.mxu1 %v1183_v37  ;;  %712 = vmatprep.mubr.bf16.mxu0 %v257_v62  ;;  %p1238_p10 = scmp.ne.s32.totalorder %s1645_s10, %s1237_s29  ;;  %p1244_p0 = scmp.lt.s32.totalorder %s1645_s10, %s1242_s12 }
  0x44   : > { %p1245_p1 = scmp.lt.s32.totalorder %s1243_s13, %s1237_s29 }
  0x45   : > { %695 = vmatpush1.bf16.msra.mxu0 %v1184_v38  ;;  %p1239_p11 = pnand %p1238_p10, %p1391_p4 }
  0x46   : > { %696 = vmatprep.subr.bf16.mxu0 %v1186_v39  ;;  %1034 = vmatpush3.bf16.msra.mxu1 %v1185_v40  ;;  %p1246_p2 = por %p1245_p1, %p1244_p0 }
  0x47   : > { %1035 = vmatprep.subr.bf16.mxu1 %v1188_v41  ;;  %p1240_p13 = pneg %p1239_p11 }
  0x49   : > { %697 = vmatpush1.bf16.msra.mxu0 %v1189_v42  ;;  %p1247_p3 = pnand %p1246_p2, %p1240_p13 }
  0x4a   : > { %698 = vmatprep.subr.bf16.mxu0 %v1191_v43  ;;  %1036 = vmatpush3.bf16.msra.mxu1 %v1190_v44 }
  0x4b   : > { %1037 = vmatprep.subr.bf16.mxu1 %v1193_v45 }
  0x4d   : > { %699 = vmatpush1.bf16.msra.mxu0 %v1194_v46 }
  0x4e   : > { %700 = vmatprep.subr.bf16.mxu0 %v1196_v47  ;;  %1038 = vmatpush3.bf16.msra.mxu1 %v1195_v48 }
  0x4f   : > { %1039 = vmatprep.subr.bf16.mxu1 %v1198_v50 }
  0x51   : > { %701 = vmatpush1.bf16.msra.mxu0 %v1199_v53 }
  0x52   : > { %702 = vmatprep.subr.bf16.mxu0 %v1201_v54  ;;  %1040 = vmatpush3.bf16.msra.mxu1 %v1200_v57 }
  0x53   : > { %1041 = vmatprep.subr.bf16.mxu1 %v1203_v58 }
  0x55   : > { %703 = vmatpush1.bf16.msra.mxu0 %v1204_v60 }
  0x56   : > { %704 = vmatprep.subr.bf16.mxu0 %v1206_v61  ;;  %1042 = vmatpush3.bf16.msra.mxu1 %v1205_v0 }
  0x57   : > { %1054 = vmatprep.subr.bf16.mxu1 %v1323_v5 }
  0x59   : > { %705 = vmatpush1.bf16.msra.mxu0 %v1208_v1  ;;  %795 = vmatmul.mubr.bf16.vlgmr.msra.gmra.mrb[4].mxu1 %v256_v3 }
  0x5a   : > { %706 = vmatprep.subr.bf16.mxu0 %v1210_v2  ;;  %1055 = vmatpush3.bf16.msra.mxu1 %v1209_v4 }
  0x5b   : > { %1062 = vmatprep.mubr.msk.bf16.mxu1 %vm1324_vm1, %v1323_v5  ;;  %1056 = vmatprep.subr.bf16.mxu1 %v1323_v5 }
  0x5d   : > { %707 = vmatpush1.bf16.msra.mxu0 %v1212_v6 }
  0x5e   : > { %708 = vmatprep.subr.bf16.mxu0 %v1214_v7  ;;  %1057 = vmatpush3.bf16.msra.mxu1 %v1213_v8 }
  0x5f   : > { %1058 = vmatprep.subr.bf16.mxu1 %v1323_v5 }
  0x61   : > { %709 = vmatpush1.bf16.msra.mxu0 %v1216_v9 }
  0x62   : > { %710 = vmatprep.subr.bf16.mxu0 %v1218_v10  ;;  %1059 = vmatpush3.bf16.msra.mxu1 %v1217_v11 }
  0x63   : > { %1060 = vmatprep.subr.bf16.mxu1 %v1323_v5 }
  0x65   : > { %711 = vmatpush1.bf16.msra.mxu0 %v1220_v12 }
  0x66   : > { %1061 = vmatpush3.bf16.msra.mxu1 %v1221_v13 }
  0x68   : > { %713 = vmatmul.mubr.bf16.vlgmr.msra.gmra.mrb[0].mxu0 %v256_v3 }
  0x69   : > { %1063 = vmatmul.mubr.msk.bf16.vlgmr.msra.gmra.mrb[8].mxu1 %vm676_vm0, %v1508_v29  ;;  %v344_v29 = vrot.slane %v339_v28, %v343_v25 }
 0x10c   : > { %v755_v14 = vpop.f32.mrb[0].mxu1 }
 0x10d   : > { %v757_v15 = vpop.f32.mrb[1].mxu1 }
 0x10e   : > { %v759_v16 = vpop.f32.mrb[2].mxu1 }
 0x10f   : > { %v760_v17 = vpop.f32.mrb[3].mxu1 }
 0x12c   : > { %v1043_v19 = vpop.f32.mrb[4].mxu1 }
 0x12d   : > { %v1044_v20 = vpop.f32.mrb[5].mxu1 }
 0x12e   : > { %v1045_v21 = vadd.f32 %v1044_v20, %v1043_v19  ;;  %v1046_v22 = vpop.f32.mrb[6].mxu1 }
 0x12f   : > { %v1047_v23 = vpop.f32.mrb[7].mxu1 }
 0x130   : > { %v797_v35 = vadd.f32 %v1045_v21, %v352_v30 }
 0x13b   : > { %v714_v32 = vpop.f32.mrb[0].mxu0 }
 0x13c   : > { %v715_v33 = vadd.f32 %v714_v32, %v344_v29  ;;  %v716_v34 = vpop.f32.mrb[1].mxu0  ;;  %v836_v39 = vpop.f32.mrb[8].mxu1 }
 0x13d   : > { %v717_v36 = vadd.f32 %v716_v34, %v348_v31  ;;  %v718_v37 = vpop.f32.mrb[2].mxu0  ;;  %v837_v41 = vadd.f32 %v836_v39, %v797_v35  ;;  %v1064_v43 = vpop.f32.mrb[9].mxu1 }
 0x13e   : > { %v756_v38 = vadd.f32 %v755_v14, %v715_v33  ;;  %v719_v40 = vpop.f32.mrb[3].mxu0  ;;  %v839_v44 = vpop.f32.mrb[10].mxu1 }
 0x13f   : > { %v758_v42 = vadd.f32 %v757_v15, %v717_v36  ;;  %844 = vst.msk [vmem:[%s228_s9 + $0x10] sm:$0xff] %vm676_vm0, %v837_v41  ;;  %v1065_v45 = vpop.f32.mrb[11].mxu1 }
 0x140   : > { %842 = vst [vmem:[%s228_s9] sm:$0xff] %v756_v38 }
 0x141   : > { %843 = vst [vmem:[%s228_s9 + $0x8] sm:$0xff] %v758_v42 }
 0x142   : > { %1250 = shalt.err (!%p1247_p3)
}
 0x143   : > { %s1251_s26 = scalar_lea.hbm %s1643_s24, 384  ;;  %s1255_s22 = scalar_lea.hbm %s1697_s4, 768 }
 0x144   : > { %p1252_p5 = scmp.ne.s32.totalorder %s1643_s24, %s1251_s26  ;;  %p1256_p9 = scmp.lt.u32.totalorder %s1643_s24, %s1697_s4 }
 0x145   : > { %p1257_p12 = scmp.lt.u32.totalorder %s1255_s22, %s1251_s26  ;;  %p1259_p11 = scmp.lt.u32.totalorder %s1251_s26, %s1643_s24 }
 0x146   : > { %p1253_p6 = pnand %p1252_p5, %p1391_p4 }
 0x147   : > { %p1258_p10 = por %p1257_p12, %p1256_p9 }
 0x148   : > { %p1254_p7 = pneg %p1253_p6 }
 0x149   : > { %p1260_p13 = por %p1259_p11, %p1258_p10 }
 0x14b   : > { %p1261_p0 = pnand %p1260_p13, %p1254_p7 }
 0x14d   : > { %1264 = shalt.err (!%p1261_p0)
}
 0x14e   : > { %1077 = dma.vmem_to_hbm [thread:$0]  (%p1391_p4), %s1645_s10, 384, %s1643_s24, %s846_s18  }
 0x14f PF: > { %p1089_p1 = scmp.ge.s32.totalorder %s1319_s20, 2  ;;  %s874_s8 = sand.u32 1, %s1299_s15  }
 0x150   : > { %s875_s9 = scalar_lea.sflag [#allocation3], %s874_s8 }
 0x151   : > { %p1084_p2 = pnand %p1089_p1, %p1398_p8 }
 0x153   : > { %1294 = dma.done.wait (!%p1084_p2), %s875_s9, 384  }
 0x154   : > { %1296 = vsyncadd (!%p1084_p2), %s875_s9, 4294966912  ;;  %s18_s20 = sadd.s32 1, %s1319_s20   ;;  %s1702_s15 = smov %s1303_s16 }
 0x155   : > { %p15_p3 = scmp.ge.s32.totalorder %s18_s20, 4   ;;  %s1703_s16 = smov %s1307_s17 }
 0x156   : > { %s1704_s17 = smov %s1404_s28  ;;  %s1705_s18 = smov %s1315_s19 }
 0x157   : > { %s1706_s19 = smov %s1708_s23  ;;  %17 = sbr.rel (!%p15_p3) target bundleno = 5 (0x5), region = 76 }
 0x15e   :  { %880 = vsyncpa [#allocation3], 1 }
 0x15f   :  { %882 = vsyncpa [#allocation3 + $0x1], 1 }
 0x160   :  { %883 = vsyncpa [#allocation4], 1 }
 0x161   :  { %885 = vsyncpa [#allocation4 + $0x1], 1 }

// kernel: animation_id_attention.3
= control target key start
LH: loop header
LB: loop body
LE: loop exit
PB: predicated region body
PF: predicated region fallthrough
CT: control target
= control target key end

     0   :  { %s5418_s15 = smov 0   ;;  %s6802_s0 = inlined_call_operand.vmem [shape: f32[2,12,1024], index: 0, kind: input, shape index: {}]   ;;  %s6803_s1 = inlined_call_operand.vmem [shape: bf16[1024,320], index: 1, kind: input, shape index: {}]   ;;  %s6804_s2 = inlined_call_operand.vmem [shape: bf16[1024,320], index: 2, kind: input, shape index: {}]   ;;  %s6805_s3 = inlined_call_operand.vmem [shape: bf16[2,5,12,64], index: 3, kind: output, shape index: {0}]   ;;  %s6806_s4 = inlined_call_operand.vmem [shape: bf16[2,5,12,64], index: 4, kind: output, shape index: {1}]  }
   0x1 LB: > { %s4234_s16 = sadd.s32 4294967295, %s5387_s15   ;;  %p4238_p0 = scmp.ge.s32.totalorder %s5387_s15, 1  ;;  %s5387_s15 = sphi %s5418_s15, %s15_s15  }
   0x2   : > { %p165_p1 = scmp.lt.s32.totalorder %s5387_s15, 3 }
   0x4   : > { %p166_p2 = pnand %p4238_p0, %p165_p1 }
   0x5   : > { %v4869_v0 = vld [vmem:[%s6803_s1 + $0x4] ss:$12 sps:$4 sm:$0xff] (!%p166_p2)   ;;  %v4871_v1 = vld [vmem:[%s6803_s1 + $0xc8] ss:$12 sps:$4 sm:$0xff] (!%p166_p2)   ;;  %v4872_v2 = vld [vmem:[%s6803_s1] ss:$12 sps:$4 sm:$0xff] (!%p166_p2)  }
   0x6   : > { %169 = sbr.rel (%p166_p2) target bundleno = 771 (0x303), region = 32  ;;  %1516 = vmatprep.subr.bf16.mxu0 (!%p166_p2), %v4869_v0  ;;  %4656 = vmatprep.subr.bf16.mxu1 (!%p166_p2), %v4871_v1  ;;  %v4873_v3 = vld [vmem:[%s6803_s1 + $0x8] ss:$12 sps:$4 sm:$0xff] (!%p166_p2)   ;;  %v4876_v5 = vld [vmem:[%s6803_s1 + $0xe0] ss:$12 sps:$4 sm:$0xff] (!%p166_p2)   ;;  %p196_p3 = scmp.lt.s32.totalorder (!%p166_p2), %s4234_s16, 1 }
   0x7   : > { %1517 = vmatpush1.bf16.msra.mxu0 (!%p166_p2), %v4872_v2  ;;  %v4874_v4 = vld [vmem:[%s6803_s1 + $0x1c] ss:$12 sps:$4 sm:$0xff] (!%p166_p2)   ;;  %4657 = vmatpush3.bf16.msra.mxu1 (!%p166_p2), %v4873_v3  ;;  %v4877_v6 = vld [vmem:[%s6803_s1 + $0x18] ss:$12 sps:$4 sm:$0xff] (!%p166_p2)   ;;  %v4878_v7 = vld [vmem:[%s6803_s1 + $0x20] ss:$12 sps:$4 sm:$0xff] (!%p166_p2)  }
   0x8   : > { %1518 = vmatprep.subr.bf16.mxu0 (!%p166_p2), %v4874_v4  ;;  %4658 = vmatprep.subr.bf16.mxu1 (!%p166_p2), %v4876_v5  ;;  %v4879_v8 = vld [vmem:[%s6803_s1 + $0x34] ss:$12 sps:$4 sm:$0xff] (!%p166_p2)   ;;  %v4881_v9 = vld [vmem:[%s6803_s1 + $0xf8] ss:$12 sps:$4 sm:$0xff] (!%p166_p2)   ;;  %v4882_v10 = vld [vmem:[%s6803_s1 + $0x30] ss:$12 sps:$4 sm:$0xff] (!%p166_p2)  }
   0x9   : > { %v4883_v11 = vld [vmem:[%s6803_s1 + $0x38] ss:$12 sps:$4 sm:$0xff] (!%p166_p2)   ;;  %v4886_v13 = vld [vmem:[%s6803_s1 + $0x110] ss:$12 sps:$4 sm:$0xff] (!%p166_p2)   ;;  %v4887_v14 = vld [vmem:[%s6803_s1 + $0x48] ss:$12 sps:$4 sm:$0xff] (!%p166_p2)  }
   0xa   : > { %v4884_v12 = vld [vmem:[%s6803_s1 + $0x4c] ss:$12 sps:$4 sm:$0xff] (!%p166_p2)   ;;  %v4888_v15 = vld [vmem:[%s6803_s1 + $0x50] ss:$12 sps:$4 sm:$0xff] (!%p166_p2)   ;;  %v4891_v17 = vld [vmem:[%s6803_s1 + $0x128] ss:$12 sps:$4 sm:$0xff] (!%p166_p2)  }
   0xb   : > { %1519 = vmatpush1.bf16.msra.mxu0 (!%p166_p2), %v4877_v6  ;;  %4659 = vmatpush3.bf16.msra.mxu1 (!%p166_p2), %v4878_v7  ;;  %v4889_v16 = vld [vmem:[%s6803_s1 + $0x64] ss:$12 sps:$4 sm:$0xff] (!%p166_p2)   ;;  %v4892_v18 = vld [vmem:[%s6803_s1 + $0x60] ss:$12 sps:$4 sm:$0xff] (!%p166_p2)   ;;  %v4893_v19 = vld [vmem:[%s6803_s1 + $0x68] ss:$12 sps:$4 sm:$0xff] (!%p166_p2)  }
   0xc   : > { %1520 = vmatprep.subr.bf16.mxu0 (!%p166_p2), %v4879_v8  ;;  %4660 = vmatprep.subr.bf16.mxu1 (!%p166_p2), %v4881_v9  ;;  %v4894_v20 = vld [vmem:[%s6803_s1 + $0x7c] ss:$12 sps:$4 sm:$0xff] (!%p166_p2)   ;;  %v4896_v21 = vld [vmem:[%s6803_s1 + $0x140] ss:$12 sps:$4 sm:$0xff] (!%p166_p2)   ;;  %v4897_v22 = vld [vmem:[%s6803_s1 + $0x78] ss:$12 sps:$4 sm:$0xff] (!%p166_p2)  }
   0xd   : > { %s6808_s16 = smov (!%p196_p3, %s4234_s16), 1  ;;  %v4898_v23 = vld [vmem:[%s6803_s1 + $0x80] ss:$12 sps:$4 sm:$0xff]   ;;  %v4901_v25 = vld [vmem:[%s6803_s1 + $0x158] ss:$12 sps:$4 sm:$0xff]   ;;  %s5390_s30 = smov 64  }
   0xe   : > { %s4655_s17 = sshll.u32 %s6808_s16, 7  ;;  %v4899_v24 = vld [vmem:[%s6803_s1 + $0x94] ss:$12 sps:$4 sm:$0xff]   ;;  %v4902_v26 = vld [vmem:[%s6803_s1 + $0x90] ss:$12 sps:$4 sm:$0xff]   ;;  %vm3796_vm0 = vcmask 519168  }
   0xf   : > { %1521 = vmatpush1.bf16.msra.mxu0 %v4882_v10  ;;  %4661 = vmatpush3.bf16.msra.mxu1 %v4883_v11  ;;  %s5517_s26 = scalar_lea.vmem %s6802_s0, %s4655_s17  ;;  %v4903_v27 = vld [vmem:[%s6803_s1 + $0x98] ss:$12 sps:$4 sm:$0xff]   ;;  %v4906_v29 = vld [vmem:[%s6803_s1 + $0x170] ss:$12 sps:$4 sm:$0xff]   ;;  %v4907_v30 = vld [vmem:[%s6803_s1 + $0xa8] ss:$12 sps:$4 sm:$0xff]  }
  0x10   : > { %1522 = vmatprep.subr.bf16.mxu0 %v4884_v12  ;;  %4662 = vmatprep.subr.bf16.mxu1 %v4886_v13  ;;  %v4904_v28 = vld [vmem:[%s6803_s1 + $0xac] ss:$12 sps:$4 sm:$0xff]   ;;  %v221_v32 = vld [vmem:[%s5517_s26 + $0x48] sm:$0xf]  ;;  %v4908_v33 = vld [vmem:[%s6803_s1 + $0xb0] ss:$12 sps:$4 sm:$0xff]  }
  0x11   : > { %v213_v31 = vld [vmem:[%s5517_s26 + $0x8] sm:$0xff]  ;;  %v4909_v35 = vld [vmem:[%s6803_s1 + $0xc4] ss:$12 sps:$4 sm:$0xff]   ;;  %v220_v37 = vld [vmem:[%s5517_s26 + $0x40] sm:$0xf]  ;;  %vm3798_vm1 = vcmask 517120  }
  0x12   : > { %v5536_v34 = vpack.c.bf16 %v221_v32, %v213_v31  ;;  %v212_v36 = vld [vmem:[%s5517_s26] sm:$0xff]  ;;  %v4911_v38 = vld [vmem:[%s6803_s1 + $0x248] ss:$12 sps:$4 sm:$0xff]   ;;  %v4922_v48 = vld [vmem:[%s6803_s1 + $0xf0] ss:$12 sps:$4 sm:$0xff]  }
  0x13   : > { %1523 = vmatpush1.bf16.msra.mxu0 %v4887_v14  ;;  %4663 = vmatpush3.bf16.msra.mxu1 %v4888_v15  ;;  %v5548_v39 = vpack.c.bf16 %v220_v37, %v212_v36  ;;  %v4912_v40 = vld [vmem:[%s6803_s1 + $0xc0] ss:$12 sps:$4 sm:$0xff]   ;;  %v4913_v41 = vld [vmem:[%s6803_s1 + $0x188] ss:$12 sps:$4 sm:$0xff]   ;;  %v4917_v44 = vld [vmem:[%s6803_s1 + $0xd8] ss:$12 sps:$4 sm:$0xff]  }
  0x14   : > { %1524 = vmatprep.subr.bf16.mxu0 %v4889_v16  ;;  %4664 = vmatprep.subr.bf16.mxu1 %v4891_v17  ;;  %v4914_v42 = vld [vmem:[%s6803_s1 + $0xdc] ss:$12 sps:$4 sm:$0xff]   ;;  %v4916_v43 = vld [vmem:[%s6803_s1 + $0x260] ss:$12 sps:$4 sm:$0xff]   ;;  %v4921_v47 = vld [vmem:[%s6803_s1 + $0x278] ss:$12 sps:$4 sm:$0xff]  }
  0x15   : > { %1720 = vmatprep.mubr.bf16.mxu1 %v5536_v34  ;;  %1548 = vmatprep.mubr.bf16.mxu0 %v5536_v34  ;;  %v4918_v45 = vld [vmem:[%s6803_s1 + $0x1a0] ss:$12 sps:$4 sm:$0xff]   ;;  %v4923_v49 = vld [vmem:[%s6803_s1 + $0x1b8] ss:$12 sps:$4 sm:$0xff]   ;;  %v4926_v51 = vld [vmem:[%s6803_s1 + $0x290] ss:$12 sps:$4 sm:$0xff]  }
  0x16   : > { %v4919_v46 = vld [vmem:[%s6803_s1 + $0xf4] ss:$12 sps:$4 sm:$0xff]   ;;  %v4924_v50 = vld [vmem:[%s6803_s1 + $0x10c] ss:$12 sps:$4 sm:$0xff]   ;;  %v4928_v53 = vld [vmem:[%s6803_s1 + $0x1d0] ss:$12 sps:$4 sm:$0xff]  }
  0x17   : > { %1525 = vmatpush1.bf16.msra.mxu0 %v4892_v18  ;;  %4665 = vmatpush3.bf16.msra.mxu1 %v4893_v19  ;;  %v4927_v52 = vld [vmem:[%s6803_s1 + $0x108] ss:$12 sps:$4 sm:$0xff]   ;;  %v4929_v54 = vld [vmem:[%s6803_s1 + $0x124] ss:$12 sps:$4 sm:$0xff]   ;;  %v4932_v56 = vld [vmem:[%s6803_s1 + $0x120] ss:$12 sps:$4 sm:$0xff]  }
  0x18   : > { %1526 = vmatprep.subr.bf16.mxu0 %v4894_v20  ;;  %4666 = vmatprep.subr.bf16.mxu1 %v4896_v21  ;;  %v4931_v55 = vld [vmem:[%s6803_s1 + $0x2a8] ss:$12 sps:$4 sm:$0xff]   ;;  %v4936_v59 = vld [vmem:[%s6803_s1 + $0x2c0] ss:$12 sps:$4 sm:$0xff]   ;;  %v4937_v60 = vld [vmem:[%s6803_s1 + $0x138] ss:$12 sps:$4 sm:$0xff]  }
  0x19   : > { %v4933_v57 = vld [vmem:[%s6803_s1 + $0x1e8] ss:$12 sps:$4 sm:$0xff]   ;;  %v4938_v61 = vld [vmem:[%s6803_s1 + $0x200] ss:$12 sps:$4 sm:$0xff]   ;;  %v4941_v63 = vld [vmem:[%s6803_s1 + $0x2d8] ss:$12 sps:$4 sm:$0xff]  }
  0x1a   : > { %v4934_v58 = vld [vmem:[%s6803_s1 + $0x13c] ss:$12 sps:$4 sm:$0xff]   ;;  %v4939_v62 = vld [vmem:[%s6803_s1 + $0x154] ss:$12 sps:$4 sm:$0xff]   ;;  %v223_v1 = vld [vmem:[%s5517_s26 + $0x58] sm:$0xf] }
  0x1b   : > { %1527 = vmatpush1.bf16.msra.mxu0 %v4897_v22  ;;  %4667 = vmatpush3.bf16.msra.mxu1 %v4898_v23  ;;  %v215_v0 = vld [vmem:[%s5517_s26 + $0x18] sm:$0xff]  ;;  %v4947_v7 = vld [vmem:[%s6803_s1 + $0x168] ss:$12 sps:$4 sm:$0xff]   ;;  %v4951_v9 = vld [vmem:[%s6803_s1 + $0x184] ss:$12 sps:$4 sm:$0xff]  }
  0x1c   : > { %1528 = vmatprep.subr.bf16.mxu0 %v4899_v24  ;;  %4668 = vmatprep.subr.bf16.mxu1 %v4901_v25  ;;  %v4942_v2 = vld [vmem:[%s6803_s1 + $0x150] ss:$12 sps:$4 sm:$0xff]   ;;  %v4943_v3 = vld [vmem:[%s6803_s1 + $0x218] ss:$12 sps:$4 sm:$0xff]   ;;  %v5634_v5 = vpack.c.bf16 %v223_v1, %v215_v0  ;;  %v4952_v12 = vld [vmem:[%s6803_s1 + $0x3c8] ss:$12 sps:$4 sm:$0xff]  }
  0x1d   : > { %v4944_v4 = vld [vmem:[%s6803_s1 + $0x16c] ss:$12 sps:$4 sm:$0xff]   ;;  %v4946_v6 = vld [vmem:[%s6803_s1 + $0x2f0] ss:$12 sps:$4 sm:$0xff]   ;;  %v4953_v15 = vld [vmem:[%s6803_s1 + $0x308] ss:$12 sps:$4 sm:$0xff]  }
  0x1e   : > { %v4948_v8 = vld [vmem:[%s6803_s1 + $0x230] ss:$12 sps:$4 sm:$0xff]   ;;  %v4949_v13 = vld [vmem:[%s6803_s1 + $0x180] ss:$12 sps:$4 sm:$0xff]   ;;  %v4954_v18 = vld [vmem:[%s6803_s1 + $0x198] ss:$12 sps:$4 sm:$0xff]  }
  0x1f   : > { %1529 = vmatpush1.bf16.msra.mxu0 %v4902_v26  ;;  %4669 = vmatpush3.bf16.msra.mxu1 %v4903_v27  ;;  %v214_v10 = vld [vmem:[%s5517_s26 + $0x10] sm:$0xff]  ;;  %v4956_v16 = vld [vmem:[%s6803_s1 + $0x19c] ss:$12 sps:$4 sm:$0xff]   ;;  %v4957_v17 = vld [vmem:[%s6803_s1 + $0x3e0] ss:$12 sps:$4 sm:$0xff]  }
  0x20   : > { %1530 = vmatprep.subr.bf16.mxu0 %v4904_v28  ;;  %4670 = vmatprep.subr.bf16.mxu1 %v4906_v29  ;;  %v222_v11 = vld [vmem:[%s5517_s26 + $0x50] sm:$0xf]  ;;  %v4958_v19 = vld [vmem:[%s6803_s1 + $0x320] ss:$12 sps:$4 sm:$0xff]   ;;  %v4962_v21 = vld [vmem:[%s6803_s1 + $0x3f8] ss:$12 sps:$4 sm:$0xff]  }
  0x21   : > { %v5657_v14 = vpack.c.bf16 %v222_v11, %v214_v10  ;;  %v4961_v20 = vld [vmem:[%s6803_s1 + $0x1b4] ss:$12 sps:$4 sm:$0xff]   ;;  %v4959_v22 = vld [vmem:[%s6803_s1 + $0x1b0] ss:$12 sps:$4 sm:$0xff]   ;;  %v4963_v23 = vld [vmem:[%s6803_s1 + $0x338] ss:$12 sps:$4 sm:$0xff]  }
  0x22   : > { %v4966_v24 = vld [vmem:[%s6803_s1 + $0x1cc] ss:$12 sps:$4 sm:$0xff]   ;;  %v4967_v25 = vld [vmem:[%s6803_s1 + $0x410] ss:$12 sps:$4 sm:$0xff]   ;;  %v4964_v26 = vld [vmem:[%s6803_s1 + $0x1c8] ss:$12 sps:$4 sm:$0xff]  }
  0x23   : > { %1531 = vmatpush1.bf16.msra.mxu0 %v4907_v30  ;;  %4671 = vmatpush3.bf16.msra.mxu1 %v4908_v33  ;;  %v4968_v27 = vld [vmem:[%s6803_s1 + $0x350] ss:$12 sps:$4 sm:$0xff]   ;;  %v4972_v29 = vld [vmem:[%s6803_s1 + $0x428] ss:$12 sps:$4 sm:$0xff]   ;;  %v4969_v30 = vld [vmem:[%s6803_s1 + $0x1e0] ss:$12 sps:$4 sm:$0xff]  }
  0x24   : > { %1532 = vmatprep.subr.bf16.mxu0 %v4909_v35  ;;  %4678 = vmatprep.subr.bf16.mxu1 %v4911_v38  ;;  %v4971_v28 = vld [vmem:[%s6803_s1 + $0x1e4] ss:$12 sps:$4 sm:$0xff]   ;;  %v4973_v31 = vld [vmem:[%s6803_s1 + $0x368] ss:$12 sps:$4 sm:$0xff]   ;;  %v4977_v33 = vld [vmem:[%s6803_s1 + $0x440] ss:$12 sps:$4 sm:$0xff]  }
  0x25   : > { %v4976_v32 = vld [vmem:[%s6803_s1 + $0x1fc] ss:$12 sps:$4 sm:$0xff]   ;;  %v4974_v37 = vld [vmem:[%s6803_s1 + $0x1f8] ss:$12 sps:$4 sm:$0xff]   ;;  %v4978_v38 = vld [vmem:[%s6803_s1 + $0x380] ss:$12 sps:$4 sm:$0xff]  }
  0x26   : > { %1721 = vmatmul.mubr.bf16.vlgmr.msra.gmra.mrb[0].mxu1 %v5548_v39  ;;  %v217_v35 = vld [vmem:[%s5517_s26 + $0x28] sm:$0xff]  ;;  %v5007_v1 = vld [vmem:[%s6803_s1 + $0x590] ss:$12 sps:$4 sm:$0xff]  }
  0x27   : > { %1533 = vmatpush1.bf16.msra.mxu0 %v4912_v40  ;;  %4679 = vmatpush3.bf16.msra.mxu1 %v4913_v41  ;;  %v225_v36 = vld [vmem:[%s5517_s26 + $0x68] sm:$0xf]  ;;  %v4981_v41 = vld [vmem:[%s6803_s1 + $0x214] ss:$12 sps:$4 sm:$0xff]   ;;  %v5006_v0 = vld [vmem:[%s6803_s1 + $0x28c] ss:$12 sps:$4 sm:$0xff]  }
  0x28   : > { %1534 = vmatprep.subr.bf16.mxu0 %v4914_v42  ;;  %4680 = vmatprep.subr.bf16.mxu1 %v4916_v43  ;;  %v5727_v40 = vpack.c.bf16 %v225_v36, %v217_v35  ;;  %v4982_v42 = vld [vmem:[%s6803_s1 + $0x458] ss:$12 sps:$4 sm:$0xff]   ;;  %v4979_v43 = vld [vmem:[%s6803_s1 + $0x210] ss:$12 sps:$4 sm:$0xff]   ;;  %v5013_v10 = vld [vmem:[%s6803_s1 + $0x4e8] ss:$12 sps:$4 sm:$0xff]  }
  0x29   : > { %1761 = vmatprep.mubr.bf16.mxu1 %v5634_v5  ;;  %v5035_v35 = vld [vmem:[%s6803_s1 + $0x318] ss:$12 sps:$4 sm:$0xff]  }
  0x2a   : > { %v5038_v36 = vld [vmem:[%s6804_s2 + $0x18] ss:$12 sps:$4 sm:$0xff]  }
  0x2b   : > { %1535 = vmatpush1.bf16.msra.mxu0 %v4917_v44  ;;  %4681 = vmatpush3.bf16.msra.mxu1 %v4918_v45  ;;  %v4983_v44 = vld [vmem:[%s6803_s1 + $0x398] ss:$12 sps:$4 sm:$0xff]  }
  0x2c   : > { %1536 = vmatprep.subr.bf16.mxu0 %v4919_v46  ;;  %4682 = vmatprep.subr.bf16.mxu1 %v4921_v47  ;;  %v4986_v45 = vld [vmem:[%s6803_s1 + $0x22c] ss:$12 sps:$4 sm:$0xff]   ;;  %v4984_v46 = vld [vmem:[%s6803_s1 + $0x228] ss:$12 sps:$4 sm:$0xff]   ;;  %v4987_v47 = vld [vmem:[%s6803_s1 + $0x470] ss:$12 sps:$4 sm:$0xff]  }
  0x2f   : > { %1537 = vmatpush1.bf16.msra.mxu0 %v4922_v48  ;;  %4683 = vmatpush3.bf16.msra.mxu1 %v4923_v49  ;;  %v4988_v48 = vld [vmem:[%s6803_s1 + $0x3b0] ss:$12 sps:$4 sm:$0xff]  }
  0x30   : > { %1538 = vmatprep.subr.bf16.mxu0 %v4924_v50  ;;  %4684 = vmatprep.subr.bf16.mxu1 %v4926_v51  ;;  %v4991_v49 = vld [vmem:[%s6803_s1 + $0x244] ss:$12 sps:$4 sm:$0xff]   ;;  %v224_v51 = vld [vmem:[%s5517_s26 + $0x60] sm:$0xf] }
  0x31   : > { %v216_v50 = vld [vmem:[%s5517_s26 + $0x20] sm:$0xff] }
  0x33   : > { %1539 = vmatpush1.bf16.msra.mxu0 %v4927_v52  ;;  %4685 = vmatpush3.bf16.msra.mxu1 %v4928_v53  ;;  %v4992_v52 = vld [vmem:[%s6803_s1 + $0x548] ss:$12 sps:$4 sm:$0xff]   ;;  %v4989_v53 = vld [vmem:[%s6803_s1 + $0x240] ss:$12 sps:$4 sm:$0xff]  }
  0x34   : > { %1540 = vmatprep.subr.bf16.mxu0 %v4929_v54  ;;  %4686 = vmatprep.subr.bf16.mxu1 %v4931_v55  ;;  %v5765_v54 = vpack.c.bf16 %v224_v51, %v216_v50  ;;  %v4993_v55 = vld [vmem:[%s6803_s1 + $0x488] ss:$12 sps:$4 sm:$0xff]   ;;  %v5056_v50 = vld [vmem:[%s6804_s2 + $0x60] ss:$12 sps:$4 sm:$0xff]  }
  0x35   : > { %v5061_v51 = vld [vmem:[%s6803_s1 + $0x37c] ss:$12 sps:$4 sm:$0xff]  }
  0x37   : > { %1541 = vmatpush1.bf16.msra.mxu0 %v4932_v56  ;;  %4687 = vmatpush3.bf16.msra.mxu1 %v4933_v57  ;;  %v4996_v56 = vld [vmem:[%s6803_s1 + $0x25c] ss:$12 sps:$4 sm:$0xff]   ;;  %v4997_v57 = vld [vmem:[%s6803_s1 + $0x560] ss:$12 sps:$4 sm:$0xff]  }
  0x38   : > { %1542 = vmatprep.subr.bf16.mxu0 %v4934_v58  ;;  %4688 = vmatprep.subr.bf16.mxu1 %v4936_v59  ;;  %v4994_v58 = vld [vmem:[%s6803_s1 + $0x258] ss:$12 sps:$4 sm:$0xff]   ;;  %v4998_v59 = vld [vmem:[%s6803_s1 + $0x4a0] ss:$12 sps:$4 sm:$0xff]  }
  0x3b   : > { %1543 = vmatpush1.bf16.msra.mxu0 %v4937_v60  ;;  %4689 = vmatpush3.bf16.msra.mxu1 %v4938_v61  ;;  %v5001_v60 = vld [vmem:[%s6803_s1 + $0x274] ss:$12 sps:$4 sm:$0xff]   ;;  %v5002_v61 = vld [vmem:[%s6803_s1 + $0x578] ss:$12 sps:$4 sm:$0xff]  }
  0x3c   : > { %1544 = vmatprep.subr.bf16.mxu0 %v4939_v62  ;;  %4690 = vmatprep.subr.bf16.mxu1 %v4941_v63  ;;  %v4999_v62 = vld [vmem:[%s6803_s1 + $0x270] ss:$12 sps:$4 sm:$0xff]   ;;  %v5003_v63 = vld [vmem:[%s6803_s1 + $0x4b8] ss:$12 sps:$4 sm:$0xff]  }
  0x3f   : > { %1545 = vmatpush1.bf16.msra.mxu0 %v4942_v2  ;;  %4691 = vmatpush3.bf16.msra.mxu1 %v4943_v3  ;;  %v5004_v2 = vld [vmem:[%s6803_s1 + $0x288] ss:$12 sps:$4 sm:$0xff]   ;;  %v5008_v3 = vld [vmem:[%s6803_s1 + $0x4d0] ss:$12 sps:$4 sm:$0xff]  }
  0x40   : > { %1546 = vmatprep.subr.bf16.mxu0 %v4944_v4  ;;  %4692 = vmatprep.subr.bf16.mxu1 %v4946_v6  ;;  %v5011_v4 = vld [vmem:[%s6803_s1 + $0x2a4] ss:$12 sps:$4 sm:$0xff]   ;;  %v5012_v6 = vld [vmem:[%s6803_s1 + $0x5a8] ss:$12 sps:$4 sm:$0xff]  }
  0x43   : > { %1547 = vmatpush1.bf16.msra.mxu0 %v4947_v7  ;;  %4693 = vmatpush3.bf16.msra.mxu1 %v4948_v8  ;;  %v219_v7 = vld [vmem:[%s5517_s26 + $0x38] sm:$0xff] }
  0x44   : > { %1559 = vmatprep.subr.bf16.mxu0 %v4951_v9  ;;  %4700 = vmatprep.subr.bf16.mxu1 %v4952_v12  ;;  %v227_v8 = vld [vmem:[%s5517_s26 + $0x78] sm:$0xf]  ;;  %v5009_v9 = vld [vmem:[%s6803_s1 + $0x2a0] ss:$12 sps:$4 sm:$0xff]   ;;  %v5016_v12 = vld [vmem:[%s6803_s1 + $0x2bc] ss:$12 sps:$4 sm:$0xff]  }
  0x45   : > { %v5821_v11 = vpack.c.bf16 %v227_v8, %v219_v7  ;;  %v5083_v7 = vld [vmem:[%s6803_s1 + $0x3d8] ss:$12 sps:$4 sm:$0xff]  }
  0x46   : > { %1549 = vmatmul.mubr.bf16.vlgmr.msra.gmra.mrb[0].mxu0 %v5548_v39  ;;  %1762 = vmatmul.mubr.bf16.vlgmr.msra.gmra.mrb[4].mxu1 %v5657_v14  ;;  %v5086_v8 = vld [vmem:[%s6804_s2 + $0xd8] ss:$12 sps:$4 sm:$0xff]  }
  0x47   : > { %1560 = vmatpush1.bf16.msra.mxu0 %v4949_v13  ;;  %4701 = vmatpush3.bf16.msra.mxu1 %v4953_v15  ;;  %v5017_v13 = vld [vmem:[%s6803_s1 + $0x5c0] ss:$12 sps:$4 sm:$0xff]   ;;  %v5014_v15 = vld [vmem:[%s6803_s1 + $0x2b8] ss:$12 sps:$4 sm:$0xff]  }
  0x48   : > { %1561 = vmatprep.subr.bf16.mxu0 %v4956_v16  ;;  %4702 = vmatprep.subr.bf16.mxu1 %v4957_v17  ;;  %v5018_v16 = vld [vmem:[%s6803_s1 + $0x500] ss:$12 sps:$4 sm:$0xff]  }
  0x49   : > { %1591 = vmatprep.mubr.bf16.mxu0 %v5634_v5  ;;  %1802 = vmatprep.mubr.bf16.mxu1 %v5727_v40  ;;  %v5021_v17 = vld [vmem:[%s6803_s1 + $0x2d4] ss:$12 sps:$4 sm:$0xff]  }
  0x4b   : > { %1562 = vmatpush1.bf16.msra.mxu0 %v4954_v18  ;;  %4703 = vmatpush3.bf16.msra.mxu1 %v4958_v19  ;;  %v5022_v18 = vld [vmem:[%s6803_s1 + $0x5d8] ss:$12 sps:$4 sm:$0xff]   ;;  %v5019_v19 = vld [vmem:[%s6803_s1 + $0x2d0] ss:$12 sps:$4 sm:$0xff]  }
  0x4c   : > { %1563 = vmatprep.subr.bf16.mxu0 %v4961_v20  ;;  %4704 = vmatprep.subr.bf16.mxu1 %v4962_v21  ;;  %v5023_v20 = vld [vmem:[%s6803_s1 + $0x518] ss:$12 sps:$4 sm:$0xff]  }
  0x4d   : > { %v5026_v21 = vld [vmem:[%s6803_s1 + $0x2ec] ss:$12 sps:$4 sm:$0xff]  }
  0x4f   : > { %1564 = vmatpush1.bf16.msra.mxu0 %v4959_v22  ;;  %4705 = vmatpush3.bf16.msra.mxu1 %v4963_v23  ;;  %v5024_v22 = vld [vmem:[%s6803_s1 + $0x2e8] ss:$12 sps:$4 sm:$0xff]   ;;  %v5027_v23 = vld [vmem:[%s6803_s1 + $0x5f0] ss:$12 sps:$4 sm:$0xff]  }
  0x50   : > { %1565 = vmatprep.subr.bf16.mxu0 %v4966_v24  ;;  %4706 = vmatprep.subr.bf16.mxu1 %v4967_v25  ;;  %v5028_v24 = vld [vmem:[%s6803_s1 + $0x530] ss:$12 sps:$4 sm:$0xff]  }
  0x51   : > { %v5031_v25 = vld [vmem:[%s6803_s1 + $0x304] ss:$12 sps:$4 sm:$0xff]  }
  0x53   : > { %1566 = vmatpush1.bf16.msra.mxu0 %v4964_v26  ;;  %4707 = vmatpush3.bf16.msra.mxu1 %v4968_v27  ;;  %v218_v26 = vld [vmem:[%s5517_s26 + $0x30] sm:$0xff] }
  0x54   : > { %1567 = vmatprep.subr.bf16.mxu0 %v4971_v28  ;;  %4708 = vmatprep.subr.bf16.mxu1 %v4972_v29  ;;  %v226_v27 = vld [vmem:[%s5517_s26 + $0x70] sm:$0xf]  ;;  %v5029_v29 = vld [vmem:[%s6803_s1 + $0x300] ss:$12 sps:$4 sm:$0xff]   ;;  %s4856_s26 = smul.u32 40, %s6808_s16 }
  0x55   : > { %v5034_v28 = vld [vmem:[%s6804_s2 + $0x4] ss:$12 sps:$4 sm:$0xff]  }
  0x56   : > { %s205_s7 = scalar_lea.vmem %s6805_s3, %s4856_s26  ;;  %s210_s10 = scalar_lea.vmem %s6806_s4, %s4856_s26 }
  0x57   : > { %1568 = vmatpush1.bf16.msra.mxu0 %v4969_v30  ;;  %4709 = vmatpush3.bf16.msra.mxu1 %v4973_v31  ;;  %v5871_v30 = vpack.c.bf16 %v226_v27, %v218_v26  ;;  %v5032_v31 = vld [vmem:[%s6804_s2] ss:$12 sps:$4 sm:$0xff]   ;;  %v5110_v26 = vld [vmem:[%s6804_s2 + $0x138] ss:$12 sps:$4 sm:$0xff]  }
  0x58   : > { %1569 = vmatprep.subr.bf16.mxu0 %v4976_v32  ;;  %4710 = vmatprep.subr.bf16.mxu1 %v4977_v33  ;;  %v5037_v32 = vld [vmem:[%s6803_s1 + $0x31c] ss:$12 sps:$4 sm:$0xff]   ;;  %v5115_v27 = vld [vmem:[%s6803_s1 + $0x454] ss:$12 sps:$4 sm:$0xff]  }
  0x59   : > { %v5040_v33 = vld [vmem:[%s6804_s2 + $0x1c] ss:$12 sps:$4 sm:$0xff]  }
  0x5b   : > { %1570 = vmatpush1.bf16.msra.mxu0 %v4974_v37  ;;  %4711 = vmatpush3.bf16.msra.mxu1 %v4978_v38  ;;  %v5043_v37 = vld [vmem:[%s6803_s1 + $0x334] ss:$12 sps:$4 sm:$0xff]  }
  0x5c   : > { %1571 = vmatprep.subr.bf16.mxu0 %v4981_v41  ;;  %4712 = vmatprep.subr.bf16.mxu1 %v4982_v42  ;;  %v5046_v38 = vld [vmem:[%s6804_s2 + $0x34] ss:$12 sps:$4 sm:$0xff]   ;;  %v5041_v41 = vld [vmem:[%s6803_s1 + $0x330] ss:$12 sps:$4 sm:$0xff]  }
  0x5d   : > { %v5044_v42 = vld [vmem:[%s6804_s2 + $0x30] ss:$12 sps:$4 sm:$0xff]  }
  0x5f   : > { %1572 = vmatpush1.bf16.msra.mxu0 %v4979_v43  ;;  %4713 = vmatpush3.bf16.msra.mxu1 %v4983_v44  ;;  %v5049_v43 = vld [vmem:[%s6803_s1 + $0x34c] ss:$12 sps:$4 sm:$0xff]  }
  0x60   : > { %1573 = vmatprep.subr.bf16.mxu0 %v4986_v45  ;;  %4714 = vmatprep.subr.bf16.mxu1 %v4987_v47  ;;  %v5052_v44 = vld [vmem:[%s6804_s2 + $0x4c] ss:$12 sps:$4 sm:$0xff]   ;;  %v5047_v45 = vld [vmem:[%s6803_s1 + $0x348] ss:$12 sps:$4 sm:$0xff]   ;;  %v5055_v47 = vld [vmem:[%s6803_s1 + $0x364] ss:$12 sps:$4 sm:$0xff]  }
  0x63   : > { %1574 = vmatpush1.bf16.msra.mxu0 %v4984_v46  ;;  %4715 = vmatpush3.bf16.msra.mxu1 %v4988_v48  ;;  %v5050_v46 = vld [vmem:[%s6804_s2 + $0x48] ss:$12 sps:$4 sm:$0xff]   ;;  %v5058_v48 = vld [vmem:[%s6804_s2 + $0x64] ss:$12 sps:$4 sm:$0xff]  }
  0x64   : > { %1575 = vmatprep.subr.bf16.mxu0 %v4991_v49  ;;  %4722 = vmatprep.subr.bf16.mxu1 %v4992_v52  ;;  %v5053_v49 = vld [vmem:[%s6803_s1 + $0x360] ss:$12 sps:$4 sm:$0xff]   ;;  %v5064_v52 = vld [vmem:[%s6804_s2 + $0x7c] ss:$12 sps:$4 sm:$0xff]  }
  0x66   : > { %1803 = vmatmul.mubr.bf16.vlgmr.msra.gmra.mrb[8].mxu1 %v5765_v54 }
  0x67   : > { %1576 = vmatpush1.bf16.msra.mxu0 %v4989_v53  ;;  %4723 = vmatpush3.bf16.msra.mxu1 %v4993_v55  ;;  %v5059_v53 = vld [vmem:[%s6803_s1 + $0x378] ss:$12 sps:$4 sm:$0xff]  }
  0x68   : > { %1577 = vmatprep.subr.bf16.mxu0 %v4996_v56  ;;  %4724 = vmatprep.subr.bf16.mxu1 %v4997_v57  ;;  %v5062_v55 = vld [vmem:[%s6804_s2 + $0x78] ss:$12 sps:$4 sm:$0xff]   ;;  %v5067_v56 = vld [vmem:[%s6803_s1 + $0x394] ss:$12 sps:$4 sm:$0xff]  }
  0x69   : > { %1843 = vmatprep.mubr.bf16.mxu1 %v5821_v11  ;;  %v5070_v57 = vld [vmem:[%s6804_s2 + $0x94] ss:$12 sps:$4 sm:$0xff]  }
  0x6b   : > { %1578 = vmatpush1.bf16.msra.mxu0 %v4994_v58  ;;  %4725 = vmatpush3.bf16.msra.mxu1 %v4998_v59  ;;  %v5065_v58 = vld [vmem:[%s6803_s1 + $0x390] ss:$12 sps:$4 sm:$0xff]  }
  0x6c   : > { %1579 = vmatprep.subr.bf16.mxu0 %v5001_v60  ;;  %4726 = vmatprep.subr.bf16.mxu1 %v5002_v61  ;;  %v5068_v59 = vld [vmem:[%s6804_s2 + $0x90] ss:$12 sps:$4 sm:$0xff]   ;;  %v5073_v60 = vld [vmem:[%s6803_s1 + $0x3ac] ss:$12 sps:$4 sm:$0xff]  }
  0x6d   : > { %v5076_v61 = vld [vmem:[%s6804_s2 + $0xac] ss:$12 sps:$4 sm:$0xff]  }
  0x6f   : > { %1580 = vmatpush1.bf16.msra.mxu0 %v4999_v62  ;;  %4727 = vmatpush3.bf16.msra.mxu1 %v5003_v63  ;;  %v5071_v62 = vld [vmem:[%s6803_s1 + $0x3a8] ss:$12 sps:$4 sm:$0xff]  }
  0x70   : > { %1581 = vmatprep.subr.bf16.mxu0 %v5006_v0  ;;  %4728 = vmatprep.subr.bf16.mxu1 %v5007_v1  ;;  %v5074_v63 = vld [vmem:[%s6804_s2 + $0xa8] ss:$12 sps:$4 sm:$0xff]   ;;  %v5079_v0 = vld [vmem:[%s6803_s1 + $0x3c4] ss:$12 sps:$4 sm:$0xff]  }
  0x71   : > { %v5082_v1 = vld [vmem:[%s6804_s2 + $0xc4] ss:$12 sps:$4 sm:$0xff]  }
  0x73   : > { %1582 = vmatpush1.bf16.msra.mxu0 %v5004_v2  ;;  %4729 = vmatpush3.bf16.msra.mxu1 %v5008_v3  ;;  %v5077_v2 = vld [vmem:[%s6803_s1 + $0x3c0] ss:$12 sps:$4 sm:$0xff]  }
  0x74   : > { %1583 = vmatprep.subr.bf16.mxu0 %v5011_v4  ;;  %4730 = vmatprep.subr.bf16.mxu1 %v5012_v6  ;;  %v5080_v3 = vld [vmem:[%s6804_s2 + $0xc0] ss:$12 sps:$4 sm:$0xff]   ;;  %v5085_v4 = vld [vmem:[%s6803_s1 + $0x3dc] ss:$12 sps:$4 sm:$0xff]  }
  0x75   : > { %v5088_v6 = vld [vmem:[%s6804_s2 + $0xdc] ss:$12 sps:$4 sm:$0xff]  }
  0x77   : > { %1584 = vmatpush1.bf16.msra.mxu0 %v5009_v9  ;;  %4731 = vmatpush3.bf16.msra.mxu1 %v5013_v10  ;;  %v5091_v9 = vld [vmem:[%s6803_s1 + $0x3f4] ss:$12 sps:$4 sm:$0xff]  }
  0x78   : > { %1585 = vmatprep.subr.bf16.mxu0 %v5016_v12  ;;  %4732 = vmatprep.subr.bf16.mxu1 %v5017_v13  ;;  %v5094_v10 = vld [vmem:[%s6804_s2 + $0xf4] ss:$12 sps:$4 sm:$0xff]   ;;  %v5089_v12 = vld [vmem:[%s6803_s1 + $0x3f0] ss:$12 sps:$4 sm:$0xff]  }
  0x79   : > { %v5092_v13 = vld [vmem:[%s6804_s2 + $0xf0] ss:$12 sps:$4 sm:$0xff]  }
  0x7b   : > { %1586 = vmatpush1.bf16.msra.mxu0 %v5014_v15  ;;  %4733 = vmatpush3.bf16.msra.mxu1 %v5018_v16  ;;  %v5097_v15 = vld [vmem:[%s6803_s1 + $0x40c] ss:$12 sps:$4 sm:$0xff]  }
  0x7c   : > { %1587 = vmatprep.subr.bf16.mxu0 %v5021_v17  ;;  %4734 = vmatprep.subr.bf16.mxu1 %v5022_v18  ;;  %v5100_v16 = vld [vmem:[%s6804_s2 + $0x10c] ss:$12 sps:$4 sm:$0xff]   ;;  %v5095_v17 = vld [vmem:[%s6803_s1 + $0x408] ss:$12 sps:$4 sm:$0xff]  }
  0x7d   : > { %v5098_v18 = vld [vmem:[%s6804_s2 + $0x108] ss:$12 sps:$4 sm:$0xff]  }
  0x7f   : > { %1588 = vmatpush1.bf16.msra.mxu0 %v5019_v19  ;;  %4735 = vmatpush3.bf16.msra.mxu1 %v5023_v20  ;;  %v5103_v19 = vld [vmem:[%s6803_s1 + $0x424] ss:$12 sps:$4 sm:$0xff]  }
  0x80   : > { %1589 = vmatprep.subr.bf16.mxu0 %v5026_v21  ;;  %4736 = vmatprep.subr.bf16.mxu1 %v5027_v23  ;;  %v5106_v20 = vld [vmem:[%s6804_s2 + $0x124] ss:$12 sps:$4 sm:$0xff]   ;;  %v5101_v21 = vld [vmem:[%s6803_s1 + $0x420] ss:$12 sps:$4 sm:$0xff]   ;;  %v5109_v23 = vld [vmem:[%s6803_s1 + $0x43c] ss:$12 sps:$4 sm:$0xff]  }
  0x83   : > { %1590 = vmatpush1.bf16.msra.mxu0 %v5024_v22  ;;  %4737 = vmatpush3.bf16.msra.mxu1 %v5028_v24  ;;  %v5104_v22 = vld [vmem:[%s6804_s2 + $0x120] ss:$12 sps:$4 sm:$0xff]   ;;  %v5112_v24 = vld [vmem:[%s6804_s2 + $0x13c] ss:$12 sps:$4 sm:$0xff]  }
  0x84   : > { %1602 = vmatprep.subr.bf16.mxu0 %v5031_v25  ;;  %3132 = vmatprep.subr.bf16.mxu1 %v5034_v28  ;;  %v5107_v25 = vld [vmem:[%s6803_s1 + $0x438] ss:$12 sps:$4 sm:$0xff]   ;;  %v5118_v28 = vld [vmem:[%s6804_s2 + $0x154] ss:$12 sps:$4 sm:$0xff]  }
  0x86   : > { %1592 = vmatmul.mubr.bf16.vlgmr.msra.gmra.mrb[0].mxu0 %v5657_v14  ;;  %1844 = vmatmul.mubr.bf16.vlgmr.msra.gmra.mrb[12].mxu1 %v5871_v30 }
  0x87   : > { %1603 = vmatpush1.bf16.msra.mxu0 %v5029_v29  ;;  %3133 = vmatpush1.bf16.msra.mxu1 %v5032_v31  ;;  %v5113_v29 = vld [vmem:[%s6803_s1 + $0x450] ss:$12 sps:$4 sm:$0xff]  }
  0x88   : > { %1604 = vmatprep.subr.bf16.mxu0 %v5037_v32  ;;  %3134 = vmatprep.subr.bf16.mxu1 %v5040_v33  ;;  %v5116_v31 = vld [vmem:[%s6804_s2 + $0x150] ss:$12 sps:$4 sm:$0xff]   ;;  %v5121_v32 = vld [vmem:[%s6803_s1 + $0x46c] ss:$12 sps:$4 sm:$0xff]  }
  0x89   : > { %1634 = vmatprep.mubr.bf16.mxu0 %v5727_v40  ;;  %3164 = vmatprep.mubr.bf16.mxu1 %v5536_v34  ;;  %v5124_v33 = vld [vmem:[%s6804_s2 + $0x16c] ss:$12 sps:$4 sm:$0xff]  }
  0x8b   : > { %1605 = vmatpush1.bf16.msra.mxu0 %v5035_v35  ;;  %3135 = vmatpush1.bf16.msra.mxu1 %v5038_v36  ;;  %v5119_v35 = vld [vmem:[%s6803_s1 + $0x468] ss:$12 sps:$4 sm:$0xff]  }
  0x8c   : > { %1606 = vmatprep.subr.bf16.mxu0 %v5043_v37  ;;  %3136 = vmatprep.subr.bf16.mxu1 %v5046_v38  ;;  %v5122_v36 = vld [vmem:[%s6804_s2 + $0x168] ss:$12 sps:$4 sm:$0xff]   ;;  %v5127_v37 = vld [vmem:[%s6803_s1 + $0x484] ss:$12 sps:$4 sm:$0xff]  }
  0x8d   : > { %v5130_v38 = vld [vmem:[%s6804_s2 + $0x184] ss:$12 sps:$4 sm:$0xff]  }
  0x8f   : > { %1607 = vmatpush1.bf16.msra.mxu0 %v5041_v41  ;;  %3137 = vmatpush1.bf16.msra.mxu1 %v5044_v42  ;;  %v5125_v41 = vld [vmem:[%s6803_s1 + $0x480] ss:$12 sps:$4 sm:$0xff]  }
  0x90   : > { %1608 = vmatprep.subr.bf16.mxu0 %v5049_v43  ;;  %3138 = vmatprep.subr.bf16.mxu1 %v5052_v44  ;;  %v5128_v42 = vld [vmem:[%s6804_s2 + $0x180] ss:$12 sps:$4 sm:$0xff]   ;;  %v5133_v43 = vld [vmem:[%s6803_s1 + $0x49c] ss:$12 sps:$4 sm:$0xff]  }
  0x91   : > { %v5136_v44 = vld [vmem:[%s6804_s2 + $0x19c] ss:$12 sps:$4 sm:$0xff]  }
  0x93   : > { %1609 = vmatpush1.bf16.msra.mxu0 %v5047_v45  ;;  %3139 = vmatpush1.bf16.msra.mxu1 %v5050_v46  ;;  %v5131_v45 = vld [vmem:[%s6803_s1 + $0x498] ss:$12 sps:$4 sm:$0xff]  }
  0x94   : > { %1610 = vmatprep.subr.bf16.mxu0 %v5055_v47  ;;  %3140 = vmatprep.subr.bf16.mxu1 %v5058_v48  ;;  %v5134_v46 = vld [vmem:[%s6804_s2 + $0x198] ss:$12 sps:$4 sm:$0xff]   ;;  %v5139_v47 = vld [vmem:[%s6803_s1 + $0x4b4] ss:$12 sps:$4 sm:$0xff]  }
  0x95   : > { %v5142_v48 = vld [vmem:[%s6804_s2 + $0x1b4] ss:$12 sps:$4 sm:$0xff]  }
  0x97   : > { %1611 = vmatpush1.bf16.msra.mxu0 %v5053_v49  ;;  %3141 = vmatpush1.bf16.msra.mxu1 %v5056_v50  ;;  %v5137_v49 = vld [vmem:[%s6803_s1 + $0x4b0] ss:$12 sps:$4 sm:$0xff]  }
  0x98   : > { %1612 = vmatprep.subr.bf16.mxu0 %v5061_v51  ;;  %3142 = vmatprep.subr.bf16.mxu1 %v5064_v52  ;;  %v5140_v50 = vld [vmem:[%s6804_s2 + $0x1b0] ss:$12 sps:$4 sm:$0xff]   ;;  %v5145_v51 = vld [vmem:[%s6803_s1 + $0x4cc] ss:$12 sps:$4 sm:$0xff]  }
  0x99   : > { %v5148_v52 = vld [vmem:[%s6804_s2 + $0x1cc] ss:$12 sps:$4 sm:$0xff]  }
  0x9b   : > { %1613 = vmatpush1.bf16.msra.mxu0 %v5059_v53  ;;  %3143 = vmatpush1.bf16.msra.mxu1 %v5062_v55  ;;  %v5143_v53 = vld [vmem:[%s6803_s1 + $0x4c8] ss:$12 sps:$4 sm:$0xff]  }
  0x9c   : > { %1614 = vmatprep.subr.bf16.mxu0 %v5067_v56  ;;  %3144 = vmatprep.subr.bf16.mxu1 %v5070_v57  ;;  %v5146_v55 = vld [vmem:[%s6804_s2 + $0x1c8] ss:$12 sps:$4 sm:$0xff]   ;;  %v5151_v56 = vld [vmem:[%s6803_s1 + $0x4e4] ss:$12 sps:$4 sm:$0xff]  }
  0x9d   : > { %v5154_v57 = vld [vmem:[%s6804_s2 + $0x1e4] ss:$12 sps:$4 sm:$0xff]  }
  0x9f   : > { %1615 = vmatpush1.bf16.msra.mxu0 %v5065_v58  ;;  %3145 = vmatpush1.bf16.msra.mxu1 %v5068_v59  ;;  %v5149_v58 = vld [vmem:[%s6803_s1 + $0x4e0] ss:$12 sps:$4 sm:$0xff]  }
  0xa0   : > { %1616 = vmatprep.subr.bf16.mxu0 %v5073_v60  ;;  %3146 = vmatprep.subr.bf16.mxu1 %v5076_v61  ;;  %v5152_v59 = vld [vmem:[%s6804_s2 + $0x1e0] ss:$12 sps:$4 sm:$0xff]   ;;  %v5157_v60 = vld [vmem:[%s6803_s1 + $0x4fc] ss:$12 sps:$4 sm:$0xff]  }
  0xa1   : > { %v5160_v61 = vld [vmem:[%s6804_s2 + $0x1fc] ss:$12 sps:$4 sm:$0xff]  }
  0xa3   : > { %1617 = vmatpush1.bf16.msra.mxu0 %v5071_v62  ;;  %3147 = vmatpush1.bf16.msra.mxu1 %v5074_v63  ;;  %v5155_v62 = vld [vmem:[%s6803_s1 + $0x4f8] ss:$12 sps:$4 sm:$0xff]  }
  0xa4   : > { %1618 = vmatprep.subr.bf16.mxu0 %v5079_v0  ;;  %3148 = vmatprep.subr.bf16.mxu1 %v5082_v1  ;;  %v5158_v63 = vld [vmem:[%s6804_s2 + $0x1f8] ss:$12 sps:$4 sm:$0xff]   ;;  %v5163_v0 = vld [vmem:[%s6803_s1 + $0x514] ss:$12 sps:$4 sm:$0xff]  }
  0xa5   : > { %v5166_v1 = vld [vmem:[%s6804_s2 + $0x214] ss:$12 sps:$4 sm:$0xff]  }
  0xa7   : > { %1619 = vmatpush1.bf16.msra.mxu0 %v5077_v2  ;;  %3149 = vmatpush1.bf16.msra.mxu1 %v5080_v3  ;;  %v5161_v2 = vld [vmem:[%s6803_s1 + $0x510] ss:$12 sps:$4 sm:$0xff]  }
  0xa8   : > { %1620 = vmatprep.subr.bf16.mxu0 %v5085_v4  ;;  %3150 = vmatprep.subr.bf16.mxu1 %v5088_v6  ;;  %v5164_v3 = vld [vmem:[%s6804_s2 + $0x210] ss:$12 sps:$4 sm:$0xff]   ;;  %v5169_v4 = vld [vmem:[%s6803_s1 + $0x52c] ss:$12 sps:$4 sm:$0xff]  }
  0xa9   : > { %v5172_v6 = vld [vmem:[%s6804_s2 + $0x22c] ss:$12 sps:$4 sm:$0xff]  }
  0xab   : > { %1621 = vmatpush1.bf16.msra.mxu0 %v5083_v7  ;;  %3151 = vmatpush1.bf16.msra.mxu1 %v5086_v8  ;;  %v5167_v7 = vld [vmem:[%s6803_s1 + $0x528] ss:$12 sps:$4 sm:$0xff]  }
  0xac   : > { %1622 = vmatprep.subr.bf16.mxu0 %v5091_v9  ;;  %3152 = vmatprep.subr.bf16.mxu1 %v5094_v10  ;;  %v5170_v8 = vld [vmem:[%s6804_s2 + $0x228] ss:$12 sps:$4 sm:$0xff]   ;;  %v5175_v9 = vld [vmem:[%s6803_s1 + $0x544] ss:$12 sps:$4 sm:$0xff]  }
  0xad   : > { %v5178_v10 = vld [vmem:[%s6804_s2 + $0x244] ss:$12 sps:$4 sm:$0xff]  }
  0xaf   : > { %1623 = vmatpush1.bf16.msra.mxu0 %v5089_v12  ;;  %3153 = vmatpush1.bf16.msra.mxu1 %v5092_v13  ;;  %v5173_v12 = vld [vmem:[%s6803_s1 + $0x540] ss:$12 sps:$4 sm:$0xff]  }
  0xb0   : > { %1624 = vmatprep.subr.bf16.mxu0 %v5097_v15  ;;  %3154 = vmatprep.subr.bf16.mxu1 %v5100_v16  ;;  %v5176_v13 = vld [vmem:[%s6804_s2 + $0x240] ss:$12 sps:$4 sm:$0xff]   ;;  %v5181_v15 = vld [vmem:[%s6803_s1 + $0x55c] ss:$12 sps:$4 sm:$0xff]  }
  0xb1   : > { %v5184_v16 = vld [vmem:[%s6804_s2 + $0x25c] ss:$12 sps:$4 sm:$0xff]  }
  0xb3   : > { %1625 = vmatpush1.bf16.msra.mxu0 %v5095_v17  ;;  %3155 = vmatpush1.bf16.msra.mxu1 %v5098_v18  ;;  %v5179_v17 = vld [vmem:[%s6803_s1 + $0x558] ss:$12 sps:$4 sm:$0xff]  }
  0xb4   : > { %1626 = vmatprep.subr.bf16.mxu0 %v5103_v19  ;;  %3156 = vmatprep.subr.bf16.mxu1 %v5106_v20  ;;  %v5182_v18 = vld [vmem:[%s6804_s2 + $0x258] ss:$12 sps:$4 sm:$0xff]   ;;  %v5187_v19 = vld [vmem:[%s6803_s1 + $0x574] ss:$12 sps:$4 sm:$0xff]  }
  0xb5   : > { %v5190_v20 = vld [vmem:[%s6804_s2 + $0x274] ss:$12 sps:$4 sm:$0xff]  }
  0xb7   : > { %1627 = vmatpush1.bf16.msra.mxu0 %v5101_v21  ;;  %3157 = vmatpush1.bf16.msra.mxu1 %v5104_v22  ;;  %v5185_v21 = vld [vmem:[%s6803_s1 + $0x570] ss:$12 sps:$4 sm:$0xff]  }
  0xb8   : > { %1628 = vmatprep.subr.bf16.mxu0 %v5109_v23  ;;  %3158 = vmatprep.subr.bf16.mxu1 %v5112_v24  ;;  %v5188_v22 = vld [vmem:[%s6804_s2 + $0x270] ss:$12 sps:$4 sm:$0xff]   ;;  %v5193_v23 = vld [vmem:[%s6803_s1 + $0x58c] ss:$12 sps:$4 sm:$0xff]  }
  0xb9   : > { %v5196_v24 = vld [vmem:[%s6804_s2 + $0x28c] ss:$12 sps:$4 sm:$0xff]  }
  0xbb   : > { %1629 = vmatpush1.bf16.msra.mxu0 %v5107_v25  ;;  %3159 = vmatpush1.bf16.msra.mxu1 %v5110_v26  ;;  %v5191_v25 = vld [vmem:[%s6803_s1 + $0x588] ss:$12 sps:$4 sm:$0xff]  }
  0xbc   : > { %1630 = vmatprep.subr.bf16.mxu0 %v5115_v27  ;;  %3160 = vmatprep.subr.bf16.mxu1 %v5118_v28  ;;  %v5194_v26 = vld [vmem:[%s6804_s2 + $0x288] ss:$12 sps:$4 sm:$0xff]   ;;  %v5199_v27 = vld [vmem:[%s6803_s1 + $0x5a4] ss:$12 sps:$4 sm:$0xff]  }
  0xbd   : > { %v5202_v28 = vld [vmem:[%s6804_s2 + $0x2a4] ss:$12 sps:$4 sm:$0xff]  }
  0xbf   : > { %1631 = vmatpush1.bf16.msra.mxu0 %v5113_v29  ;;  %3161 = vmatpush1.bf16.msra.mxu1 %v5116_v31  ;;  %v5197_v29 = vld [vmem:[%s6803_s1 + $0x5a0] ss:$12 sps:$4 sm:$0xff]  }
  0xc0   : > { %1632 = vmatprep.subr.bf16.mxu0 %v5121_v32  ;;  %3162 = vmatprep.subr.bf16.mxu1 %v5124_v33  ;;  %v5200_v31 = vld [vmem:[%s6804_s2 + $0x2a0] ss:$12 sps:$4 sm:$0xff]   ;;  %v5205_v32 = vld [vmem:[%s6803_s1 + $0x5bc] ss:$12 sps:$4 sm:$0xff]  }
  0xc1   : > { %v5208_v33 = vld [vmem:[%s6804_s2 + $0x2bc] ss:$12 sps:$4 sm:$0xff]  }
  0xc3   : > { %1633 = vmatpush1.bf16.msra.mxu0 %v5119_v35  ;;  %3163 = vmatpush1.bf16.msra.mxu1 %v5122_v36  ;;  %v5203_v35 = vld [vmem:[%s6803_s1 + $0x5b8] ss:$12 sps:$4 sm:$0xff]  }
  0xc4   : > { %1645 = vmatprep.subr.bf16.mxu0 %v5127_v37  ;;  %3175 = vmatprep.subr.bf16.mxu1 %v5130_v38  ;;  %v5206_v36 = vld [vmem:[%s6804_s2 + $0x2b8] ss:$12 sps:$4 sm:$0xff]   ;;  %v5211_v37 = vld [vmem:[%s6803_s1 + $0x5d4] ss:$12 sps:$4 sm:$0xff]  }
  0xc5   : > { %v5214_v38 = vld [vmem:[%s6804_s2 + $0x2d4] ss:$12 sps:$4 sm:$0xff]  }
  0xc6   : > { %1635 = vmatmul.mubr.bf16.vlgmr.msra.gmra.mrb[0].mxu0 %v5765_v54  ;;  %3165 = vmatmul.mubr.bf16.vlgmr.msra.gmra.mrb[16].mxu1 %v5548_v39 }
  0xc7   : > { %1646 = vmatpush1.bf16.msra.mxu0 %v5125_v41  ;;  %3176 = vmatpush1.bf16.msra.mxu1 %v5128_v42  ;;  %v5209_v42 = vld [vmem:[%s6803_s1 + $0x5d0] ss:$12 sps:$4 sm:$0xff]  }
  0xc8   : > { %1647 = vmatprep.subr.bf16.mxu0 %v5133_v43  ;;  %3177 = vmatprep.subr.bf16.mxu1 %v5136_v44  ;;  %v5212_v44 = vld [vmem:[%s6804_s2 + $0x2d0] ss:$12 sps:$4 sm:$0xff]  }
  0xc9   : > { %1677 = vmatprep.mubr.bf16.mxu0 %v5821_v11  ;;  %3207 = vmatprep.mubr.bf16.mxu1 %v5634_v5 }
  0xcb   : > { %1648 = vmatpush1.bf16.msra.mxu0 %v5131_v45  ;;  %3178 = vmatpush1.bf16.msra.mxu1 %v5134_v46  ;;  %v5217_v45 = vld [vmem:[%s6803_s1 + $0x5ec] ss:$12 sps:$4 sm:$0xff]  }
  0xcc   : > { %1649 = vmatprep.subr.bf16.mxu0 %v5139_v47  ;;  %3179 = vmatprep.subr.bf16.mxu1 %v5142_v48 }
  0xcf   : > { %1650 = vmatpush1.bf16.msra.mxu0 %v5137_v49  ;;  %3180 = vmatpush1.bf16.msra.mxu1 %v5140_v50  ;;  %v5220_v49 = vld [vmem:[%s6804_s2 + $0x2ec] ss:$12 sps:$4 sm:$0xff]  }
  0xd0   : > { %1651 = vmatprep.subr.bf16.mxu0 %v5145_v51  ;;  %3181 = vmatprep.subr.bf16.mxu1 %v5148_v52  ;;  %v5215_v51 = vld [vmem:[%s6803_s1 + $0x5e8] ss:$12 sps:$4 sm:$0xff]  }
  0xd1   : > { %v5218_v52 = vld [vmem:[%s6804_s2 + $0x2e8] ss:$12 sps:$4 sm:$0xff]  }
  0xd3   : > { %1652 = vmatpush1.bf16.msra.mxu0 %v5143_v53  ;;  %3182 = vmatpush1.bf16.msra.mxu1 %v5146_v55  ;;  %v5224_v53 = vld [vmem:[%s6804_s2 + $0xc8] ss:$12 sps:$4 sm:$0xff]   ;;  %v5223_v55 = vld [vmem:[%s6804_s2 + $0x304] ss:$12 sps:$4 sm:$0xff]  }
  0xd4   : > { %1653 = vmatprep.subr.bf16.mxu0 %v5151_v56  ;;  %3183 = vmatprep.subr.bf16.mxu1 %v5154_v57  ;;  %v5221_v56 = vld [vmem:[%s6804_s2 + $0x300] ss:$12 sps:$4 sm:$0xff]   ;;  %v5225_v57 = vld [vmem:[%s6804_s2 + $0x8] ss:$12 sps:$4 sm:$0xff]  }
  0xd7   : > { %1654 = vmatpush1.bf16.msra.mxu0 %v5149_v58  ;;  %3184 = vmatpush1.bf16.msra.mxu1 %v5152_v59  ;;  %v5229_v58 = vld [vmem:[%s6804_s2 + $0xe0] ss:$12 sps:$4 sm:$0xff]   ;;  %v5228_v59 = vld [vmem:[%s6804_s2 + $0x31c] ss:$12 sps:$4 sm:$0xff]  }
  0xd8   : > { %1655 = vmatprep.subr.bf16.mxu0 %v5157_v60  ;;  %3185 = vmatprep.subr.bf16.mxu1 %v5160_v61  ;;  %v5230_v60 = vld [vmem:[%s6804_s2 + $0x20] ss:$12 sps:$4 sm:$0xff]   ;;  %v5226_v61 = vld [vmem:[%s6804_s2 + $0x318] ss:$12 sps:$4 sm:$0xff]  }
  0xdb   : > { %1656 = vmatpush1.bf16.msra.mxu0 %v5155_v62  ;;  %3186 = vmatpush1.bf16.msra.mxu1 %v5158_v63  ;;  %v5234_v62 = vld [vmem:[%s6804_s2 + $0xf8] ss:$12 sps:$4 sm:$0xff]   ;;  %v5233_v63 = vld [vmem:[%s6804_s2 + $0x334] ss:$12 sps:$4 sm:$0xff]  }
  0xdc   : > { %1657 = vmatprep.subr.bf16.mxu0 %v5163_v0  ;;  %3187 = vmatprep.subr.bf16.mxu1 %v5166_v1  ;;  %v5231_v0 = vld [vmem:[%s6804_s2 + $0x330] ss:$12 sps:$4 sm:$0xff]   ;;  %v5235_v1 = vld [vmem:[%s6804_s2 + $0x38] ss:$12 sps:$4 sm:$0xff]  }
  0xdf   : > { %1658 = vmatpush1.bf16.msra.mxu0 %v5161_v2  ;;  %3188 = vmatpush1.bf16.msra.mxu1 %v5164_v3  ;;  %v5239_v2 = vld [vmem:[%s6804_s2 + $0x110] ss:$12 sps:$4 sm:$0xff]   ;;  %v5236_v3 = vld [vmem:[%s6804_s2 + $0x348] ss:$12 sps:$4 sm:$0xff]  }
  0xe0   : > { %1659 = vmatprep.subr.bf16.mxu0 %v5169_v4  ;;  %3189 = vmatprep.subr.bf16.mxu1 %v5172_v6  ;;  %v5240_v4 = vld [vmem:[%s6804_s2 + $0x50] ss:$12 sps:$4 sm:$0xff]   ;;  %v5244_v6 = vld [vmem:[%s6804_s2 + $0x128] ss:$12 sps:$4 sm:$0xff]  }
  0xe3   : > { %1660 = vmatpush1.bf16.msra.mxu0 %v5167_v7  ;;  %3190 = vmatpush1.bf16.msra.mxu1 %v5170_v8  ;;  %v5243_v7 = vld [vmem:[%s6804_s2 + $0x364] ss:$12 sps:$4 sm:$0xff]   ;;  %v5241_v8 = vld [vmem:[%s6804_s2 + $0x360] ss:$12 sps:$4 sm:$0xff]  }
  0xe4   : > { %1661 = vmatprep.subr.bf16.mxu0 %v5175_v9  ;;  %3191 = vmatprep.subr.bf16.mxu1 %v5178_v10  ;;  %v5245_v9 = vld [vmem:[%s6804_s2 + $0x68] ss:$12 sps:$4 sm:$0xff]   ;;  %v5249_v10 = vld [vmem:[%s6804_s2 + $0x140] ss:$12 sps:$4 sm:$0xff]  }
  0xe7   : > { %1662 = vmatpush1.bf16.msra.mxu0 %v5173_v12  ;;  %3192 = vmatpush1.bf16.msra.mxu1 %v5176_v13  ;;  %v5248_v12 = vld [vmem:[%s6804_s2 + $0x37c] ss:$12 sps:$4 sm:$0xff]   ;;  %v5246_v13 = vld [vmem:[%s6804_s2 + $0x378] ss:$12 sps:$4 sm:$0xff]  }
  0xe8   : > { %1663 = vmatprep.subr.bf16.mxu0 %v5181_v15  ;;  %3193 = vmatprep.subr.bf16.mxu1 %v5184_v16  ;;  %v5250_v15 = vld [vmem:[%s6804_s2 + $0x80] ss:$12 sps:$4 sm:$0xff]   ;;  %v5254_v16 = vld [vmem:[%s6804_s2 + $0x158] ss:$12 sps:$4 sm:$0xff]  }
  0xeb   : > { %1664 = vmatpush1.bf16.msra.mxu0 %v5179_v17  ;;  %3194 = vmatpush1.bf16.msra.mxu1 %v5182_v18  ;;  %v5253_v17 = vld [vmem:[%s6804_s2 + $0x394] ss:$12 sps:$4 sm:$0xff]  }
  0xec   : > { %1665 = vmatprep.subr.bf16.mxu0 %v5187_v19  ;;  %3195 = vmatprep.subr.bf16.mxu1 %v5190_v20  ;;  %v5255_v19 = vld [vmem:[%s6804_s2 + $0x98] ss:$12 sps:$4 sm:$0xff]  }
  0xef   : > { %1666 = vmatpush1.bf16.msra.mxu0 %v5185_v21  ;;  %3196 = vmatpush1.bf16.msra.mxu1 %v5188_v22 }
  0xf0   : > { %1667 = vmatprep.subr.bf16.mxu0 %v5193_v23  ;;  %3197 = vmatprep.subr.bf16.mxu1 %v5196_v24  ;;  %v5251_v23 = vld [vmem:[%s6804_s2 + $0x390] ss:$12 sps:$4 sm:$0xff]  }
  0xf1   : > { %v5259_v24 = vld [vmem:[%s6804_s2 + $0x170] ss:$12 sps:$4 sm:$0xff]  }
  0xf3   : > { %1668 = vmatpush1.bf16.msra.mxu0 %v5191_v25  ;;  %3198 = vmatpush1.bf16.msra.mxu1 %v5194_v26  ;;  %v5258_v26 = vld [vmem:[%s6804_s2 + $0x3ac] ss:$12 sps:$4 sm:$0xff]  }
  0xf4   : > { %1669 = vmatprep.subr.bf16.mxu0 %v5199_v27  ;;  %3199 = vmatprep.subr.bf16.mxu1 %v5202_v28 }
  0xf7   : > { %1670 = vmatpush1.bf16.msra.mxu0 %v5197_v29  ;;  %3200 = vmatpush1.bf16.msra.mxu1 %v5200_v31  ;;  %v5256_v29 = vld [vmem:[%s6804_s2 + $0x3a8] ss:$12 sps:$4 sm:$0xff]   ;;  %v5260_v31 = vld [vmem:[%s6804_s2 + $0xb0] ss:$12 sps:$4 sm:$0xff]  }
  0xf8   : > { %1671 = vmatprep.subr.bf16.mxu0 %v5205_v32  ;;  %3201 = vmatprep.subr.bf16.mxu1 %v5208_v33  ;;  %v5264_v33 = vld [vmem:[%s6804_s2 + $0x248] ss:$12 sps:$4 sm:$0xff]  }
  0xf9   : > { %v4672_v41 = vpop.f32.mrb[0].mxu1 }
  0xfa   : > { %v4673_v43 = vpop.f32.mrb[1].mxu1 }
  0xfb   : > { %1672 = vmatpush1.bf16.msra.mxu0 %v5203_v35  ;;  %v6247_v46 = vadd.f32 %v4673_v43, %v4672_v41  ;;  %v4675_v47 = vpop.f32.mrb[2].mxu1  ;;  %3202 = vmatpush1.bf16.msra.mxu1 %v5206_v36  ;;  %v5263_v35 = vld [vmem:[%s6804_s2 + $0x3c4] ss:$12 sps:$4 sm:$0xff]   ;;  %v5261_v36 = vld [vmem:[%s6804_s2 + $0x3c0] ss:$12 sps:$4 sm:$0xff]  }
  0xfc   : > { %1673 = vmatprep.subr.bf16.mxu0 %v5211_v37  ;;  %v4676_v48 = vpop.f32.mrb[3].mxu1  ;;  %3203 = vmatprep.subr.bf16.mxu1 %v5214_v38  ;;  %v5265_v37 = vld [vmem:[%s6804_s2 + $0x188] ss:$12 sps:$4 sm:$0xff]   ;;  %v5269_v38 = vld [vmem:[%s6804_s2 + $0x260] ss:$12 sps:$4 sm:$0xff]  }
  0xfd   : > { %v6252_v50 = vadd.f32 %v4676_v48, %v4675_v47  ;;  %v5268_v41 = vld [vmem:[%s6804_s2 + $0x3dc] ss:$12 sps:$4 sm:$0xff]   ;;  %v5270_v43 = vld [vmem:[%s6804_s2 + $0x1a0] ss:$12 sps:$4 sm:$0xff]  }
  0xfe   : > { %v5278_v47 = vld [vmem:[%s6804_s2 + $0x40c] ss:$12 sps:$4 sm:$0xff]   ;;  %v5280_v48 = vld [vmem:[%s6804_s2 + $0x1d0] ss:$12 sps:$4 sm:$0xff]  }
  0xff   : > { %1674 = vmatpush1.bf16.msra.mxu0 %v5209_v42  ;;  %3204 = vmatpush1.bf16.msra.mxu1 %v5212_v44  ;;  %v5266_v42 = vld [vmem:[%s6804_s2 + $0x3d8] ss:$12 sps:$4 sm:$0xff]  }
 0x100   : > { %1675 = vmatprep.subr.bf16.mxu0 %v5217_v45  ;;  %3205 = vmatprep.subr.bf16.mxu1 %v5220_v49  ;;  %v5274_v44 = vld [vmem:[%s6804_s2 + $0x278] ss:$12 sps:$4 sm:$0xff]   ;;  %v5271_v45 = vld [vmem:[%s6804_s2 + $0x3f0] ss:$12 sps:$4 sm:$0xff]   ;;  %v5276_v49 = vld [vmem:[%s6804_s2 + $0x408] ss:$12 sps:$4 sm:$0xff]  }
 0x103   : > { %1676 = vmatpush1.bf16.msra.mxu0 %v5215_v51  ;;  %3206 = vmatpush1.bf16.msra.mxu1 %v5218_v52  ;;  %v5283_v51 = vld [vmem:[%s6804_s2 + $0x424] ss:$12 sps:$4 sm:$0xff]   ;;  %v5285_v52 = vld [vmem:[%s6804_s2 + $0x1e8] ss:$12 sps:$4 sm:$0xff]  }
 0x104   : > { %4744 = vmatprep.subr.bf16.mxu0 %v5224_v53  ;;  %3218 = vmatprep.subr.bf16.mxu1 %v5223_v55  ;;  %v5281_v53 = vld [vmem:[%s6804_s2 + $0x420] ss:$12 sps:$4 sm:$0xff]  }
 0x105   : > { %v5289_v55 = vld [vmem:[%s6804_s2 + $0x2c0] ss:$12 sps:$4 sm:$0xff]  }
 0x106   : > { %1678 = vmatmul.mubr.bf16.vlgmr.msra.gmra.mrb[0].mxu0 %v5871_v30  ;;  %3208 = vmatmul.mubr.bf16.vlgmr.msra.gmra.mrb[16].mxu1 %v5657_v14 }
 0x107   : > { %4745 = vmatpush3.bf16.msra.mxu0 %v5225_v57  ;;  %3219 = vmatpush1.bf16.msra.mxu1 %v5221_v56  ;;  %v5288_v56 = vld [vmem:[%s6804_s2 + $0x43c] ss:$12 sps:$4 sm:$0xff]   ;;  %v5290_v57 = vld [vmem:[%s6804_s2 + $0x200] ss:$12 sps:$4 sm:$0xff]  }
 0x108   : > { %4746 = vmatprep.subr.bf16.mxu0 %v5229_v58  ;;  %3220 = vmatprep.subr.bf16.mxu1 %v5228_v59  ;;  %v5286_v58 = vld [vmem:[%s6804_s2 + $0x438] ss:$12 sps:$4 sm:$0xff]  }
 0x109   : > { %3336 = vmatprep.mubr.bf16.mxu0 %v5536_v34  ;;  %3250 = vmatprep.mubr.bf16.mxu1 %v5727_v40  ;;  %v5238_v34 = vld [vmem:[%s6804_s2 + $0x34c] ss:$12 sps:$4 sm:$0xff]  }
 0x10a   : > { %v5294_v59 = vld [vmem:[%s6804_s2 + $0x2d8] ss:$12 sps:$4 sm:$0xff]  }
 0x10b   : > { %4747 = vmatpush3.bf16.msra.mxu0 %v5230_v60  ;;  %3221 = vmatpush1.bf16.msra.mxu1 %v5226_v61  ;;  %v5293_v60 = vld [vmem:[%s6804_s2 + $0x454] ss:$12 sps:$4 sm:$0xff]  }
 0x10c   : > { %4748 = vmatprep.subr.bf16.mxu0 %v5234_v62  ;;  %3222 = vmatprep.subr.bf16.mxu1 %v5233_v63  ;;  %v5295_v63 = vld [vmem:[%s6804_s2 + $0x218] ss:$12 sps:$4 sm:$0xff]  }
 0x10f   : > { %4749 = vmatpush3.bf16.msra.mxu0 %v5235_v1  ;;  %3223 = vmatpush1.bf16.msra.mxu1 %v5231_v0 }
 0x110   : > { %4750 = vmatprep.subr.bf16.mxu0 %v5239_v2  ;;  %3224 = vmatprep.subr.bf16.mxu1 %v5238_v34  ;;  %v5291_v2 = vld [vmem:[%s6804_s2 + $0x450] ss:$12 sps:$4 sm:$0xff]  }
 0x111   : > { %v5299_v34 = vld [vmem:[%s6804_s2 + $0x2f0] ss:$12 sps:$4 sm:$0xff]  }
 0x113   : > { %4751 = vmatpush3.bf16.msra.mxu0 %v5240_v4  ;;  %3225 = vmatpush1.bf16.msra.mxu1 %v5236_v3  ;;  %v5298_v4 = vld [vmem:[%s6804_s2 + $0x46c] ss:$12 sps:$4 sm:$0xff]  }
 0x114   : > { %4752 = vmatprep.subr.bf16.mxu0 %v5244_v6  ;;  %3226 = vmatprep.subr.bf16.mxu1 %v5243_v7 }
 0x117   : > { %4753 = vmatpush3.bf16.msra.mxu0 %v5245_v9  ;;  %3227 = vmatpush1.bf16.msra.mxu1 %v5241_v8  ;;  %v5300_v8 = vld [vmem:[%s6804_s2 + $0x230] ss:$12 sps:$4 sm:$0xff]  }
 0x118   : > { %4754 = vmatprep.subr.bf16.mxu0 %v5249_v10  ;;  %3228 = vmatprep.subr.bf16.mxu1 %v5248_v12  ;;  %v5296_v10 = vld [vmem:[%s6804_s2 + $0x468] ss:$12 sps:$4 sm:$0xff]  }
 0x119   : > { %v4694_v18 = vpop.f32.mrb[4].mxu1  ;;  %v5304_v12 = vld [vmem:[%s6804_s2 + $0x3c8] ss:$12 sps:$4 sm:$0xff]  }
 0x11a   : > { %v4695_v20 = vpop.f32.mrb[5].mxu1 }
 0x11b   : > { %4755 = vmatpush3.bf16.msra.mxu0 %v5250_v15  ;;  %v4696_v21 = vadd.f32 %v4695_v20, %v4694_v18  ;;  %v4697_v22 = vpop.f32.mrb[6].mxu1  ;;  %3229 = vmatpush1.bf16.msra.mxu1 %v5246_v13  ;;  %v5303_v13 = vld [vmem:[%s6804_s2 + $0x484] ss:$12 sps:$4 sm:$0xff]   ;;  %v5305_v15 = vld [vmem:[%s6804_s2 + $0x308] ss:$12 sps:$4 sm:$0xff]  }
 0x11c   : > { %4756 = vmatprep.subr.bf16.mxu0 %v5254_v16  ;;  %v4698_v25 = vpop.f32.mrb[7].mxu1  ;;  %3230 = vmatprep.subr.bf16.mxu1 %v5253_v17  ;;  %v5301_v16 = vld [vmem:[%s6804_s2 + $0x480] ss:$12 sps:$4 sm:$0xff]   ;;  %v5308_v18 = vld [vmem:[%s6804_s2 + $0x49c] ss:$12 sps:$4 sm:$0xff]  }
 0x11d   : > { %v6355_v27 = vadd.f32 %v4696_v21, %v6247_v46  ;;  %v4699_v28 = vadd.f32 %v4698_v25, %v4697_v22  ;;  %v5279_v46 = vld [vmem:[%s6804_s2 + $0x290] ss:$12 sps:$4 sm:$0xff]   ;;  %v5309_v17 = vld [vmem:[%s6804_s2 + $0x3e0] ss:$12 sps:$4 sm:$0xff]   ;;  %v5306_v20 = vld [vmem:[%s6804_s2 + $0x498] ss:$12 sps:$4 sm:$0xff]  }
 0x11e   : > { %v5314_v21 = vld [vmem:[%s6804_s2 + $0x3f8] ss:$12 sps:$4 sm:$0xff]   ;;  %v5320_v25 = vld [vmem:[%s6804_s2 + $0x350] ss:$12 sps:$4 sm:$0xff]  }
 0x11f   : > { %4757 = vmatpush3.bf16.msra.mxu0 %v5255_v19  ;;  %v6364_v32 = vadd.f32 %v4699_v28, %v6252_v50  ;;  %3231 = vmatpush1.bf16.msra.mxu1 %v5251_v23  ;;  %v5284_v50 = vld [vmem:[%s6804_s2 + $0x2a8] ss:$12 sps:$4 sm:$0xff]   ;;  %v5310_v19 = vld [vmem:[%s6804_s2 + $0x320] ss:$12 sps:$4 sm:$0xff]   ;;  %v5315_v22 = vld [vmem:[%s6804_s2 + $0x338] ss:$12 sps:$4 sm:$0xff]  }
 0x120   : > { %4758 = vmatprep.subr.bf16.mxu0 %v5259_v24  ;;  %3232 = vmatprep.subr.bf16.mxu1 %v5258_v26  ;;  %v5311_v23 = vld [vmem:[%s6804_s2 + $0x4b0] ss:$12 sps:$4 sm:$0xff]   ;;  %v5316_v26 = vld [vmem:[%s6804_s2 + $0x4c8] ss:$12 sps:$4 sm:$0xff]  }
 0x121   : > { %v5319_v24 = vld [vmem:[%s6804_s2 + $0x410] ss:$12 sps:$4 sm:$0xff]  }
 0x122   : > { %v5323_v28 = vld [vmem:[%s6804_s2 + $0x4e4] ss:$12 sps:$4 sm:$0xff]  }
 0x123   : > { %4759 = vmatpush3.bf16.msra.mxu0 %v5260_v31  ;;  %3233 = vmatpush1.bf16.msra.mxu1 %v5256_v29  ;;  %v5325_v29 = vld [vmem:[%s6804_s2 + $0x368] ss:$12 sps:$4 sm:$0xff]   ;;  %v5321_v31 = vld [vmem:[%s6804_s2 + $0x4e0] ss:$12 sps:$4 sm:$0xff]  }
 0x124   : > { %4766 = vmatprep.subr.bf16.mxu0 %v5264_v33  ;;  %3234 = vmatprep.subr.bf16.mxu1 %v5263_v35  ;;  %v5328_v33 = vld [vmem:[%s6804_s2 + $0x4fc] ss:$12 sps:$4 sm:$0xff]   ;;  %v5330_v35 = vld [vmem:[%s6804_s2 + $0x380] ss:$12 sps:$4 sm:$0xff]  }
 0x126   : > { %3337 = vmatmul.mubr.bf16.vlgmr.msra.gmra.mrb[4].mxu0 %v5548_v39  ;;  %v5273_v39 = vld [vmem:[%s6804_s2 + $0x3f4] ss:$12 sps:$4 sm:$0xff]  }
 0x127   : > { %4767 = vmatpush3.bf16.msra.mxu0 %v5265_v37  ;;  %3377 = vmatprep.mubr.bf16.mxu0 %v5634_v5  ;;  %v5275_v5 = vld [vmem:[%s6804_s2 + $0x1b8] ss:$12 sps:$4 sm:$0xff]  }
 0x128   : > { %3235 = vmatpush1.bf16.msra.mxu1 %v5261_v36  ;;  %4768 = vmatprep.subr.bf16.mxu0 %v5269_v38  ;;  %v5326_v36 = vld [vmem:[%s6804_s2 + $0x4f8] ss:$12 sps:$4 sm:$0xff]   ;;  %v5333_v38 = vld [vmem:[%s6804_s2 + $0x514] ss:$12 sps:$4 sm:$0xff]  }
 0x129   : > { %3236 = vmatprep.subr.bf16.mxu1 %v5268_v41  ;;  %v5334_v37 = vld [vmem:[%s6804_s2 + $0x458] ss:$12 sps:$4 sm:$0xff]  }
 0x12b   : > { %4769 = vmatpush3.bf16.msra.mxu0 %v5270_v43  ;;  %v5335_v43 = vld [vmem:[%s6804_s2 + $0x398] ss:$12 sps:$4 sm:$0xff]  }
 0x12c   : > { %3237 = vmatpush1.bf16.msra.mxu1 %v5266_v42  ;;  %4770 = vmatprep.subr.bf16.mxu0 %v5274_v44 }
 0x12d   : > { %3238 = vmatprep.subr.bf16.mxu1 %v5273_v39 }
 0x12f   : > { %4771 = vmatpush3.bf16.msra.mxu0 %v5275_v5  ;;  %v5339_v5 = vld [vmem:[%s6804_s2 + $0x470] ss:$12 sps:$4 sm:$0xff]  }
 0x130   : > { %3239 = vmatpush1.bf16.msra.mxu1 %v5271_v45  ;;  %4772 = vmatprep.subr.bf16.mxu0 %v5279_v46  ;;  %v5331_v45 = vld [vmem:[%s6804_s2 + $0x510] ss:$12 sps:$4 sm:$0xff]  }
 0x131   : > { %3240 = vmatprep.subr.bf16.mxu1 %v5278_v47  ;;  %v5338_v47 = vld [vmem:[%s6804_s2 + $0x52c] ss:$12 sps:$4 sm:$0xff]  }
 0x133   : > { %4773 = vmatpush3.bf16.msra.mxu0 %v5280_v48 }
 0x134   : > { %3241 = vmatpush1.bf16.msra.mxu1 %v5276_v49  ;;  %4774 = vmatprep.subr.bf16.mxu0 %v5284_v50  ;;  %v5340_v50 = vld [vmem:[%s6804_s2 + $0x3b0] ss:$12 sps:$4 sm:$0xff]  }
 0x135   : > { %3242 = vmatprep.subr.bf16.mxu1 %v5283_v51 }
 0x137   : > { %4775 = vmatpush3.bf16.msra.mxu0 %v5285_v52  ;;  %v5336_v52 = vld [vmem:[%s6804_s2 + $0x528] ss:$12 sps:$4 sm:$0xff]  }
 0x138   : > { %3243 = vmatpush1.bf16.msra.mxu1 %v5281_v53  ;;  %4776 = vmatprep.subr.bf16.mxu0 %v5289_v55  ;;  %v5344_v53 = vld [vmem:[%s6804_s2 + $0x548] ss:$12 sps:$4 sm:$0xff]   ;;  %v5343_v55 = vld [vmem:[%s6804_s2 + $0x544] ss:$12 sps:$4 sm:$0xff]  }
 0x139   : > { %3244 = vmatprep.subr.bf16.mxu1 %v5288_v56  ;;  %v4716_v61 = vpop.f32.mrb[8].mxu1  ;;  %v5345_v56 = vld [vmem:[%s6804_s2 + $0x488] ss:$12 sps:$4 sm:$0xff]  }
 0x13a   : > { %v4717_v62 = vpop.f32.mrb[9].mxu1 }
 0x13b   : > { %4777 = vmatpush3.bf16.msra.mxu0 %v5290_v57  ;;  %v4718_v0 = vadd.f32 %v4717_v62, %v4716_v61  ;;  %v4719_v1 = vpop.f32.mrb[10].mxu1  ;;  %v5341_v57 = vld [vmem:[%s6804_s2 + $0x540] ss:$12 sps:$4 sm:$0xff]   ;;  %v5346_v61 = vld [vmem:[%s6804_s2 + $0x558] ss:$12 sps:$4 sm:$0xff]  }
 0x13c   : > { %3245 = vmatpush1.bf16.msra.mxu1 %v5286_v58  ;;  %4778 = vmatprep.subr.bf16.mxu0 %v5294_v59  ;;  %v4720_v3 = vpop.f32.mrb[11].mxu1  ;;  %v5349_v58 = vld [vmem:[%s6804_s2 + $0x560] ss:$12 sps:$4 sm:$0xff]   ;;  %v5348_v59 = vld [vmem:[%s6804_s2 + $0x55c] ss:$12 sps:$4 sm:$0xff]  }
 0x13d   : > { %3246 = vmatprep.subr.bf16.mxu1 %v5293_v60  ;;  %v6459_v6 = vadd.f32 %v4718_v0, %v6355_v27  ;;  %v4721_v7 = vadd.f32 %v4720_v3, %v4719_v1  ;;  %v5324_v27 = vld [vmem:[%s6804_s2 + $0x428] ss:$12 sps:$4 sm:$0xff]   ;;  %v5350_v60 = vld [vmem:[%s6804_s2 + $0x4a0] ss:$12 sps:$4 sm:$0xff]   ;;  %v5354_v62 = vld [vmem:[%s6804_s2 + $0x578] ss:$12 sps:$4 sm:$0xff]  }
 0x13e   : > { %v5359_v0 = vld [vmem:[%s6804_s2 + $0x590] ss:$12 sps:$4 sm:$0xff]   ;;  %v5358_v1 = vld [vmem:[%s6804_s2 + $0x58c] ss:$12 sps:$4 sm:$0xff]   ;;  %v5364_v3 = vld [vmem:[%s6804_s2 + $0x5a8] ss:$12 sps:$4 sm:$0xff]  }
 0x13f   : > { %4779 = vmatpush3.bf16.msra.mxu0 %v5295_v63  ;;  %v6465_v9 = vadd.f32 %v4721_v7, %v6364_v32  ;;  %v5329_v32 = vld [vmem:[%s6804_s2 + $0x440] ss:$12 sps:$4 sm:$0xff]   ;;  %v5351_v63 = vld [vmem:[%s6804_s2 + $0x570] ss:$12 sps:$4 sm:$0xff]  }
 0x140   : > { %3247 = vmatpush1.bf16.msra.mxu1 %v5291_v2  ;;  %4780 = vmatprep.subr.bf16.mxu0 %v5299_v34  ;;  %v5360_v2 = vld [vmem:[%s6804_s2 + $0x4d0] ss:$12 sps:$4 sm:$0xff]   ;;  %v5356_v34 = vld [vmem:[%s6804_s2 + $0x588] ss:$12 sps:$4 sm:$0xff]   ;;  %v5361_v7 = vld [vmem:[%s6804_s2 + $0x5a0] ss:$12 sps:$4 sm:$0xff]  }
 0x141   : > { %3248 = vmatprep.subr.bf16.mxu1 %v5298_v4  ;;  %v5363_v4 = vld [vmem:[%s6804_s2 + $0x5a4] ss:$12 sps:$4 sm:$0xff]  }
 0x143   : > { %4781 = vmatpush3.bf16.msra.mxu0 %v5300_v8  ;;  %v5369_v8 = vld [vmem:[%s6804_s2 + $0x5c0] ss:$12 sps:$4 sm:$0xff]  }
 0x144   : > { %3249 = vmatpush1.bf16.msra.mxu1 %v5296_v10  ;;  %4788 = vmatprep.subr.bf16.mxu0 %v5304_v12  ;;  %v5370_v10 = vld [vmem:[%s6804_s2 + $0x500] ss:$12 sps:$4 sm:$0xff]   ;;  %v5366_v12 = vld [vmem:[%s6804_s2 + $0x5b8] ss:$12 sps:$4 sm:$0xff]  }
 0x145   : > { %3261 = vmatprep.subr.bf16.mxu1 %v5303_v13  ;;  %v5374_v13 = vld [vmem:[%s6804_s2 + $0x5d8] ss:$12 sps:$4 sm:$0xff]  }
 0x146   : > { %3378 = vmatmul.mubr.bf16.vlgmr.msra.gmra.mrb[8].mxu0 %v5657_v14  ;;  %v5313_v14 = vld [vmem:[%s6804_s2 + $0x4b4] ss:$12 sps:$4 sm:$0xff]  }
 0x147   : > { %3251 = vmatmul.mubr.bf16.vlgmr.msra.gmra.mrb[16].mxu1 %v5765_v54  ;;  %4789 = vmatpush3.bf16.msra.mxu0 %v5305_v15  ;;  %v5373_v15 = vld [vmem:[%s6804_s2 + $0x5d4] ss:$12 sps:$4 sm:$0xff]  }
 0x148   : > { %3262 = vmatpush1.bf16.msra.mxu1 %v5301_v16  ;;  %4790 = vmatprep.subr.bf16.mxu0 %v5309_v17  ;;  %v5375_v16 = vld [vmem:[%s6804_s2 + $0x518] ss:$12 sps:$4 sm:$0xff]   ;;  %v5371_v17 = vld [vmem:[%s6804_s2 + $0x5d0] ss:$12 sps:$4 sm:$0xff]  }
 0x149   : > { %3263 = vmatprep.subr.bf16.mxu1 %v5308_v18  ;;  %3418 = vmatprep.mubr.bf16.mxu0 %v5727_v40  ;;  %v5318_v40 = vld [vmem:[%s6804_s2 + $0x4cc] ss:$12 sps:$4 sm:$0xff]   ;;  %v5379_v18 = vld [vmem:[%s6804_s2 + $0x5f0] ss:$12 sps:$4 sm:$0xff]  }
 0x14a   : > { %3293 = vmatprep.mubr.bf16.mxu1 %v5821_v11 }
 0x14b   : > { %4791 = vmatpush3.bf16.msra.mxu0 %v5310_v19  ;;  %v5378_v19 = vld [vmem:[%s6804_s2 + $0x5ec] ss:$12 sps:$4 sm:$0xff]  }
 0x14c   : > { %3264 = vmatpush1.bf16.msra.mxu1 %v5306_v20  ;;  %4792 = vmatprep.subr.bf16.mxu0 %v5314_v21  ;;  %v5380_v20 = vld [vmem:[%s6804_s2 + $0x530] ss:$12 sps:$4 sm:$0xff]   ;;  %v5376_v21 = vld [vmem:[%s6804_s2 + $0x5e8] ss:$12 sps:$4 sm:$0xff]  }
 0x14d   : > { %3265 = vmatprep.subr.bf16.mxu1 %v5313_v14  ;;  %v5389_v14 = vmov 1983009808  }
 0x14f   : > { %4793 = vmatpush3.bf16.msra.mxu0 %v5315_v22  ;;  %v3482_v22 = vunpack.c.l.s4 %v5389_v14 }
 0x150   : > { %3266 = vmatpush1.bf16.msra.mxu1 %v5311_v23  ;;  %4794 = vmatprep.subr.bf16.mxu0 %v5319_v24  ;;  %v3484_v23 = vlaneseq }
 0x151   : > { %3267 = vmatprep.subr.bf16.mxu1 %v5318_v40  ;;  %v3483_v24 = vunpack.c.0.s8 %v3482_v22 }
 0x152   : > { %v3485_v40 = vshrl.u32 %v3484_v23, 7 }
 0x153   : > { %4795 = vmatpush3.bf16.msra.mxu0 %v5320_v25 }
 0x154   : > { %3268 = vmatpush1.bf16.msra.mxu1 %v5316_v26  ;;  %4796 = vmatprep.subr.bf16.mxu0 %v5324_v27 }
 0x155   : > { %3269 = vmatprep.subr.bf16.mxu1 %v5323_v28  ;;  %v6677_v28 = vsub.s32 %v3483_v24, %v3485_v40 }
 0x157   : > { %4797 = vmatpush3.bf16.msra.mxu0 %v5325_v29 }
 0x158   : > { %3270 = vmatpush1.bf16.msra.mxu1 %v5321_v31  ;;  %4798 = vmatprep.subr.bf16.mxu0 %v5329_v32 }
 0x159   : > { %3271 = vmatprep.subr.bf16.mxu1 %v5328_v33  ;;  %v4738_v41 = vpop.f32.mrb[12].mxu1 }
 0x15a   : > { %v4739_v42 = vpop.f32.mrb[13].mxu1 }
 0x15b   : > { %4799 = vmatpush3.bf16.msra.mxu0 %v5330_v35  ;;  %v4740_v44 = vadd.f32 %v4739_v42, %v4738_v41  ;;  %v4741_v39 = vpop.f32.mrb[14].mxu1 }
 0x15c   : > { %3272 = vmatpush1.bf16.msra.mxu1 %v5326_v36  ;;  %4800 = vmatprep.subr.bf16.mxu0 %v5334_v37  ;;  %v4742_v46 = vpop.f32.mrb[15].mxu1 }
 0x15d   : > { %3273 = vmatprep.subr.bf16.mxu1 %v5333_v38  ;;  %v6565_v48 = vadd.f32 %v4740_v44, %v6459_v6  ;;  %v4743_v49 = vadd.f32 %v4742_v46, %v4741_v39  ;;  %v5365_v6 = vld [vmem:[%s6804_s2 + $0x4e8] ss:$12 sps:$4 sm:$0xff]   ;;  %v5391_v38 = vmov 0  }
 0x15f   : > { %4801 = vmatpush3.bf16.msra.mxu0 %v5335_v43  ;;  %v6571_v51 = vadd.f32 %v4743_v49, %v6465_v9  ;;  %v5368_v9 = vld [vmem:[%s6804_s2 + $0x5bc] ss:$12 sps:$4 sm:$0xff]  }
 0x160   : > { %3274 = vmatpush1.bf16.msra.mxu1 %v5331_v45  ;;  %4802 = vmatprep.subr.bf16.mxu0 %v5339_v5 }
 0x161   : > { %3275 = vmatprep.subr.bf16.mxu1 %v5338_v47 }
 0x163   : > { %4803 = vmatpush3.bf16.msra.mxu0 %v5340_v50 }
 0x164   : > { %3276 = vmatpush1.bf16.msra.mxu1 %v5336_v52  ;;  %4810 = vmatprep.subr.bf16.mxu0 %v5344_v53 }
 0x165   : > { %3277 = vmatprep.subr.bf16.mxu1 %v5343_v55 }
 0x166   : > { %3419 = vmatmul.mubr.bf16.vlgmr.msra.gmra.mrb[12].mxu0 %v5765_v54  ;;  %v5353_v54 = vld [vmem:[%s6804_s2 + $0x574] ss:$12 sps:$4 sm:$0xff]  }
 0x167   : > { %4811 = vmatpush3.bf16.msra.mxu0 %v5345_v56  ;;  %3459 = vmatprep.mubr.bf16.mxu0 %v5821_v11  ;;  %v5355_v11 = vld [vmem:[%s6804_s2 + $0x4b8] ss:$12 sps:$4 sm:$0xff]  }
 0x168   : > { %3278 = vmatpush1.bf16.msra.mxu1 %v5341_v57  ;;  %4812 = vmatprep.subr.bf16.mxu0 %v5349_v58 }
 0x169   : > { %3279 = vmatprep.subr.bf16.mxu1 %v5348_v59 }
 0x16b   : > { %4813 = vmatpush3.bf16.msra.mxu0 %v5350_v60 }
 0x16c   : > { %3280 = vmatpush1.bf16.msra.mxu1 %v5346_v61  ;;  %4814 = vmatprep.subr.bf16.mxu0 %v5354_v62 }
 0x16d   : > { %3281 = vmatprep.subr.bf16.mxu1 %v5353_v54 }
 0x16f   : > { %4815 = vmatpush3.bf16.msra.mxu0 %v5355_v11 }
 0x170   : > { %3282 = vmatpush1.bf16.msra.mxu1 %v5351_v63  ;;  %4816 = vmatprep.subr.bf16.mxu0 %v5359_v0  ;;  %v5392_v0 = vmov 1934713408  }
 0x171   : > { %3283 = vmatprep.subr.bf16.mxu1 %v5358_v1  ;;  %v3506_v1 = vunpack.c.l.s4 %v5392_v0 }
 0x173   : > { %4817 = vmatpush3.bf16.msra.mxu0 %v5360_v2  ;;  %v3507_v2 = vunpack.c.0.s8 %v3506_v1 }
 0x174   : > { %3284 = vmatpush1.bf16.msra.mxu1 %v5356_v34  ;;  %4818 = vmatprep.subr.bf16.mxu0 %v5364_v3 }
 0x175   : > { %3285 = vmatprep.subr.bf16.mxu1 %v5363_v4  ;;  %v6690_v34 = vsub.s32 %v3507_v2, %v3485_v40 }
 0x177   : > { %4819 = vmatpush3.bf16.msra.mxu0 %v5365_v6 }
 0x178   : > { %3286 = vmatpush1.bf16.msra.mxu1 %v5361_v7  ;;  %4820 = vmatprep.subr.bf16.mxu0 %v5369_v8 }
 0x179   : > { %3287 = vmatprep.subr.bf16.mxu1 %v5368_v9 }
 0x17b   : > { %4821 = vmatpush3.bf16.msra.mxu0 %v5370_v10 }
 0x17c   : > { %3288 = vmatpush1.bf16.msra.mxu1 %v5366_v12  ;;  %4822 = vmatprep.subr.bf16.mxu0 %v5374_v13 }
 0x17d   : > { %3289 = vmatprep.subr.bf16.mxu1 %v5373_v15 }
 0x17f   : > { %4823 = vmatpush3.bf16.msra.mxu0 %v5375_v16 }
 0x180   : > { %3290 = vmatpush1.bf16.msra.mxu1 %v5371_v17  ;;  %4824 = vmatprep.subr.bf16.mxu0 %v5379_v18 }
 0x181   : > { %3291 = vmatprep.subr.bf16.mxu1 %v5378_v19 }
 0x183   : > { %4825 = vmatpush3.bf16.msra.mxu0 %v5380_v20 }
 0x184   : > { %3292 = vmatpush1.bf16.msra.mxu1 %v5376_v21 }
 0x186   : > { %3460 = vmatmul.mubr.bf16.vlgmr.msra.gmra.mrb[16].mxu0 %v5871_v30 }
 0x187   : > { %3294 = vmatmul.mubr.bf16.vlgmr.msra.gmra.mrb[16].mxu1 %v5871_v30 }
 0x1d9   : > { %v1679_v25 = vpop.f32.mrb[0].mxu0 }
 0x1da   : > { %v4627_v26 = vpack.c.bf16 %v6565_v48, %v1679_v25  ;;  %v1681_v27 = vpop.f32.mrb[1].mxu0 }
 0x1db   : > { %v1683_v29 = vpop.f32.mrb[2].mxu0 }
 0x1dc   : > { %v4628_v31 = vpack.c.bf16 %v6571_v51, %v1683_v29  ;;  %v1685_v32 = vpop.f32.mrb[3].mxu0  ;;  %v3468_v33 = vpack.c.bf16 %v1683_v29, %v1679_v25  ;;  %v3487_v30 = vrot.slane %v4627_v26, %v6677_v28 }
 0x1dd   : > { %v3469_v35 = vpack.c.bf16 %v1685_v32, %v1681_v27 }
 0x1de   : > { %v3494_v36 = vrot.slane %v4628_v31, %v6677_v28  ;;  %3472 = vrot.lane.b32.xlu0 %v3468_v33, %s5390_s30 }
 0x1df   : > { %v3501_v37 = vrot.slane %v3469_v35, %v6677_v28  ;;  %v3502_v41 = vcombine.high %v3469_v35, %v5391_v38 }
 0x1e1   : > { %v3503_v42 = vcombine.low %v3487_v30, %v3501_v37  ;;  %v3504_v43 = vcombine.high %v3487_v30, %v3501_v37  ;;  %v3519_v44 = vcombine.low %v3494_v36, %v3502_v41 }
 0x1e2   : > { %3476 = vrot.lane.b32.xlu0 %v3469_v35, %s5390_s30 }
 0x1e3   : > { %v3511_v4 = vrot.slane %v3503_v42, %v6690_v34  ;;  %v3518_v6 = vrot.slane %v3504_v43, %v6690_v34  ;;  %v3526_v7 = vrot.slane %v3519_v44, %v6690_v34 }
 0x1e5   : > { %v3527_v10 = vcombine.high %v3511_v4, %v5391_v38  ;;  %v3528_v15 = vcombine.high %v3518_v6, %v5391_v38  ;;  %v3529_v16 = vcombine.high %v3526_v7, %v5391_v38  ;;  %v3577_v20 = vshrl.u32 %v3511_v4, 16 }
 0x1e6   : > { %v3593_v21 = vshrl.u32 %v3518_v6, 16  ;;  %v3608_v14 = vshrl.u32 %v3526_v7, 16 }
 0x1e7   : > { %v3585_v40 = vshrl.u32 %v3527_v10, 16  ;;  %v3601_v26 = vshrl.u32 %v3528_v15, 16  ;;  %v3614_v31 = vshrl.u32 %v3529_v16, 16 }
 0x1f9   : > { %v4760_v39 = vpop.f32.mrb[4].mxu0 }
 0x1fa   : > { %v4761_v45 = vpop.f32.mrb[5].mxu0 }
 0x1fb   : > { %v4762_v5 = vadd.f32 %v4761_v45, %v4760_v39  ;;  %v4763_v46 = vpop.f32.mrb[6].mxu0 }
 0x1fc   : > { %v4764_v47 = vpop.f32.mrb[7].mxu0 }
 0x1fd   : > { %v4765_v48 = vadd.f32 %v4764_v47, %v4763_v46 }
 0x219   : > { %v4782_v49 = vpop.f32.mrb[8].mxu0 }
 0x21a   : > { %v4783_v50 = vpop.f32.mrb[9].mxu0 }
 0x21b   : > { %v4784_v51 = vadd.f32 %v4783_v50, %v4782_v49  ;;  %v4785_v52 = vpop.f32.mrb[10].mxu0 }
 0x21c   : > { %v4786_v53 = vpop.f32.mrb[11].mxu0 }
 0x21d   : > { %v3380_v55 = vadd.f32 %v4784_v51, %v4762_v5  ;;  %v4787_v56 = vadd.f32 %v4786_v53, %v4785_v52 }
 0x21f   : > { %v3383_v57 = vadd.f32 %v4787_v56, %v4765_v48 }
 0x239   : > { %v4804_v58 = vpop.f32.mrb[12].mxu0 }
 0x23a   : > { %v4805_v59 = vpop.f32.mrb[13].mxu0 }
 0x23b   : > { %v4806_v60 = vadd.f32 %v4805_v59, %v4804_v58  ;;  %v4807_v61 = vpop.f32.mrb[14].mxu0 }
 0x23c   : > { %v4808_v62 = vpop.f32.mrb[15].mxu0 }
 0x23d   : > { %v6686_v54 = vadd.f32 %v4806_v60, %v3380_v55  ;;  %v4809_v11 = vadd.f32 %v4808_v62, %v4807_v61 }
 0x23f   : > { %v6688_v63 = vadd.f32 %v4809_v11, %v3383_v57 }
 0x250   : > { %v3473_v3 = vpop.permute.xlu0 %3472 }
 0x251   : > { %v3536_v9 = vrot.slane %v3473_v3, %v6677_v28 }
 0x254   : > { %v3477_v8 = vpop.permute.xlu0 %3476 }
 0x255   : > { %v3544_v12 = vrot.slane %v3477_v8, %v6677_v28  ;;  %v4629_v13 = vcombine.high %v3473_v3, %v3477_v8 }
 0x257   : > { %v3546_v17 = vcombine.low %v3536_v9, %v3544_v12  ;;  %v3547_v18 = vcombine.high %v3536_v9, %v3544_v12  ;;  %v3569_v19 = vrot.slane %v4629_v13, %v6690_v34 }
 0x259   : > { %v3554_v22 = vrot.slane %v3546_v17, %v6690_v34  ;;  %v3561_v23 = vrot.slane %v3547_v18, %v6690_v34  ;;  %v3572_v24 = vcombine.high %v3569_v19, %v5391_v38  ;;  %v4826_v25 = vpop.f32.mrb[16].mxu0  ;;  %v3607_v27 = vpack.i.b16 %v3569_v19, %v3526_v7 }
 0x25a   : > { %v3609_v29 = vshrl.u32 %v3569_v19, 16  ;;  %v6704_v32 = vpop.f32.mrb[16].mxu1  ;;  %v4827_v33 = vpop.f32.mrb[17].mxu0 }
 0x25b   : > { %v3570_v35 = vcombine.high %v3554_v22, %v5391_v38  ;;  %v3571_v36 = vcombine.high %v3561_v23, %v5391_v38  ;;  %v3575_v30 = vpack.i.b16 %v3554_v22, %v3511_v4  ;;  %v3578_v37 = vshrl.u32 %v3554_v22, 16  ;;  %v3297_v41 = vpop.f32.mrb[17].mxu1  ;;  %v4829_v42 = vpop.f32.mrb[18].mxu0 }
 0x25c   : > { %v3591_v43 = vpack.i.b16 %v3561_v23, %v3518_v6  ;;  %v3594_v44 = vshrl.u32 %v3561_v23, 16  ;;  %v3610_v39 = vpack.i.b16 %v3609_v29, %v3608_v14  ;;  %v3613_v45 = vpack.i.b16 %v3572_v24, %v3529_v16  ;;  %v6708_v5 = vpop.f32.mrb[18].mxu1  ;;  %v4830_v46 = vpop.f32.mrb[19].mxu0 }
 0x25d   : > { %v3579_v47 = vpack.i.b16 %v3578_v37, %v3577_v20  ;;  %v3583_v48 = vpack.i.b16 %v3570_v35, %v3527_v10  ;;  %v3586_v49 = vshrl.u32 %v3570_v35, 16  ;;  %v3599_v50 = vpack.i.b16 %v3571_v36, %v3528_v15  ;;  %v3301_v51 = vpop.f32.mrb[19].mxu1 }
 0x25e   : > { %v3595_v52 = vpack.i.b16 %v3594_v44, %v3593_v21  ;;  %v3602_v53 = vshrl.u32 %v3571_v36, 16  ;;  %v3615_v55 = vshrl.u32 %v3572_v24, 16  ;;  %v3617_v56 = vcombine.low %v3575_v30, %v3591_v43 }
 0x25f   : > { %v3587_v57 = vpack.i.b16 %v3586_v49, %v3585_v40  ;;  %v3625_v58 = vcombine.low %v3583_v48, %v3599_v50  ;;  %v3640_v59 = vrot.slane %v3607_v27, %v6677_v28  ;;  %v3648_v60 = vrot.slane %v3613_v45, %v6677_v28 }
 0x260   : > { %v3603_v61 = vpack.i.b16 %v3602_v53, %v3601_v26  ;;  %v3616_v62 = vpack.i.b16 %v3615_v55, %v3614_v31  ;;  %v3624_v11 = vrot.slane %v3617_v56, %v6677_v28  ;;  %v3684_v0 = vcombine.low %v3579_v47, %v3595_v52 }
 0x261   : > { %v3632_v1 = vrot.slane %v3625_v58, %v6677_v28  ;;  %v3665_v2 = vcombine.low %v3640_v59, %v3648_v60  ;;  %v3666_v3 = vcombine.high %v3640_v59, %v3648_v60  ;;  %v3707_v4 = vrot.slane %v3610_v39, %v6677_v28 }
 0x262   : > { %v3691_v6 = vrot.slane %v3684_v0, %v6677_v28  ;;  %v3692_v7 = vcombine.low %v3587_v57, %v3603_v61  ;;  %v3715_v8 = vrot.slane %v3616_v62, %v6677_v28  ;;  %v4828_v9 = vadd.f32 %v4827_v33, %v4826_v25 }
 0x263   : > { %v3649_v10 = vcombine.low %v3624_v11, %v3632_v1  ;;  %v3650_v12 = vcombine.high %v3624_v11, %v3632_v1  ;;  %v3673_v13 = vrot.slane %v3665_v2, %v6690_v34  ;;  %v3680_v15 = vrot.slane %v3666_v3, %v6690_v34 }
 0x264   : > { %v3699_v16 = vrot.slane %v3692_v7, %v6677_v28  ;;  %v3732_v17 = vcombine.low %v3707_v4, %v3715_v8  ;;  %v3733_v18 = vcombine.high %v3707_v4, %v3715_v8  ;;  %v3462_v19 = vadd.f32 %v4828_v9, %v6686_v54 }
 0x265   : > { %v3657_v20 = vrot.slane %v3649_v10, %v6690_v34  ;;  %v3664_v21 = vrot.slane %v3650_v12, %v6690_v34  ;;  %v3809_v14 = vpack.c.bf16 %v3301_v51, %v3297_v41  ;;  %v4831_v22 = vadd.f32 %v4830_v46, %v4829_v42 }
 0x266   : > { %v3716_v23 = vcombine.low %v3691_v6, %v3699_v16  ;;  %v3717_v24 = vcombine.high %v3691_v6, %v3699_v16  ;;  %v4640_v27 = vpack.c.bf16 %v3462_v19, %v6704_v32  ;;  %v3740_v54 = vrot.slane %v3732_v17, %v6690_v34 }
 0x267   : > { %v3681_v40 = vcombine.low %v3657_v20, %v3673_v13  ;;  %v3682_v25 = vcombine.high %v3657_v20, %v3673_v13  ;;  %v3683_v26 = vcombine.low %v3664_v21, %v3680_v15  ;;  %v3747_v33 = vrot.slane %v3733_v18, %v6690_v34 }
 0x268   : > { %v3724_v29 = vrot.slane %v3716_v23, %v6690_v34  ;;  %v3731_v31 = vrot.slane %v3717_v24, %v6690_v34  ;;  %v3827_v36 = vrot.slane %v4640_v27, %v6677_v28  ;;  %v3841_v30 = vrot.slane %v3809_v14, %v6677_v28 }
 0x269   : > { %v3754_v35 = vshrl.u32 %v3681_v40, 16  ;;  %v3465_v37 = vadd.f32 %v4831_v22, %v6688_v63  ;;  %v3808_v44 = vpack.c.bf16 %v6708_v5, %v6704_v32  ;;  %v3760_v39 = vshrl.u32 %v3682_v25, 16 }
 0x26a   : > { %v3748_v41 = vcombine.low %v3724_v29, %v3740_v54  ;;  %v3749_v42 = vcombine.high %v3724_v29, %v3740_v54  ;;  %v3750_v43 = vcombine.low %v3731_v31, %v3747_v33  ;;  %v3843_v45 = vcombine.low %v3827_v36, %v3841_v30 }
 0x26b   : > { %v3844_v46 = vcombine.high %v3827_v36, %v3841_v30  ;;  %v4641_v47 = vpack.c.bf16 %v3465_v37, %v6708_v5  ;;  %3812 = vrot.lane.b32.xlu1 %v3808_v44, %s5390_s30  ;;  %v3842_v32 = vcombine.high %v3809_v14, %v5391_v38 }
 0x26c   : > { %v3753_v48 = vpack.i.b16 %v3748_v41, %v3681_v40  ;;  %v3755_v49 = vshrl.u32 %v3748_v41, 16  ;;  %v3759_v50 = vpack.i.b16 %v3749_v42, %v3682_v25  ;;  %v3761_v51 = vshrl.u32 %v3749_v42, 16 }
 0x26d   : > { %v3765_v63 = vpack.i.b16 %v3750_v43, %v3683_v26  ;;  %v3834_v52 = vrot.slane %v4641_v47, %v6677_v28  ;;  %v3851_v2 = vrot.slane %v3843_v45, %v6690_v34  ;;  %v3858_v4 = vrot.slane %v3844_v46, %v6690_v34 }
 0x26e   : > { %v3756_v53 = vpack.i.b16 %v3755_v49, %v3754_v35  ;;  %v3762_v55 = vpack.i.b16 %v3761_v51, %v3760_v39  ;;  %v4630_v5 = vcombine.low %v3753_v48, %v3753_v48  ;;  %v4631_v56 = vcombine.high %v3753_v48, %v3753_v48 }
 0x26f   : > { %v4634_v57 = vcombine.low %v3759_v50, %v3759_v50  ;;  %v4635_v58 = vcombine.high %v3759_v50, %v3759_v50  ;;  %v4638_v59 = vcombine.low %v3765_v63, %v3765_v63  ;;  %v4639_v60 = vcombine.high %v3765_v63, %v3765_v63  ;;  %3816 = vrot.lane.b32.xlu1 %v3809_v14, %s5390_s30 }
 0x270   : > { %v4632_v61 = vcombine.low %v3756_v53, %v3756_v53  ;;  %v4633_v62 = vcombine.high %v3756_v53, %v3756_v53  ;;  %v4636_v11 = vcombine.low %v3762_v55, %v3762_v55  ;;  %v4637_v0 = vcombine.high %v3762_v55, %v3762_v55  ;;  %3797 = vst.msk [vmem:[%s205_s7] sm:$0xf] %vm3796_vm0, %v4630_v5 }
 0x271   : > { %3799 = vst.msk [vmem:[%s205_s7 + $0x4] sm:$0x3] %vm3798_vm1, %v4631_v56  ;;  %3803 = vst.msk [vmem:[%s205_s7 + $0x14] sm:$0x3] %vm3798_vm1, %v4635_v58  ;;  %v3859_v1 = vcombine.low %v3834_v52, %v3842_v32  ;;  %v3867_v8 = vcombine.high %v3851_v2, %v5391_v38  ;;  %v3868_v10 = vcombine.high %v3858_v4, %v5391_v38  ;;  %v3917_v19 = vshrl.u32 %v3851_v2, 16 }
 0x272   : > { %3802 = vst.msk [vmem:[%s205_s7 + $0x10] sm:$0xf] %vm3796_vm0, %v4634_v57  ;;  %3806 = vst.msk [vmem:[%s205_s7 + $0x20] sm:$0xf] %vm3796_vm0, %v4638_v59  ;;  %v3933_v21 = vshrl.u32 %v3858_v4, 16 }
 0x273   : > { %3807 = vst.msk [vmem:[%s205_s7 + $0x24] sm:$0x3] %vm3798_vm1, %v4639_v60  ;;  %3801 = vst.msk [vmem:[%s205_s7 + $0xc] sm:$0x3] %vm3798_vm1, %v4633_v62  ;;  %v3866_v6 = vrot.slane %v3859_v1, %v6690_v34  ;;  %v3925_v20 = vshrl.u32 %v3867_v8, 16  ;;  %v3941_v24 = vshrl.u32 %v3868_v10, 16 }
 0x274   : > { %3800 = vst.msk [vmem:[%s205_s7 + $0x8] sm:$0xf] %vm3796_vm0, %v4632_v61  ;;  %3804 = vst.msk [vmem:[%s205_s7 + $0x18] sm:$0xf] %vm3796_vm0, %v4636_v11 }
 0x275   : > { %3805 = vst.msk [vmem:[%s205_s7 + $0x1c] sm:$0x3] %vm3798_vm1, %v4637_v0  ;;  %v3869_v15 = vcombine.high %v3866_v6, %v5391_v38  ;;  %v3948_v25 = vshrl.u32 %v3866_v6, 16 }
 0x277   : > { %v3954_v27 = vshrl.u32 %v3869_v15, 16 }
 0x2dd   : > { %v3813_v3 = vpop.permute.xlu1 %3812 }
 0x2de   : > { %v3876_v9 = vrot.slane %v3813_v3, %v6677_v28 }
 0x2e1   : > { %v3817_v7 = vpop.permute.xlu1 %3816 }
 0x2e2   : > { %v3884_v12 = vrot.slane %v3817_v7, %v6677_v28  ;;  %v4642_v13 = vcombine.high %v3813_v3, %v3817_v7 }
 0x2e4   : > { %v3886_v16 = vcombine.low %v3876_v9, %v3884_v12  ;;  %v3887_v17 = vcombine.high %v3876_v9, %v3884_v12  ;;  %v3909_v18 = vrot.slane %v4642_v13, %v6690_v34 }
 0x2e6   : > { %v3894_v14 = vrot.slane %v3886_v16, %v6690_v34  ;;  %v3901_v22 = vrot.slane %v3887_v17, %v6690_v34  ;;  %v3912_v23 = vcombine.high %v3909_v18, %v5391_v38  ;;  %v3947_v40 = vpack.i.b16 %v3909_v18, %v3866_v6 }
 0x2e7   : > { %v3949_v26 = vshrl.u32 %v3909_v18, 16 }
 0x2e8   : > { %v3910_v29 = vcombine.high %v3894_v14, %v5391_v38  ;;  %v3911_v31 = vcombine.high %v3901_v22, %v5391_v38  ;;  %v3915_v54 = vpack.i.b16 %v3894_v14, %v3851_v2  ;;  %v3918_v33 = vshrl.u32 %v3894_v14, 16 }
 0x2e9   : > { %v3931_v35 = vpack.i.b16 %v3901_v22, %v3858_v4  ;;  %v3934_v36 = vshrl.u32 %v3901_v22, 16  ;;  %v3950_v30 = vpack.i.b16 %v3949_v26, %v3948_v25  ;;  %v3953_v37 = vpack.i.b16 %v3912_v23, %v3869_v15 }
 0x2ea   : > { %v3919_v41 = vpack.i.b16 %v3918_v33, %v3917_v19  ;;  %v3923_v42 = vpack.i.b16 %v3910_v29, %v3867_v8  ;;  %v3926_v43 = vshrl.u32 %v3910_v29, 16  ;;  %v3939_v44 = vpack.i.b16 %v3911_v31, %v3868_v10 }
 0x2eb   : > { %v3935_v39 = vpack.i.b16 %v3934_v36, %v3933_v21  ;;  %v3942_v45 = vshrl.u32 %v3911_v31, 16  ;;  %v3955_v46 = vshrl.u32 %v3912_v23, 16  ;;  %v3957_v47 = vcombine.low %v3915_v54, %v3931_v35 }
 0x2ec   : > { %v3927_v48 = vpack.i.b16 %v3926_v43, %v3925_v20  ;;  %v3965_v49 = vcombine.low %v3923_v42, %v3939_v44  ;;  %v3980_v50 = vrot.slane %v3947_v40, %v6677_v28  ;;  %v3988_v38 = vrot.slane %v3953_v37, %v6677_v28 }
 0x2ed   : > { %v3943_v51 = vpack.i.b16 %v3942_v45, %v3941_v24  ;;  %v3956_v63 = vpack.i.b16 %v3955_v46, %v3954_v27  ;;  %v4024_v32 = vcombine.low %v3919_v41, %v3935_v39  ;;  %v3964_v52 = vrot.slane %v3957_v47, %v6677_v28 }
 0x2ee   : > { %v3972_v53 = vrot.slane %v3965_v49, %v6677_v28  ;;  %v4005_v55 = vcombine.low %v3980_v50, %v3988_v38  ;;  %v4006_v5 = vcombine.high %v3980_v50, %v3988_v38  ;;  %v4047_v57 = vrot.slane %v3950_v30, %v6677_v28 }
 0x2ef   : > { %v4032_v56 = vcombine.low %v3927_v48, %v3943_v51  ;;  %v4055_v58 = vrot.slane %v3956_v63, %v6677_v28  ;;  %v4031_v61 = vrot.slane %v4024_v32, %v6677_v28 }
 0x2f0   : > { %v3989_v59 = vcombine.low %v3964_v52, %v3972_v53  ;;  %v3990_v60 = vcombine.high %v3964_v52, %v3972_v53  ;;  %v4013_v3 = vrot.slane %v4005_v55, %v6690_v34  ;;  %v4020_v4 = vrot.slane %v4006_v5, %v6690_v34 }
 0x2f1   : > { %v4039_v62 = vrot.slane %v4032_v56, %v6677_v28  ;;  %v4072_v11 = vcombine.low %v4047_v57, %v4055_v58  ;;  %v4073_v0 = vcombine.high %v4047_v57, %v4055_v58 }
 0x2f2   : > { %v3997_v1 = vrot.slane %v3989_v59, %v6690_v34  ;;  %v4004_v2 = vrot.slane %v3990_v60, %v6690_v34 }
 0x2f3   : > { %v4056_v6 = vcombine.low %v4031_v61, %v4039_v62  ;;  %v4057_v7 = vcombine.high %v4031_v61, %v4039_v62  ;;  %v4080_v13 = vrot.slane %v4072_v11, %v6690_v34  ;;  %v4087_v15 = vrot.slane %v4073_v0, %v6690_v34 }
 0x2f4   : > { %v4021_v8 = vcombine.low %v3997_v1, %v4013_v3  ;;  %v4022_v9 = vcombine.high %v3997_v1, %v4013_v3  ;;  %v4023_v10 = vcombine.low %v4004_v2, %v4020_v4 }
 0x2f5   : > { %v4064_v12 = vrot.slane %v4056_v6, %v6690_v34  ;;  %v4071_v28 = vrot.slane %v4057_v7, %v6690_v34 }
 0x2f6   : > { %v4094_v19 = vshrl.u32 %v4021_v8, 16  ;;  %v4100_v20 = vshrl.u32 %v4022_v9, 16 }
 0x2f7   : > { %v4088_v16 = vcombine.low %v4064_v12, %v4080_v13  ;;  %v4089_v17 = vcombine.high %v4064_v12, %v4080_v13  ;;  %v4090_v18 = vcombine.low %v4071_v28, %v4087_v15 }
 0x2f9   : > { %v4093_v21 = vpack.i.b16 %v4088_v16, %v4021_v8  ;;  %v4095_v14 = vshrl.u32 %v4088_v16, 16  ;;  %v4099_v22 = vpack.i.b16 %v4089_v17, %v4022_v9  ;;  %v4101_v23 = vshrl.u32 %v4089_v17, 16 }
 0x2fa   : > { %v4105_v24 = vpack.i.b16 %v4090_v18, %v4023_v10 }
 0x2fb   : > { %v4096_v40 = vpack.i.b16 %v4095_v14, %v4094_v19  ;;  %v4102_v25 = vpack.i.b16 %v4101_v23, %v4100_v20  ;;  %v4643_v26 = vcombine.low %v4093_v21, %v4093_v21  ;;  %v4644_v27 = vcombine.high %v4093_v21, %v4093_v21 }
 0x2fc   : > { %v4647_v34 = vcombine.low %v4099_v22, %v4099_v22  ;;  %v4648_v29 = vcombine.high %v4099_v22, %v4099_v22  ;;  %v4651_v31 = vcombine.low %v4105_v24, %v4105_v24  ;;  %v4652_v54 = vcombine.high %v4105_v24, %v4105_v24 }
 0x2fd   : > { %v4645_v33 = vcombine.low %v4096_v40, %v4096_v40  ;;  %v4646_v35 = vcombine.high %v4096_v40, %v4096_v40  ;;  %v4649_v36 = vcombine.low %v4102_v25, %v4102_v25  ;;  %v4650_v30 = vcombine.high %v4102_v25, %v4102_v25  ;;  %4136 = vst.msk [vmem:[%s210_s10] sm:$0xf] %vm3796_vm0, %v4643_v26 }
 0x2fe   : > { %4137 = vst.msk [vmem:[%s210_s10 + $0x4] sm:$0x3] %vm3798_vm1, %v4644_v27  ;;  %4141 = vst.msk [vmem:[%s210_s10 + $0x14] sm:$0x3] %vm3798_vm1, %v4648_v29 }
 0x2ff   : > { %4140 = vst.msk [vmem:[%s210_s10 + $0x10] sm:$0xf] %vm3796_vm0, %v4647_v34  ;;  %4144 = vst.msk [vmem:[%s210_s10 + $0x20] sm:$0xf] %vm3796_vm0, %v4651_v31 }
 0x300   : > { %4145 = vst.msk [vmem:[%s210_s10 + $0x24] sm:$0x3] %vm3798_vm1, %v4652_v54  ;;  %4139 = vst.msk [vmem:[%s210_s10 + $0xc] sm:$0x3] %vm3798_vm1, %v4646_v35 }
 0x301   : > { %4138 = vst.msk [vmem:[%s210_s10 + $0x8] sm:$0xf] %vm3796_vm0, %v4645_v33  ;;  %4142 = vst.msk [vmem:[%s210_s10 + $0x18] sm:$0xf] %vm3796_vm0, %v4649_v36 }
 0x302   : > { %4143 = vst.msk [vmem:[%s210_s10 + $0x1c] sm:$0x3] %vm3798_vm1, %v4650_v30 }
 0x303 PF: > { %s15_s15 = sadd.s32 1, %s5387_s15  }
 0x304   : > { %p12_p4 = scmp.ge.s32.totalorder %s15_s15, 4  }
 0x306   :  { %14 = sbr.rel (!%p12_p4) target bundleno = 1 (0x1), region = 74 }

</bundles_post_ra>
